<compile_context>
chip_gen: v5e
topology: v5e:2x2
jax: 0.10.0
libtpu: 0.0.40
codegen_flags: <defaults>
</compile_context>

<pallas_src>
import jax
import jax.numpy as jnp
from jax.experimental import pallas as pl
from jax.experimental.pallas import tpu as pltpu


def _round_up(n, m):
  return ((n + m - 1) // m) * m


def _reorder_gates(w):
  """Permute PyTorch gate blocks [i, f, g, o] (axis 0) -> [i, f, o, g]."""
  four_h = w.shape[0]
  H = four_h // 4
  return jnp.concatenate(
      [w[0 * H:1 * H], w[1 * H:2 * H], w[3 * H:4 * H], w[2 * H:3 * H]], axis=0)


# -----------------------------------------------------------------------------
# Fused kernel factory (all layers + both directions + classifier)
# -----------------------------------------------------------------------------
def _make_fused_lstm_kernel(*, T, Bt, F, H, C, num_layers, directions,
                            compute_dtype):
  f32 = jnp.float32
  n_lstm_refs = 3 * num_layers * directions

  def kernel(*refs):
    # Ref layout: [x3d, (w_ih_t, w_hh_t, bias) * L * D, w_cls_t, b_cls,
    #              out, seq_scratch * min(L-1, 2)]
    x_ref = refs[0]
    w_refs = refs[1:1 + n_lstm_refs]
    wcls_ref = refs[1 + n_lstm_refs]
    bcls_ref = refs[2 + n_lstm_refs]
    out_ref = refs[3 + n_lstm_refs]
    seq_refs = refs[4 + n_lstm_refs:]          # ping-pong VMEM scratch buffers

    def run_layer(x2d, layer, seq_out_ref):
      """One LSTM layer; fwd & bwd interleaved in a single unrolled loop."""
      wih, whh, bias = [], [], []
      for d in range(directions):
        base = 3 * (layer * directions + d)
        wih.append(w_refs[base][...])          # (Kin, 4H)  compute_dtype
        whh.append(w_refs[base + 1][...])      # (H, 4H)    compute_dtype
        bias.append(w_refs[base + 2][...])     # (1, 4H)    f32

      # Hoisted input projection: ONE (T*Bt, Kin) x (Kin, 4H) matmul per
      # direction, bias folded in once (outside the time loop).
      gx = [jnp.dot(x2d, wih[d], preferred_element_type=f32) + bias[d]
            for d in range(directions)]        # each (T*Bt, 4H) f32

      h = [jnp.zeros((Bt, H), f32) for _ in range(directions)]
      c = [jnp.zeros((Bt, H), f32) for _ in range(directions)]

      # Interleave: fwd step t and bwd step T-1-t share an unrolled iteration
      # so the two independent recurrence chains hide each other's latency.
      # TODO(synk): for production T (>~16) switch to lax.fori_loop over a
      # gx VMEM scratch (unroll=4-8) to bound vreg pressure; for the toy T=8
      # the full static unroll is best (per review).
      for t in range(T):
        for d in range(directions):
          tt = t if d == 0 else T - 1 - t
          g = gx[d][tt * Bt:(tt + 1) * Bt, :] + jnp.dot(
              h[d].astype(compute_dtype), whh[d], preferred_element_type=f32)
          # Gate columns were reordered in the wrapper to [i, f, o, g]:
          # sigmoid over ONE contiguous 3H slice, tanh over ONE H slice.
          sig = jax.nn.sigmoid(g[:, :3 * H])
          g_g = jnp.tanh(g[:, 3 * H:])
          i_g = sig[:, 0 * H:1 * H]
          f_g = sig[:, 1 * H:2 * H]
          o_g = sig[:, 2 * H:3 * H]
          c[d] = f_g * c[d] + i_g * g_g
          h[d] = o_g * jnp.tanh(c[d])
          if seq_out_ref is not None:          # skipped for the last layer
            seq_out_ref[tt * Bt:(tt + 1) * Bt, d * H:(d + 1) * H] = (
                h[d].astype(seq_out_ref.dtype))
      return h                                 # final hidden per direction

    # Layer 0 input: (T, Bt, F) -> (T*Bt, F); leading-dim collapse only
    # (Bt is a sublane multiple), so this reshape is layout-preserving.
    layer_in = x_ref[...].reshape(T * Bt, F)
    h_final = None
    for layer in range(num_layers):
      last = layer == num_layers - 1
      seq_out = None if last else seq_refs[layer % len(seq_refs)]
      h_final = run_layer(layer_in, layer, seq_out)
      if not last:
        layer_in = seq_out[...]                # (T*Bt, directions*H)

    # Classifier on hn of the last layer; the fwd/bwd concat is folded into
    # row-blocks of the pre-transposed classifier weight.
    wcls = wcls_ref[...]                       # (directions*H, C)
    logits = bcls_ref[...]                     # (1, C) f32 -> broadcasts
    for d in range(directions):
      logits = logits + jnp.dot(h_final[d].astype(compute_dtype),
                                wcls[d * H:(d + 1) * H, :],
                                preferred_element_type=f32)
    out_ref[...] = logits.astype(out_ref.dtype)

  return kernel


# -----------------------------------------------------------------------------
# Wrapper
# -----------------------------------------------------------------------------
def lstm_model_v2_forward(x, params, *, num_layers, bidirectional,
                          compute_dtype=jnp.float32, batch_tile=None):
  """x: (B, T, mfcc) -> logits (B, num_classes). Matches the PyTorch forward.

  compute_dtype: dtype of the MXU matmul operands (accumulation & gate math
  stay f32). Use jnp.bfloat16 on v6e/v7x for higher MXU rate; default f32 for
  exact parity with PyTorch.
  batch_tile: batch rows per grid step. None = whole (padded) batch in one
  tile (best on single-TC v5e/v6e). Set ~Bp//2 on v7x to use both TCs.
  """
  B, T, F = x.shape
  directions = 2 if bidirectional else 1
  H = params["lstm"][(0, 0)][1].shape[1]                 # w_hh: (4H, H)
  w_cls, b_cls = params["classifier"]
  C = w_cls.shape[0]

  # Sublane packing: 8 rows for 4-byte dtypes, 16 for 2-byte (bf16).
  sub = 8 if jnp.dtype(compute_dtype).itemsize == 4 else 16
  Bt = _round_up(batch_tile if batch_tile is not None else B, sub)
  Bt = max(Bt, sub)
  n_tiles = max(1, -(-B // Bt))
  Bp = n_tiles * Bt

  # Time-major, batch-padded, pre-cast input: (T, Bp, F).
  x_tm = jnp.transpose(x, (1, 0, 2))
  x_tm = jnp.pad(x_tm, ((0, 0), (0, Bp - B), (0, 0))).astype(compute_dtype)

  inputs = [x_tm]
  in_specs = [pl.BlockSpec((T, Bt, F), lambda i: (0, i, 0))]

  def shared(a):      # replicated 2-D operand: same block for every grid step
    inputs.append(a)
    in_specs.append(pl.BlockSpec(a.shape, lambda i: (0, 0)))

  for layer in range(num_layers):
    for d in range(directions):
      w_ih, w_hh, b_ih, b_hh = params["lstm"][(layer, d)]
      shared(_reorder_gates(w_ih).T.astype(compute_dtype))     # (Kin, 4H)
      shared(_reorder_gates(w_hh).T.astype(compute_dtype))     # (H, 4H)
      shared(_reorder_gates(b_ih + b_hh).reshape(1, -1)
             .astype(jnp.float32))                             # (1, 4H)
  shared(w_cls.T.astype(compute_dtype))                        # (dirs*H, C)
  shared(b_cls.reshape(1, -1).astype(jnp.float32))             # (1, C)

  kernel = _make_fused_lstm_kernel(
      T=T, Bt=Bt, F=F, H=H, C=C, num_layers=num_layers,
      directions=directions, compute_dtype=compute_dtype)

  # Ping-pong inter-layer sequence scratch (only if there is >1 layer).
  n_scratch = min(num_layers - 1, 2)
  scratch_shapes = [pltpu.VMEM((T * Bt, directions * H), compute_dtype)
                    for _ in range(n_scratch)]

  # Advisory cost estimate so XLA schedules the custom call sensibly.
  flops = 0
  in_size = F
  for _ in range(num_layers):
    flops += directions * 2 * T * Bp * (in_size + H) * 4 * H
    in_size = H * directions
  flops += 2 * Bp * H * directions * C
  transcendentals = num_layers * directions * T * Bp * 5 * H
  bytes_accessed = int(sum(a.size * a.dtype.itemsize for a in inputs)) + Bp * C * 4

  logits_padded = pl.pallas_call(
      kernel,
      grid=(n_tiles,),
      out_shape=jax.ShapeDtypeStruct((Bp, C), jnp.float32),
      in_specs=in_specs,
      out_specs=pl.BlockSpec((Bt, C), lambda i: (i, 0)),
      scratch_shapes=scratch_shapes,
      compiler_params=pltpu.CompilerParams(
          dimension_semantics=("parallel",)),
      cost_estimate=pl.CostEstimate(flops=flops,
                                    transcendentals=transcendentals,
                                    bytes_accessed=bytes_accessed),
  )(*inputs)
  return logits_padded[:B]


# -----------------------------------------------------------------------------
# Deterministic parameter init (PyTorch-style uniform(-1/sqrt(H), 1/sqrt(H)))
# -----------------------------------------------------------------------------
def init_params(key, *, num_classes, mfcc_size, hidden_size, num_layers,
                bidirectional):
  directions = 2 if bidirectional else 1
  k_lstm = 1.0 / jnp.sqrt(hidden_size)
  params = {"lstm": {}}
  for layer in range(num_layers):
    in_size = mfcc_size if layer == 0 else hidden_size * directions
    for d in range(directions):
      key, k1, k2, k3, k4 = jax.random.split(key, 5)
      w_ih = jax.random.uniform(k1, (4 * hidden_size, in_size),
                                jnp.float32, -k_lstm, k_lstm)
      w_hh = jax.random.uniform(k2, (4 * hidden_size, hidden_size),
                                jnp.float32, -k_lstm, k_lstm)
      b_ih = jax.random.uniform(k3, (4 * hidden_size,),
                                jnp.float32, -k_lstm, k_lstm)
      b_hh = jax.random.uniform(k4, (4 * hidden_size,),
                                jnp.float32, -k_lstm, k_lstm)
      params["lstm"][(layer, d)] = (w_ih, w_hh, b_ih, b_hh)

  in_feat = hidden_size * directions
  k_cls = 1.0 / jnp.sqrt(in_feat)
  key, k1, k2 = jax.random.split(key, 3)
  w_cls = jax.random.uniform(k1, (num_classes, in_feat),
                             jnp.float32, -k_cls, k_cls)
  b_cls = jax.random.uniform(k2, (num_classes,),
                             jnp.float32, -k_cls, k_cls)
  params["classifier"] = (w_cls, b_cls)
  return params


# -----------------------------------------------------------------------------
if __name__ == "__main__":
  B, T = 2, 8           # batch, sequence length
  MFCC = 16             # mfcc_size (LSTM input size)
  HIDDEN = 32           # hidden_size
  NUM_LAYERS = 2
  NUM_CLASSES = 5
  BIDIRECTIONAL = True

  key = jax.random.PRNGKey(0)
  key, xk = jax.random.split(key)
  x = jax.random.normal(xk, (B, T, MFCC), jnp.float32)

  params = init_params(key, num_classes=NUM_CLASSES, mfcc_size=MFCC,
                       hidden_size=HIDDEN, num_layers=NUM_LAYERS,
                       bidirectional=BIDIRECTIONAL)

  @jax.jit
  def forward(x_in, p):
    return lstm_model_v2_forward(x_in, p, num_layers=NUM_LAYERS,
                                 bidirectional=BIDIRECTIONAL)

  out = forward(x, params)
  out = jax.block_until_ready(out)
  assert out.shape == (B, NUM_CLASSES), out.shape
  print("KERNEL_OK")
</pallas_src>

<mosaic_0001>
module attributes {stable_mosaic.version = 11 : i64} {
  func.func @kernel(%arg0: i32, %arg1: memref<8x8x16xf32, #tpu.memory_space<vmem>>, %arg2: memref<16x128xf32, #tpu.memory_space<vmem>>, %arg3: memref<32x128xf32, #tpu.memory_space<vmem>>, %arg4: memref<1x128xf32, #tpu.memory_space<vmem>>, %arg5: memref<16x128xf32, #tpu.memory_space<vmem>>, %arg6: memref<32x128xf32, #tpu.memory_space<vmem>>, %arg7: memref<1x128xf32, #tpu.memory_space<vmem>>, %arg8: memref<64x128xf32, #tpu.memory_space<vmem>>, %arg9: memref<32x128xf32, #tpu.memory_space<vmem>>, %arg10: memref<1x128xf32, #tpu.memory_space<vmem>>, %arg11: memref<64x128xf32, #tpu.memory_space<vmem>>, %arg12: memref<32x128xf32, #tpu.memory_space<vmem>>, %arg13: memref<1x128xf32, #tpu.memory_space<vmem>>, %arg14: memref<64x5xf32, #tpu.memory_space<vmem>>, %arg15: memref<1x5xf32, #tpu.memory_space<vmem>>, %arg16: memref<8x5xf32, #tpu.memory_space<vmem>>, %arg17: memref<64x64xf32, #tpu.memory_space<vmem>>) attributes {dimension_semantics = [#tpu.dimension_semantics<parallel>], iteration_bounds = array<i64: 1>, scalar_prefetch = 0 : i64, scratch_operands = 1 : i64, tpu.core_type = #tpu.core_type<tc>, window_params = [{transform_indices = @transform_0, window_bounds = array<i64: 8, 8, 16>}, {pipeline_mode = #tpu.pipeline_mode<synchronous>, transform_indices = @transform_1, window_bounds = array<i64: 16, 128>}, {pipeline_mode = #tpu.pipeline_mode<synchronous>, transform_indices = @transform_2, window_bounds = array<i64: 32, 128>}, {pipeline_mode = #tpu.pipeline_mode<synchronous>, transform_indices = @transform_3, window_bounds = array<i64: 1, 128>}, {pipeline_mode = #tpu.pipeline_mode<synchronous>, transform_indices = @transform_4, window_bounds = array<i64: 16, 128>}, {pipeline_mode = #tpu.pipeline_mode<synchronous>, transform_indices = @transform_5, window_bounds = array<i64: 32, 128>}, {pipeline_mode = #tpu.pipeline_mode<synchronous>, transform_indices = @transform_6, window_bounds = array<i64: 1, 128>}, {pipeline_mode = #tpu.pipeline_mode<synchronous>, transform_indices = @transform_7, window_bounds = array<i64: 64, 128>}, {pipeline_mode = #tpu.pipeline_mode<synchronous>, transform_indices = @transform_8, window_bounds = array<i64: 32, 128>}, {pipeline_mode = #tpu.pipeline_mode<synchronous>, transform_indices = @transform_9, window_bounds = array<i64: 1, 128>}, {pipeline_mode = #tpu.pipeline_mode<synchronous>, transform_indices = @transform_10, window_bounds = array<i64: 64, 128>}, {pipeline_mode = #tpu.pipeline_mode<synchronous>, transform_indices = @transform_11, window_bounds = array<i64: 32, 128>}, {pipeline_mode = #tpu.pipeline_mode<synchronous>, transform_indices = @transform_12, window_bounds = array<i64: 1, 128>}, {pipeline_mode = #tpu.pipeline_mode<synchronous>, transform_indices = @transform_13, window_bounds = array<i64: 64, 5>}, {pipeline_mode = #tpu.pipeline_mode<synchronous>, transform_indices = @transform_14, window_bounds = array<i64: 1, 5>}, {transform_indices = @transform_15, window_bounds = array<i64: 8, 5>}]} {
    %c0 = arith.constant 0 : index
    %c0_0 = arith.constant 0 : index
    %c0_1 = arith.constant 0 : index
    %0 = vector.load %arg1[%c0, %c0_0, %c0_1] : memref<8x8x16xf32, #tpu.memory_space<vmem>>, vector<8x8x16xf32>
    %1 = vector.shape_cast %0 : vector<8x8x16xf32> to vector<64x16xf32>
    %c0_2 = arith.constant 0 : index
    %c0_3 = arith.constant 0 : index
    %2 = vector.load %arg2[%c0_2, %c0_3] : memref<16x128xf32, #tpu.memory_space<vmem>>, vector<16x128xf32>
    %c0_4 = arith.constant 0 : index
    %c0_5 = arith.constant 0 : index
    %3 = vector.load %arg3[%c0_4, %c0_5] : memref<32x128xf32, #tpu.memory_space<vmem>>, vector<32x128xf32>
    %c0_6 = arith.constant 0 : index
    %c0_7 = arith.constant 0 : index
    %4 = vector.load %arg4[%c0_6, %c0_7] : memref<1x128xf32, #tpu.memory_space<vmem>>, vector<1x128xf32>
    %c0_8 = arith.constant 0 : index
    %c0_9 = arith.constant 0 : index
    %5 = vector.load %arg5[%c0_8, %c0_9] : memref<16x128xf32, #tpu.memory_space<vmem>>, vector<16x128xf32>
    %c0_10 = arith.constant 0 : index
    %c0_11 = arith.constant 0 : index
    %6 = vector.load %arg6[%c0_10, %c0_11] : memref<32x128xf32, #tpu.memory_space<vmem>>, vector<32x128xf32>
    %c0_12 = arith.constant 0 : index
    %c0_13 = arith.constant 0 : index
    %7 = vector.load %arg7[%c0_12, %c0_13] : memref<1x128xf32, #tpu.memory_space<vmem>>, vector<1x128xf32>
    %cst = arith.constant dense<0.000000e+00> : vector<64x128xf32>
    %8 = tpu.matmul %1, %2, %cst {dimension_numbers = #tpu.dot_dimension_numbers<[1], [0], [0], [1], [0, 0, 1, 1], [], []>} : vector<64x16xf32>, vector<16x128xf32>, vector<64x128xf32> -> vector<64x128xf32>
    %9 = vector.broadcast %4 : vector<1x128xf32> to vector<64x128xf32>
    %10 = arith.addf %8, %9 : vector<64x128xf32>
    %cst_14 = arith.constant dense<0.000000e+00> : vector<64x128xf32>
    %11 = tpu.matmul %1, %5, %cst_14 {dimension_numbers = #tpu.dot_dimension_numbers<[1], [0], [0], [1], [0, 0, 1, 1], [], []>} : vector<64x16xf32>, vector<16x128xf32>, vector<64x128xf32> -> vector<64x128xf32>
    %12 = vector.broadcast %7 : vector<1x128xf32> to vector<64x128xf32>
    %13 = arith.addf %11, %12 : vector<64x128xf32>
    %cst_15 = arith.constant 0.000000e+00 : f32
    %14 = vector.broadcast %cst_15 : f32 to vector<8x32xf32>
    %cst_16 = arith.constant 0.000000e+00 : f32
    %15 = vector.broadcast %cst_16 : f32 to vector<8x32xf32>
    %cst_17 = arith.constant 0.000000e+00 : f32
    %16 = vector.broadcast %cst_17 : f32 to vector<8x32xf32>
    %cst_18 = arith.constant 0.000000e+00 : f32
    %17 = vector.broadcast %cst_18 : f32 to vector<8x32xf32>
    %18 = vector.extract_strided_slice %10 {offsets = [0, 0], sizes = [8, 128], strides = [1, 1]} : vector<64x128xf32> to vector<8x128xf32>
    %cst_19 = arith.constant dense<0.000000e+00> : vector<8x128xf32>
    %19 = tpu.matmul %14, %3, %cst_19 {dimension_numbers = #tpu.dot_dimension_numbers<[1], [0], [0], [1], [0, 0, 1, 1], [], []>} : vector<8x32xf32>, vector<32x128xf32>, vector<8x128xf32> -> vector<8x128xf32>
    %20 = arith.addf %18, %19 : vector<8x128xf32>
    %21 = vector.extract_strided_slice %20 {offsets = [0, 0], sizes = [8, 96], strides = [1, 1]} : vector<8x128xf32> to vector<8x96xf32>
    %22 = arith.negf %21 : vector<8x96xf32>
    %23 = math.exp %22 : vector<8x96xf32>
    %cst_20 = arith.constant 1.000000e+00 : f32
    %24 = vector.broadcast %cst_20 : f32 to vector<8x96xf32>
    %25 = arith.addf %24, %23 : vector<8x96xf32>
    %26 = arith.divf %24, %25 : vector<8x96xf32>
    %27 = vector.extract_strided_slice %20 {offsets = [0, 96], sizes = [8, 32], strides = [1, 1]} : vector<8x128xf32> to vector<8x32xf32>
    %28 = math.tanh %27 : vector<8x32xf32>
    %29 = vector.extract_strided_slice %26 {offsets = [0, 0], sizes = [8, 32], strides = [1, 1]} : vector<8x96xf32> to vector<8x32xf32>
    %30 = vector.extract_strided_slice %26 {offsets = [0, 32], sizes = [8, 32], strides = [1, 1]} : vector<8x96xf32> to vector<8x32xf32>
    %31 = vector.extract_strided_slice %26 {offsets = [0, 64], sizes = [8, 32], strides = [1, 1]} : vector<8x96xf32> to vector<8x32xf32>
    %32 = arith.mulf %30, %16 : vector<8x32xf32>
    %33 = arith.mulf %29, %28 : vector<8x32xf32>
    %34 = arith.addf %32, %33 : vector<8x32xf32>
    %35 = math.tanh %34 : vector<8x32xf32>
    %36 = arith.mulf %31, %35 : vector<8x32xf32>
    %c0_21 = arith.constant 0 : index
    %c0_22 = arith.constant 0 : index
    %37 = vector.load %arg17[%c0_21, %c0_22] : memref<64x64xf32, #tpu.memory_space<vmem>>, vector<8x32xf32>
    tpu.vector_store %arg17[%c0_21, %c0_22], %36 {strides = array<i32>} : memref<64x64xf32, #tpu.memory_space<vmem>>, vector<8x32xf32>,
    %38 = vector.extract_strided_slice %13 {offsets = [56, 0], sizes = [8, 128], strides = [1, 1]} : vector<64x128xf32> to vector<8x128xf32>
    %cst_23 = arith.constant dense<0.000000e+00> : vector<8x128xf32>
    %39 = tpu.matmul %15, %6, %cst_23 {dimension_numbers = #tpu.dot_dimension_numbers<[1], [0], [0], [1], [0, 0, 1, 1], [], []>} : vector<8x32xf32>, vector<32x128xf32>, vector<8x128xf32> -> vector<8x128xf32>
    %40 = arith.addf %38, %39 : vector<8x128xf32>
    %41 = vector.extract_strided_slice %40 {offsets = [0, 0], sizes = [8, 96], strides = [1, 1]} : vector<8x128xf32> to vector<8x96xf32>
    %42 = arith.negf %41 : vector<8x96xf32>
    %43 = math.exp %42 : vector<8x96xf32>
    %cst_24 = arith.constant 1.000000e+00 : f32
    %44 = vector.broadcast %cst_24 : f32 to vector<8x96xf32>
    %45 = arith.addf %44, %43 : vector<8x96xf32>
    %46 = arith.divf %44, %45 : vector<8x96xf32>
    %47 = vector.extract_strided_slice %40 {offsets = [0, 96], sizes = [8, 32], strides = [1, 1]} : vector<8x128xf32> to vector<8x32xf32>
    %48 = math.tanh %47 : vector<8x32xf32>
    %49 = vector.extract_strided_slice %46 {offsets = [0, 0], sizes = [8, 32], strides = [1, 1]} : vector<8x96xf32> to vector<8x32xf32>
    %50 = vector.extract_strided_slice %46 {offsets = [0, 32], sizes = [8, 32], strides = [1, 1]} : vector<8x96xf32> to vector<8x32xf32>
    %51 = vector.extract_strided_slice %46 {offsets = [0, 64], sizes = [8, 32], strides = [1, 1]} : vector<8x96xf32> to vector<8x32xf32>
    %52 = arith.mulf %50, %17 : vector<8x32xf32>
    %53 = arith.mulf %49, %48 : vector<8x32xf32>
    %54 = arith.addf %52, %53 : vector<8x32xf32>
    %55 = math.tanh %54 : vector<8x32xf32>
    %56 = arith.mulf %51, %55 : vector<8x32xf32>
    %c56 = arith.constant 56 : index
    %c32 = arith.constant 32 : index
    %57 = vector.load %arg17[%c56, %c32] : memref<64x64xf32, #tpu.memory_space<vmem>>, vector<8x32xf32>
    tpu.vector_store %arg17[%c56, %c32], %56 {strides = array<i32>} : memref<64x64xf32, #tpu.memory_space<vmem>>, vector<8x32xf32>,
    %58 = vector.extract_strided_slice %10 {offsets = [8, 0], sizes = [8, 128], strides = [1, 1]} : vector<64x128xf32> to vector<8x128xf32>
    %cst_25 = arith.constant dense<0.000000e+00> : vector<8x128xf32>
    %59 = tpu.matmul %36, %3, %cst_25 {dimension_numbers = #tpu.dot_dimension_numbers<[1], [0], [0], [1], [0, 0, 1, 1], [], []>} : vector<8x32xf32>, vector<32x128xf32>, vector<8x128xf32> -> vector<8x128xf32>
    %60 = arith.addf %58, %59 : vector<8x128xf32>
    %61 = vector.extract_strided_slice %60 {offsets = [0, 0], sizes = [8, 96], strides = [1, 1]} : vector<8x128xf32> to vector<8x96xf32>
    %62 = arith.negf %61 : vector<8x96xf32>
    %63 = math.exp %62 : vector<8x96xf32>
    %cst_26 = arith.constant 1.000000e+00 : f32
    %64 = vector.broadcast %cst_26 : f32 to vector<8x96xf32>
    %65 = arith.addf %64, %63 : vector<8x96xf32>
    %66 = arith.divf %64, %65 : vector<8x96xf32>
    %67 = vector.extract_strided_slice %60 {offsets = [0, 96], sizes = [8, 32], strides = [1, 1]} : vector<8x128xf32> to vector<8x32xf32>
    %68 = math.tanh %67 : vector<8x32xf32>
    %69 = vector.extract_strided_slice %66 {offsets = [0, 0], sizes = [8, 32], strides = [1, 1]} : vector<8x96xf32> to vector<8x32xf32>
    %70 = vector.extract_strided_slice %66 {offsets = [0, 32], sizes = [8, 32], strides = [1, 1]} : vector<8x96xf32> to vector<8x32xf32>
    %71 = vector.extract_strided_slice %66 {offsets = [0, 64], sizes = [8, 32], strides = [1, 1]} : vector<8x96xf32> to vector<8x32xf32>
    %72 = arith.mulf %70, %34 : vector<8x32xf32>
    %73 = arith.mulf %69, %68 : vector<8x32xf32>
    %74 = arith.addf %72, %73 : vector<8x32xf32>
    %75 = math.tanh %74 : vector<8x32xf32>
    %76 = arith.mulf %71, %75 : vector<8x32xf32>
    %c8 = arith.constant 8 : index
    %c0_27 = arith.constant 0 : index
    %77 = vector.load %arg17[%c8, %c0_27] : memref<64x64xf32, #tpu.memory_space<vmem>>, vector<8x32xf32>
    tpu.vector_store %arg17[%c8, %c0_27], %76 {strides = array<i32>} : memref<64x64xf32, #tpu.memory_space<vmem>>, vector<8x32xf32>,
    %78 = vector.extract_strided_slice %13 {offsets = [48, 0], sizes = [8, 128], strides = [1, 1]} : vector<64x128xf32> to vector<8x128xf32>
    %cst_28 = arith.constant dense<0.000000e+00> : vector<8x128xf32>
    %79 = tpu.matmul %56, %6, %cst_28 {dimension_numbers = #tpu.dot_dimension_numbers<[1], [0], [0], [1], [0, 0, 1, 1], [], []>} : vector<8x32xf32>, vector<32x128xf32>, vector<8x128xf32> -> vector<8x128xf32>
    %80 = arith.addf %78, %79 : vector<8x128xf32>
    %81 = vector.extract_strided_slice %80 {offsets = [0, 0], sizes = [8, 96], strides = [1, 1]} : vector<8x128xf32> to vector<8x96xf32>
    %82 = arith.negf %81 : vector<8x96xf32>
    %83 = math.exp %82 : vector<8x96xf32>
    %cst_29 = arith.constant 1.000000e+00 : f32
    %84 = vector.broadcast %cst_29 : f32 to vector<8x96xf32>
    %85 = arith.addf %84, %83 : vector<8x96xf32>
    %86 = arith.divf %84, %85 : vector<8x96xf32>
    %87 = vector.extract_strided_slice %80 {offsets = [0, 96], sizes = [8, 32], strides = [1, 1]} : vector<8x128xf32> to vector<8x32xf32>
    %88 = math.tanh %87 : vector<8x32xf32>
    %89 = vector.extract_strided_slice %86 {offsets = [0, 0], sizes = [8, 32], strides = [1, 1]} : vector<8x96xf32> to vector<8x32xf32>
    %90 = vector.extract_strided_slice %86 {offsets = [0, 32], sizes = [8, 32], strides = [1, 1]} : vector<8x96xf32> to vector<8x32xf32>
    %91 = vector.extract_strided_slice %86 {offsets = [0, 64], sizes = [8, 32], strides = [1, 1]} : vector<8x96xf32> to vector<8x32xf32>
    %92 = arith.mulf %90, %54 : vector<8x32xf32>
    %93 = arith.mulf %89, %88 : vector<8x32xf32>
    %94 = arith.addf %92, %93 : vector<8x32xf32>
    %95 = math.tanh %94 : vector<8x32xf32>
    %96 = arith.mulf %91, %95 : vector<8x32xf32>
    %c48 = arith.constant 48 : index
    %c32_30 = arith.constant 32 : index
    %97 = vector.load %arg17[%c48, %c32_30] : memref<64x64xf32, #tpu.memory_space<vmem>>, vector<8x32xf32>
    tpu.vector_store %arg17[%c48, %c32_30], %96 {strides = array<i32>} : memref<64x64xf32, #tpu.memory_space<vmem>>, vector<8x32xf32>,
    %98 = vector.extract_strided_slice %10 {offsets = [16, 0], sizes = [8, 128], strides = [1, 1]} : vector<64x128xf32> to vector<8x128xf32>
    %cst_31 = arith.constant dense<0.000000e+00> : vector<8x128xf32>
    %99 = tpu.matmul %76, %3, %cst_31 {dimension_numbers = #tpu.dot_dimension_numbers<[1], [0], [0], [1], [0, 0, 1, 1], [], []>} : vector<8x32xf32>, vector<32x128xf32>, vector<8x128xf32> -> vector<8x128xf32>
    %100 = arith.addf %98, %99 : vector<8x128xf32>
    %101 = vector.extract_strided_slice %100 {offsets = [0, 0], sizes = [8, 96], strides = [1, 1]} : vector<8x128xf32> to vector<8x96xf32>
    %102 = arith.negf %101 : vector<8x96xf32>
    %103 = math.exp %102 : vector<8x96xf32>
    %cst_32 = arith.constant 1.000000e+00 : f32
    %104 = vector.broadcast %cst_32 : f32 to vector<8x96xf32>
    %105 = arith.addf %104, %103 : vector<8x96xf32>
    %106 = arith.divf %104, %105 : vector<8x96xf32>
    %107 = vector.extract_strided_slice %100 {offsets = [0, 96], sizes = [8, 32], strides = [1, 1]} : vector<8x128xf32> to vector<8x32xf32>
    %108 = math.tanh %107 : vector<8x32xf32>
    %109 = vector.extract_strided_slice %106 {offsets = [0, 0], sizes = [8, 32], strides = [1, 1]} : vector<8x96xf32> to vector<8x32xf32>
    %110 = vector.extract_strided_slice %106 {offsets = [0, 32], sizes = [8, 32], strides = [1, 1]} : vector<8x96xf32> to vector<8x32xf32>
    %111 = vector.extract_strided_slice %106 {offsets = [0, 64], sizes = [8, 32], strides = [1, 1]} : vector<8x96xf32> to vector<8x32xf32>
    %112 = arith.mulf %110, %74 : vector<8x32xf32>
    %113 = arith.mulf %109, %108 : vector<8x32xf32>
    %114 = arith.addf %112, %113 : vector<8x32xf32>
    %115 = math.tanh %114 : vector<8x32xf32>
    %116 = arith.mulf %111, %115 : vector<8x32xf32>
    %c16 = arith.constant 16 : index
    %c0_33 = arith.constant 0 : index
    %117 = vector.load %arg17[%c16, %c0_33] : memref<64x64xf32, #tpu.memory_space<vmem>>, vector<8x32xf32>
    tpu.vector_store %arg17[%c16, %c0_33], %116 {strides = array<i32>} : memref<64x64xf32, #tpu.memory_space<vmem>>, vector<8x32xf32>,
    %118 = vector.extract_strided_slice %13 {offsets = [40, 0], sizes = [8, 128], strides = [1, 1]} : vector<64x128xf32> to vector<8x128xf32>
    %cst_34 = arith.constant dense<0.000000e+00> : vector<8x128xf32>
    %119 = tpu.matmul %96, %6, %cst_34 {dimension_numbers = #tpu.dot_dimension_numbers<[1], [0], [0], [1], [0, 0, 1, 1], [], []>} : vector<8x32xf32>, vector<32x128xf32>, vector<8x128xf32> -> vector<8x128xf32>
    %120 = arith.addf %118, %119 : vector<8x128xf32>
    %121 = vector.extract_strided_slice %120 {offsets = [0, 0], sizes = [8, 96], strides = [1, 1]} : vector<8x128xf32> to vector<8x96xf32>
    %122 = arith.negf %121 : vector<8x96xf32>
    %123 = math.exp %122 : vector<8x96xf32>
    %cst_35 = arith.constant 1.000000e+00 : f32
    %124 = vector.broadcast %cst_35 : f32 to vector<8x96xf32>
    %125 = arith.addf %124, %123 : vector<8x96xf32>
    %126 = arith.divf %124, %125 : vector<8x96xf32>
    %127 = vector.extract_strided_slice %120 {offsets = [0, 96], sizes = [8, 32], strides = [1, 1]} : vector<8x128xf32> to vector<8x32xf32>
    %128 = math.tanh %127 : vector<8x32xf32>
    %129 = vector.extract_strided_slice %126 {offsets = [0, 0], sizes = [8, 32], strides = [1, 1]} : vector<8x96xf32> to vector<8x32xf32>
    %130 = vector.extract_strided_slice %126 {offsets = [0, 32], sizes = [8, 32], strides = [1, 1]} : vector<8x96xf32> to vector<8x32xf32>
    %131 = vector.extract_strided_slice %126 {offsets = [0, 64], sizes = [8, 32], strides = [1, 1]} : vector<8x96xf32> to vector<8x32xf32>
    %132 = arith.mulf %130, %94 : vector<8x32xf32>
    %133 = arith.mulf %129, %128 : vector<8x32xf32>
    %134 = arith.addf %132, %133 : vector<8x32xf32>
    %135 = math.tanh %134 : vector<8x32xf32>
    %136 = arith.mulf %131, %135 : vector<8x32xf32>
    %c40 = arith.constant 40 : index
    %c32_36 = arith.constant 32 : index
    %137 = vector.load %arg17[%c40, %c32_36] : memref<64x64xf32, #tpu.memory_space<vmem>>, vector<8x32xf32>
    tpu.vector_store %arg17[%c40, %c32_36], %136 {strides = array<i32>} : memref<64x64xf32, #tpu.memory_space<vmem>>, vector<8x32xf32>,
    %138 = vector.extract_strided_slice %10 {offsets = [24, 0], sizes = [8, 128], strides = [1, 1]} : vector<64x128xf32> to vector<8x128xf32>
    %cst_37 = arith.constant dense<0.000000e+00> : vector<8x128xf32>
    %139 = tpu.matmul %116, %3, %cst_37 {dimension_numbers = #tpu.dot_dimension_numbers<[1], [0], [0], [1], [0, 0, 1, 1], [], []>} : vector<8x32xf32>, vector<32x128xf32>, vector<8x128xf32> -> vector<8x128xf32>
    %140 = arith.addf %138, %139 : vector<8x128xf32>
    %141 = vector.extract_strided_slice %140 {offsets = [0, 0], sizes = [8, 96], strides = [1, 1]} : vector<8x128xf32> to vector<8x96xf32>
    %142 = arith.negf %141 : vector<8x96xf32>
    %143 = math.exp %142 : vector<8x96xf32>
    %cst_38 = arith.constant 1.000000e+00 : f32
    %144 = vector.broadcast %cst_38 : f32 to vector<8x96xf32>
    %145 = arith.addf %144, %143 : vector<8x96xf32>
    %146 = arith.divf %144, %145 : vector<8x96xf32>
    %147 = vector.extract_strided_slice %140 {offsets = [0, 96], sizes = [8, 32], strides = [1, 1]} : vector<8x128xf32> to vector<8x32xf32>
    %148 = math.tanh %147 : vector<8x32xf32>
    %149 = vector.extract_strided_slice %146 {offsets = [0, 0], sizes = [8, 32], strides = [1, 1]} : vector<8x96xf32> to vector<8x32xf32>
    %150 = vector.extract_strided_slice %146 {offsets = [0, 32], sizes = [8, 32], strides = [1, 1]} : vector<8x96xf32> to vector<8x32xf32>
    %151 = vector.extract_strided_slice %146 {offsets = [0, 64], sizes = [8, 32], strides = [1, 1]} : vector<8x96xf32> to vector<8x32xf32>
    %152 = arith.mulf %150, %114 : vector<8x32xf32>
    %153 = arith.mulf %149, %148 : vector<8x32xf32>
    %154 = arith.addf %152, %153 : vector<8x32xf32>
    %155 = math.tanh %154 : vector<8x32xf32>
    %156 = arith.mulf %151, %155 : vector<8x32xf32>
    %c24 = arith.constant 24 : index
    %c0_39 = arith.constant 0 : index
    %157 = vector.load %arg17[%c24, %c0_39] : memref<64x64xf32, #tpu.memory_space<vmem>>, vector<8x32xf32>
    tpu.vector_store %arg17[%c24, %c0_39], %156 {strides = array<i32>} : memref<64x64xf32, #tpu.memory_space<vmem>>, vector<8x32xf32>,
    %158 = vector.extract_strided_slice %13 {offsets = [32, 0], sizes = [8, 128], strides = [1, 1]} : vector<64x128xf32> to vector<8x128xf32>
    %cst_40 = arith.constant dense<0.000000e+00> : vector<8x128xf32>
    %159 = tpu.matmul %136, %6, %cst_40 {dimension_numbers = #tpu.dot_dimension_numbers<[1], [0], [0], [1], [0, 0, 1, 1], [], []>} : vector<8x32xf32>, vector<32x128xf32>, vector<8x128xf32> -> vector<8x128xf32>
    %160 = arith.addf %158, %159 : vector<8x128xf32>
    %161 = vector.extract_strided_slice %160 {offsets = [0, 0], sizes = [8, 96], strides = [1, 1]} : vector<8x128xf32> to vector<8x96xf32>
    %162 = arith.negf %161 : vector<8x96xf32>
    %163 = math.exp %162 : vector<8x96xf32>
    %cst_41 = arith.constant 1.000000e+00 : f32
    %164 = vector.broadcast %cst_41 : f32 to vector<8x96xf32>
    %165 = arith.addf %164, %163 : vector<8x96xf32>
    %166 = arith.divf %164, %165 : vector<8x96xf32>
    %167 = vector.extract_strided_slice %160 {offsets = [0, 96], sizes = [8, 32], strides = [1, 1]} : vector<8x128xf32> to vector<8x32xf32>
    %168 = math.tanh %167 : vector<8x32xf32>
    %169 = vector.extract_strided_slice %166 {offsets = [0, 0], sizes = [8, 32], strides = [1, 1]} : vector<8x96xf32> to vector<8x32xf32>
    %170 = vector.extract_strided_slice %166 {offsets = [0, 32], sizes = [8, 32], strides = [1, 1]} : vector<8x96xf32> to vector<8x32xf32>
    %171 = vector.extract_strided_slice %166 {offsets = [0, 64], sizes = [8, 32], strides = [1, 1]} : vector<8x96xf32> to vector<8x32xf32>
    %172 = arith.mulf %170, %134 : vector<8x32xf32>
    %173 = arith.mulf %169, %168 : vector<8x32xf32>
    %174 = arith.addf %172, %173 : vector<8x32xf32>
    %175 = math.tanh %174 : vector<8x32xf32>
    %176 = arith.mulf %171, %175 : vector<8x32xf32>
    %c32_42 = arith.constant 32 : index
    %c32_43 = arith.constant 32 : index
    %177 = vector.load %arg17[%c32_42, %c32_43] : memref<64x64xf32, #tpu.memory_space<vmem>>, vector<8x32xf32>
    tpu.vector_store %arg17[%c32_42, %c32_43], %176 {strides = array<i32>} : memref<64x64xf32, #tpu.memory_space<vmem>>, vector<8x32xf32>,
    %178 = vector.extract_strided_slice %10 {offsets = [32, 0], sizes = [8, 128], strides = [1, 1]} : vector<64x128xf32> to vector<8x128xf32>
    %cst_44 = arith.constant dense<0.000000e+00> : vector<8x128xf32>
    %179 = tpu.matmul %156, %3, %cst_44 {dimension_numbers = #tpu.dot_dimension_numbers<[1], [0], [0], [1], [0, 0, 1, 1], [], []>} : vector<8x32xf32>, vector<32x128xf32>, vector<8x128xf32> -> vector<8x128xf32>
    %180 = arith.addf %178, %179 : vector<8x128xf32>
    %181 = vector.extract_strided_slice %180 {offsets = [0, 0], sizes = [8, 96], strides = [1, 1]} : vector<8x128xf32> to vector<8x96xf32>
    %182 = arith.negf %181 : vector<8x96xf32>
    %183 = math.exp %182 : vector<8x96xf32>
    %cst_45 = arith.constant 1.000000e+00 : f32
    %184 = vector.broadcast %cst_45 : f32 to vector<8x96xf32>
    %185 = arith.addf %184, %183 : vector<8x96xf32>
    %186 = arith.divf %184, %185 : vector<8x96xf32>
    %187 = vector.extract_strided_slice %180 {offsets = [0, 96], sizes = [8, 32], strides = [1, 1]} : vector<8x128xf32> to vector<8x32xf32>
    %188 = math.tanh %187 : vector<8x32xf32>
    %189 = vector.extract_strided_slice %186 {offsets = [0, 0], sizes = [8, 32], strides = [1, 1]} : vector<8x96xf32> to vector<8x32xf32>
    %190 = vector.extract_strided_slice %186 {offsets = [0, 32], sizes = [8, 32], strides = [1, 1]} : vector<8x96xf32> to vector<8x32xf32>
    %191 = vector.extract_strided_slice %186 {offsets = [0, 64], sizes = [8, 32], strides = [1, 1]} : vector<8x96xf32> to vector<8x32xf32>
    %192 = arith.mulf %190, %154 : vector<8x32xf32>
    %193 = arith.mulf %189, %188 : vector<8x32xf32>
    %194 = arith.addf %192, %193 : vector<8x32xf32>
    %195 = math.tanh %194 : vector<8x32xf32>
    %196 = arith.mulf %191, %195 : vector<8x32xf32>
    %c32_46 = arith.constant 32 : index
    %c0_47 = arith.constant 0 : index
    %197 = vector.load %arg17[%c32_46, %c0_47] : memref<64x64xf32, #tpu.memory_space<vmem>>, vector<8x32xf32>
    tpu.vector_store %arg17[%c32_46, %c0_47], %196 {strides = array<i32>} : memref<64x64xf32, #tpu.memory_space<vmem>>, vector<8x32xf32>,
    %198 = vector.extract_strided_slice %13 {offsets = [24, 0], sizes = [8, 128], strides = [1, 1]} : vector<64x128xf32> to vector<8x128xf32>
    %cst_48 = arith.constant dense<0.000000e+00> : vector<8x128xf32>
    %199 = tpu.matmul %176, %6, %cst_48 {dimension_numbers = #tpu.dot_dimension_numbers<[1], [0], [0], [1], [0, 0, 1, 1], [], []>} : vector<8x32xf32>, vector<32x128xf32>, vector<8x128xf32> -> vector<8x128xf32>
    %200 = arith.addf %198, %199 : vector<8x128xf32>
    %201 = vector.extract_strided_slice %200 {offsets = [0, 0], sizes = [8, 96], strides = [1, 1]} : vector<8x128xf32> to vector<8x96xf32>
    %202 = arith.negf %201 : vector<8x96xf32>
    %203 = math.exp %202 : vector<8x96xf32>
    %cst_49 = arith.constant 1.000000e+00 : f32
    %204 = vector.broadcast %cst_49 : f32 to vector<8x96xf32>
    %205 = arith.addf %204, %203 : vector<8x96xf32>
    %206 = arith.divf %204, %205 : vector<8x96xf32>
    %207 = vector.extract_strided_slice %200 {offsets = [0, 96], sizes = [8, 32], strides = [1, 1]} : vector<8x128xf32> to vector<8x32xf32>
    %208 = math.tanh %207 : vector<8x32xf32>
    %209 = vector.extract_strided_slice %206 {offsets = [0, 0], sizes = [8, 32], strides = [1, 1]} : vector<8x96xf32> to vector<8x32xf32>
    %210 = vector.extract_strided_slice %206 {offsets = [0, 32], sizes = [8, 32], strides = [1, 1]} : vector<8x96xf32> to vector<8x32xf32>
    %211 = vector.extract_strided_slice %206 {offsets = [0, 64], sizes = [8, 32], strides = [1, 1]} : vector<8x96xf32> to vector<8x32xf32>
    %212 = arith.mulf %210, %174 : vector<8x32xf32>
    %213 = arith.mulf %209, %208 : vector<8x32xf32>
    %214 = arith.addf %212, %213 : vector<8x32xf32>
    %215 = math.tanh %214 : vector<8x32xf32>
    %216 = arith.mulf %211, %215 : vector<8x32xf32>
    %c24_50 = arith.constant 24 : index
    %c32_51 = arith.constant 32 : index
    %217 = vector.load %arg17[%c24_50, %c32_51] : memref<64x64xf32, #tpu.memory_space<vmem>>, vector<8x32xf32>
    tpu.vector_store %arg17[%c24_50, %c32_51], %216 {strides = array<i32>} : memref<64x64xf32, #tpu.memory_space<vmem>>, vector<8x32xf32>,
    %218 = vector.extract_strided_slice %10 {offsets = [40, 0], sizes = [8, 128], strides = [1, 1]} : vector<64x128xf32> to vector<8x128xf32>
    %cst_52 = arith.constant dense<0.000000e+00> : vector<8x128xf32>
    %219 = tpu.matmul %196, %3, %cst_52 {dimension_numbers = #tpu.dot_dimension_numbers<[1], [0], [0], [1], [0, 0, 1, 1], [], []>} : vector<8x32xf32>, vector<32x128xf32>, vector<8x128xf32> -> vector<8x128xf32>
    %220 = arith.addf %218, %219 : vector<8x128xf32>
    %221 = vector.extract_strided_slice %220 {offsets = [0, 0], sizes = [8, 96], strides = [1, 1]} : vector<8x128xf32> to vector<8x96xf32>
    %222 = arith.negf %221 : vector<8x96xf32>
    %223 = math.exp %222 : vector<8x96xf32>
    %cst_53 = arith.constant 1.000000e+00 : f32
    %224 = vector.broadcast %cst_53 : f32 to vector<8x96xf32>
    %225 = arith.addf %224, %223 : vector<8x96xf32>
    %226 = arith.divf %224, %225 : vector<8x96xf32>
    %227 = vector.extract_strided_slice %220 {offsets = [0, 96], sizes = [8, 32], strides = [1, 1]} : vector<8x128xf32> to vector<8x32xf32>
    %228 = math.tanh %227 : vector<8x32xf32>
    %229 = vector.extract_strided_slice %226 {offsets = [0, 0], sizes = [8, 32], strides = [1, 1]} : vector<8x96xf32> to vector<8x32xf32>
    %230 = vector.extract_strided_slice %226 {offsets = [0, 32], sizes = [8, 32], strides = [1, 1]} : vector<8x96xf32> to vector<8x32xf32>
    %231 = vector.extract_strided_slice %226 {offsets = [0, 64], sizes = [8, 32], strides = [1, 1]} : vector<8x96xf32> to vector<8x32xf32>
    %232 = arith.mulf %230, %194 : vector<8x32xf32>
    %233 = arith.mulf %229, %228 : vector<8x32xf32>
    %234 = arith.addf %232, %233 : vector<8x32xf32>
    %235 = math.tanh %234 : vector<8x32xf32>
    %236 = arith.mulf %231, %235 : vector<8x32xf32>
    %c40_54 = arith.constant 40 : index
    %c0_55 = arith.constant 0 : index
    %237 = vector.load %arg17[%c40_54, %c0_55] : memref<64x64xf32, #tpu.memory_space<vmem>>, vector<8x32xf32>
    tpu.vector_store %arg17[%c40_54, %c0_55], %236 {strides = array<i32>} : memref<64x64xf32, #tpu.memory_space<vmem>>, vector<8x32xf32>,
    %238 = vector.extract_strided_slice %13 {offsets = [16, 0], sizes = [8, 128], strides = [1, 1]} : vector<64x128xf32> to vector<8x128xf32>
    %cst_56 = arith.constant dense<0.000000e+00> : vector<8x128xf32>
    %239 = tpu.matmul %216, %6, %cst_56 {dimension_numbers = #tpu.dot_dimension_numbers<[1], [0], [0], [1], [0, 0, 1, 1], [], []>} : vector<8x32xf32>, vector<32x128xf32>, vector<8x128xf32> -> vector<8x128xf32>
    %240 = arith.addf %238, %239 : vector<8x128xf32>
    %241 = vector.extract_strided_slice %240 {offsets = [0, 0], sizes = [8, 96], strides = [1, 1]} : vector<8x128xf32> to vector<8x96xf32>
    %242 = arith.negf %241 : vector<8x96xf32>
    %243 = math.exp %242 : vector<8x96xf32>
    %cst_57 = arith.constant 1.000000e+00 : f32
    %244 = vector.broadcast %cst_57 : f32 to vector<8x96xf32>
    %245 = arith.addf %244, %243 : vector<8x96xf32>
    %246 = arith.divf %244, %245 : vector<8x96xf32>
    %247 = vector.extract_strided_slice %240 {offsets = [0, 96], sizes = [8, 32], strides = [1, 1]} : vector<8x128xf32> to vector<8x32xf32>
    %248 = math.tanh %247 : vector<8x32xf32>
    %249 = vector.extract_strided_slice %246 {offsets = [0, 0], sizes = [8, 32], strides = [1, 1]} : vector<8x96xf32> to vector<8x32xf32>
    %250 = vector.extract_strided_slice %246 {offsets = [0, 32], sizes = [8, 32], strides = [1, 1]} : vector<8x96xf32> to vector<8x32xf32>
    %251 = vector.extract_strided_slice %246 {offsets = [0, 64], sizes = [8, 32], strides = [1, 1]} : vector<8x96xf32> to vector<8x32xf32>
    %252 = arith.mulf %250, %214 : vector<8x32xf32>
    %253 = arith.mulf %249, %248 : vector<8x32xf32>
    %254 = arith.addf %252, %253 : vector<8x32xf32>
    %255 = math.tanh %254 : vector<8x32xf32>
    %256 = arith.mulf %251, %255 : vector<8x32xf32>
    %c16_58 = arith.constant 16 : index
    %c32_59 = arith.constant 32 : index
    %257 = vector.load %arg17[%c16_58, %c32_59] : memref<64x64xf32, #tpu.memory_space<vmem>>, vector<8x32xf32>
    tpu.vector_store %arg17[%c16_58, %c32_59], %256 {strides = array<i32>} : memref<64x64xf32, #tpu.memory_space<vmem>>, vector<8x32xf32>,
    %258 = vector.extract_strided_slice %10 {offsets = [48, 0], sizes = [8, 128], strides = [1, 1]} : vector<64x128xf32> to vector<8x128xf32>
    %cst_60 = arith.constant dense<0.000000e+00> : vector<8x128xf32>
    %259 = tpu.matmul %236, %3, %cst_60 {dimension_numbers = #tpu.dot_dimension_numbers<[1], [0], [0], [1], [0, 0, 1, 1], [], []>} : vector<8x32xf32>, vector<32x128xf32>, vector<8x128xf32> -> vector<8x128xf32>
    %260 = arith.addf %258, %259 : vector<8x128xf32>
    %261 = vector.extract_strided_slice %260 {offsets = [0, 0], sizes = [8, 96], strides = [1, 1]} : vector<8x128xf32> to vector<8x96xf32>
    %262 = arith.negf %261 : vector<8x96xf32>
    %263 = math.exp %262 : vector<8x96xf32>
    %cst_61 = arith.constant 1.000000e+00 : f32
    %264 = vector.broadcast %cst_61 : f32 to vector<8x96xf32>
    %265 = arith.addf %264, %263 : vector<8x96xf32>
    %266 = arith.divf %264, %265 : vector<8x96xf32>
    %267 = vector.extract_strided_slice %260 {offsets = [0, 96], sizes = [8, 32], strides = [1, 1]} : vector<8x128xf32> to vector<8x32xf32>
    %268 = math.tanh %267 : vector<8x32xf32>
    %269 = vector.extract_strided_slice %266 {offsets = [0, 0], sizes = [8, 32], strides = [1, 1]} : vector<8x96xf32> to vector<8x32xf32>
    %270 = vector.extract_strided_slice %266 {offsets = [0, 32], sizes = [8, 32], strides = [1, 1]} : vector<8x96xf32> to vector<8x32xf32>
    %271 = vector.extract_strided_slice %266 {offsets = [0, 64], sizes = [8, 32], strides = [1, 1]} : vector<8x96xf32> to vector<8x32xf32>
    %272 = arith.mulf %270, %234 : vector<8x32xf32>
    %273 = arith.mulf %269, %268 : vector<8x32xf32>
    %274 = arith.addf %272, %273 : vector<8x32xf32>
    %275 = math.tanh %274 : vector<8x32xf32>
    %276 = arith.mulf %271, %275 : vector<8x32xf32>
    %c48_62 = arith.constant 48 : index
    %c0_63 = arith.constant 0 : index
    %277 = vector.load %arg17[%c48_62, %c0_63] : memref<64x64xf32, #tpu.memory_space<vmem>>, vector<8x32xf32>
    tpu.vector_store %arg17[%c48_62, %c0_63], %276 {strides = array<i32>} : memref<64x64xf32, #tpu.memory_space<vmem>>, vector<8x32xf32>,
    %278 = vector.extract_strided_slice %13 {offsets = [8, 0], sizes = [8, 128], strides = [1, 1]} : vector<64x128xf32> to vector<8x128xf32>
    %cst_64 = arith.constant dense<0.000000e+00> : vector<8x128xf32>
    %279 = tpu.matmul %256, %6, %cst_64 {dimension_numbers = #tpu.dot_dimension_numbers<[1], [0], [0], [1], [0, 0, 1, 1], [], []>} : vector<8x32xf32>, vector<32x128xf32>, vector<8x128xf32> -> vector<8x128xf32>
    %280 = arith.addf %278, %279 : vector<8x128xf32>
    %281 = vector.extract_strided_slice %280 {offsets = [0, 0], sizes = [8, 96], strides = [1, 1]} : vector<8x128xf32> to vector<8x96xf32>
    %282 = arith.negf %281 : vector<8x96xf32>
    %283 = math.exp %282 : vector<8x96xf32>
    %cst_65 = arith.constant 1.000000e+00 : f32
    %284 = vector.broadcast %cst_65 : f32 to vector<8x96xf32>
    %285 = arith.addf %284, %283 : vector<8x96xf32>
    %286 = arith.divf %284, %285 : vector<8x96xf32>
    %287 = vector.extract_strided_slice %280 {offsets = [0, 96], sizes = [8, 32], strides = [1, 1]} : vector<8x128xf32> to vector<8x32xf32>
    %288 = math.tanh %287 : vector<8x32xf32>
    %289 = vector.extract_strided_slice %286 {offsets = [0, 0], sizes = [8, 32], strides = [1, 1]} : vector<8x96xf32> to vector<8x32xf32>
    %290 = vector.extract_strided_slice %286 {offsets = [0, 32], sizes = [8, 32], strides = [1, 1]} : vector<8x96xf32> to vector<8x32xf32>
    %291 = vector.extract_strided_slice %286 {offsets = [0, 64], sizes = [8, 32], strides = [1, 1]} : vector<8x96xf32> to vector<8x32xf32>
    %292 = arith.mulf %290, %254 : vector<8x32xf32>
    %293 = arith.mulf %289, %288 : vector<8x32xf32>
    %294 = arith.addf %292, %293 : vector<8x32xf32>
    %295 = math.tanh %294 : vector<8x32xf32>
    %296 = arith.mulf %291, %295 : vector<8x32xf32>
    %c8_66 = arith.constant 8 : index
    %c32_67 = arith.constant 32 : index
    %297 = vector.load %arg17[%c8_66, %c32_67] : memref<64x64xf32, #tpu.memory_space<vmem>>, vector<8x32xf32>
    tpu.vector_store %arg17[%c8_66, %c32_67], %296 {strides = array<i32>} : memref<64x64xf32, #tpu.memory_space<vmem>>, vector<8x32xf32>,
    %298 = vector.extract_strided_slice %10 {offsets = [56, 0], sizes = [8, 128], strides = [1, 1]} : vector<64x128xf32> to vector<8x128xf32>
    %cst_68 = arith.constant dense<0.000000e+00> : vector<8x128xf32>
    %299 = tpu.matmul %276, %3, %cst_68 {dimension_numbers = #tpu.dot_dimension_numbers<[1], [0], [0], [1], [0, 0, 1, 1], [], []>} : vector<8x32xf32>, vector<32x128xf32>, vector<8x128xf32> -> vector<8x128xf32>
    %300 = arith.addf %298, %299 : vector<8x128xf32>
    %301 = vector.extract_strided_slice %300 {offsets = [0, 0], sizes = [8, 96], strides = [1, 1]} : vector<8x128xf32> to vector<8x96xf32>
    %302 = arith.negf %301 : vector<8x96xf32>
    %303 = math.exp %302 : vector<8x96xf32>
    %cst_69 = arith.constant 1.000000e+00 : f32
    %304 = vector.broadcast %cst_69 : f32 to vector<8x96xf32>
    %305 = arith.addf %304, %303 : vector<8x96xf32>
    %306 = arith.divf %304, %305 : vector<8x96xf32>
    %307 = vector.extract_strided_slice %300 {offsets = [0, 96], sizes = [8, 32], strides = [1, 1]} : vector<8x128xf32> to vector<8x32xf32>
    %308 = math.tanh %307 : vector<8x32xf32>
    %309 = vector.extract_strided_slice %306 {offsets = [0, 0], sizes = [8, 32], strides = [1, 1]} : vector<8x96xf32> to vector<8x32xf32>
    %310 = vector.extract_strided_slice %306 {offsets = [0, 32], sizes = [8, 32], strides = [1, 1]} : vector<8x96xf32> to vector<8x32xf32>
    %311 = vector.extract_strided_slice %306 {offsets = [0, 64], sizes = [8, 32], strides = [1, 1]} : vector<8x96xf32> to vector<8x32xf32>
    %312 = arith.mulf %310, %274 : vector<8x32xf32>
    %313 = arith.mulf %309, %308 : vector<8x32xf32>
    %314 = arith.addf %312, %313 : vector<8x32xf32>
    %315 = math.tanh %314 : vector<8x32xf32>
    %316 = arith.mulf %311, %315 : vector<8x32xf32>
    %c56_70 = arith.constant 56 : index
    %c0_71 = arith.constant 0 : index
    %317 = vector.load %arg17[%c56_70, %c0_71] : memref<64x64xf32, #tpu.memory_space<vmem>>, vector<8x32xf32>
    tpu.vector_store %arg17[%c56_70, %c0_71], %316 {strides = array<i32>} : memref<64x64xf32, #tpu.memory_space<vmem>>, vector<8x32xf32>,
    %318 = vector.extract_strided_slice %13 {offsets = [0, 0], sizes = [8, 128], strides = [1, 1]} : vector<64x128xf32> to vector<8x128xf32>
    %cst_72 = arith.constant dense<0.000000e+00> : vector<8x128xf32>
    %319 = tpu.matmul %296, %6, %cst_72 {dimension_numbers = #tpu.dot_dimension_numbers<[1], [0], [0], [1], [0, 0, 1, 1], [], []>} : vector<8x32xf32>, vector<32x128xf32>, vector<8x128xf32> -> vector<8x128xf32>
    %320 = arith.addf %318, %319 : vector<8x128xf32>
    %321 = vector.extract_strided_slice %320 {offsets = [0, 0], sizes = [8, 96], strides = [1, 1]} : vector<8x128xf32> to vector<8x96xf32>
    %322 = arith.negf %321 : vector<8x96xf32>
    %323 = math.exp %322 : vector<8x96xf32>
    %cst_73 = arith.constant 1.000000e+00 : f32
    %324 = vector.broadcast %cst_73 : f32 to vector<8x96xf32>
    %325 = arith.addf %324, %323 : vector<8x96xf32>
    %326 = arith.divf %324, %325 : vector<8x96xf32>
    %327 = vector.extract_strided_slice %320 {offsets = [0, 96], sizes = [8, 32], strides = [1, 1]} : vector<8x128xf32> to vector<8x32xf32>
    %328 = math.tanh %327 : vector<8x32xf32>
    %329 = vector.extract_strided_slice %326 {offsets = [0, 0], sizes = [8, 32], strides = [1, 1]} : vector<8x96xf32> to vector<8x32xf32>
    %330 = vector.extract_strided_slice %326 {offsets = [0, 32], sizes = [8, 32], strides = [1, 1]} : vector<8x96xf32> to vector<8x32xf32>
    %331 = vector.extract_strided_slice %326 {offsets = [0, 64], sizes = [8, 32], strides = [1, 1]} : vector<8x96xf32> to vector<8x32xf32>
    %332 = arith.mulf %330, %294 : vector<8x32xf32>
    %333 = arith.mulf %329, %328 : vector<8x32xf32>
    %334 = arith.addf %332, %333 : vector<8x32xf32>
    %335 = math.tanh %334 : vector<8x32xf32>
    %336 = arith.mulf %331, %335 : vector<8x32xf32>
    %c0_74 = arith.constant 0 : index
    %c32_75 = arith.constant 32 : index
    %337 = vector.load %arg17[%c0_74, %c32_75] : memref<64x64xf32, #tpu.memory_space<vmem>>, vector<8x32xf32>
    tpu.vector_store %arg17[%c0_74, %c32_75], %336 {strides = array<i32>} : memref<64x64xf32, #tpu.memory_space<vmem>>, vector<8x32xf32>,
    %c0_76 = arith.constant 0 : index
    %c0_77 = arith.constant 0 : index
    %338 = vector.load %arg17[%c0_76, %c0_77] : memref<64x64xf32, #tpu.memory_space<vmem>>, vector<64x64xf32>
    %c0_78 = arith.constant 0 : index
    %c0_79 = arith.constant 0 : index
    %339 = vector.load %arg8[%c0_78, %c0_79] : memref<64x128xf32, #tpu.memory_space<vmem>>, vector<64x128xf32>
    %c0_80 = arith.constant 0 : index
    %c0_81 = arith.constant 0 : index
    %340 = vector.load %arg9[%c0_80, %c0_81] : memref<32x128xf32, #tpu.memory_space<vmem>>, vector<32x128xf32>
    %c0_82 = arith.constant 0 : index
    %c0_83 = arith.constant 0 : index
    %341 = vector.load %arg10[%c0_82, %c0_83] : memref<1x128xf32, #tpu.memory_space<vmem>>, vector<1x128xf32>
    %c0_84 = arith.constant 0 : index
    %c0_85 = arith.constant 0 : index
    %342 = vector.load %arg11[%c0_84, %c0_85] : memref<64x128xf32, #tpu.memory_space<vmem>>, vector<64x128xf32>
    %c0_86 = arith.constant 0 : index
    %c0_87 = arith.constant 0 : index
    %343 = vector.load %arg12[%c0_86, %c0_87] : memref<32x128xf32, #tpu.memory_space<vmem>>, vector<32x128xf32>
    %c0_88 = arith.constant 0 : index
    %c0_89 = arith.constant 0 : index
    %344 = vector.load %arg13[%c0_88, %c0_89] : memref<1x128xf32, #tpu.memory_space<vmem>>, vector<1x128xf32>
    %cst_90 = arith.constant dense<0.000000e+00> : vector<64x128xf32>
    %345 = tpu.matmul %338, %339, %cst_90 {dimension_numbers = #tpu.dot_dimension_numbers<[1], [0], [0], [1], [0, 0, 1, 1], [], []>} : vector<64x64xf32>, vector<64x128xf32>, vector<64x128xf32> -> vector<64x128xf32>
    %346 = vector.broadcast %341 : vector<1x128xf32> to vector<64x128xf32>
    %347 = arith.addf %345, %346 : vector<64x128xf32>
    %cst_91 = arith.constant dense<0.000000e+00> : vector<64x128xf32>
    %348 = tpu.matmul %338, %342, %cst_91 {dimension_numbers = #tpu.dot_dimension_numbers<[1], [0], [0], [1], [0, 0, 1, 1], [], []>} : vector<64x64xf32>, vector<64x128xf32>, vector<64x128xf32> -> vector<64x128xf32>
    %349 = vector.broadcast %344 : vector<1x128xf32> to vector<64x128xf32>
    %350 = arith.addf %348, %349 : vector<64x128xf32>
    %cst_92 = arith.constant 0.000000e+00 : f32
    %351 = vector.broadcast %cst_92 : f32 to vector<8x32xf32>
    %cst_93 = arith.constant 0.000000e+00 : f32
    %352 = vector.broadcast %cst_93 : f32 to vector<8x32xf32>
    %cst_94 = arith.constant 0.000000e+00 : f32
    %353 = vector.broadcast %cst_94 : f32 to vector<8x32xf32>
    %cst_95 = arith.constant 0.000000e+00 : f32
    %354 = vector.broadcast %cst_95 : f32 to vector<8x32xf32>
    %355 = vector.extract_strided_slice %347 {offsets = [0, 0], sizes = [8, 128], strides = [1, 1]} : vector<64x128xf32> to vector<8x128xf32>
    %cst_96 = arith.constant dense<0.000000e+00> : vector<8x128xf32>
    %356 = tpu.matmul %351, %340, %cst_96 {dimension_numbers = #tpu.dot_dimension_numbers<[1], [0], [0], [1], [0, 0, 1, 1], [], []>} : vector<8x32xf32>, vector<32x128xf32>, vector<8x128xf32> -> vector<8x128xf32>
    %357 = arith.addf %355, %356 : vector<8x128xf32>
    %358 = vector.extract_strided_slice %357 {offsets = [0, 0], sizes = [8, 96], strides = [1, 1]} : vector<8x128xf32> to vector<8x96xf32>
    %359 = arith.negf %358 : vector<8x96xf32>
    %360 = math.exp %359 : vector<8x96xf32>
    %cst_97 = arith.constant 1.000000e+00 : f32
    %361 = vector.broadcast %cst_97 : f32 to vector<8x96xf32>
    %362 = arith.addf %361, %360 : vector<8x96xf32>
    %363 = arith.divf %361, %362 : vector<8x96xf32>
    %364 = vector.extract_strided_slice %357 {offsets = [0, 96], sizes = [8, 32], strides = [1, 1]} : vector<8x128xf32> to vector<8x32xf32>
    %365 = math.tanh %364 : vector<8x32xf32>
    %366 = vector.extract_strided_slice %363 {offsets = [0, 0], sizes = [8, 32], strides = [1, 1]} : vector<8x96xf32> to vector<8x32xf32>
    %367 = vector.extract_strided_slice %363 {offsets = [0, 32], sizes = [8, 32], strides = [1, 1]} : vector<8x96xf32> to vector<8x32xf32>
    %368 = vector.extract_strided_slice %363 {offsets = [0, 64], sizes = [8, 32], strides = [1, 1]} : vector<8x96xf32> to vector<8x32xf32>
    %369 = arith.mulf %367, %353 : vector<8x32xf32>
    %370 = arith.mulf %366, %365 : vector<8x32xf32>
    %371 = arith.addf %369, %370 : vector<8x32xf32>
    %372 = math.tanh %371 : vector<8x32xf32>
    %373 = arith.mulf %368, %372 : vector<8x32xf32>
    %374 = vector.extract_strided_slice %350 {offsets = [56, 0], sizes = [8, 128], strides = [1, 1]} : vector<64x128xf32> to vector<8x128xf32>
    %cst_98 = arith.constant dense<0.000000e+00> : vector<8x128xf32>
    %375 = tpu.matmul %352, %343, %cst_98 {dimension_numbers = #tpu.dot_dimension_numbers<[1], [0], [0], [1], [0, 0, 1, 1], [], []>} : vector<8x32xf32>, vector<32x128xf32>, vector<8x128xf32> -> vector<8x128xf32>
    %376 = arith.addf %374, %375 : vector<8x128xf32>
    %377 = vector.extract_strided_slice %376 {offsets = [0, 0], sizes = [8, 96], strides = [1, 1]} : vector<8x128xf32> to vector<8x96xf32>
    %378 = arith.negf %377 : vector<8x96xf32>
    %379 = math.exp %378 : vector<8x96xf32>
    %cst_99 = arith.constant 1.000000e+00 : f32
    %380 = vector.broadcast %cst_99 : f32 to vector<8x96xf32>
    %381 = arith.addf %380, %379 : vector<8x96xf32>
    %382 = arith.divf %380, %381 : vector<8x96xf32>
    %383 = vector.extract_strided_slice %376 {offsets = [0, 96], sizes = [8, 32], strides = [1, 1]} : vector<8x128xf32> to vector<8x32xf32>
    %384 = math.tanh %383 : vector<8x32xf32>
    %385 = vector.extract_strided_slice %382 {offsets = [0, 0], sizes = [8, 32], strides = [1, 1]} : vector<8x96xf32> to vector<8x32xf32>
    %386 = vector.extract_strided_slice %382 {offsets = [0, 32], sizes = [8, 32], strides = [1, 1]} : vector<8x96xf32> to vector<8x32xf32>
    %387 = vector.extract_strided_slice %382 {offsets = [0, 64], sizes = [8, 32], strides = [1, 1]} : vector<8x96xf32> to vector<8x32xf32>
    %388 = arith.mulf %386, %354 : vector<8x32xf32>
    %389 = arith.mulf %385, %384 : vector<8x32xf32>
    %390 = arith.addf %388, %389 : vector<8x32xf32>
    %391 = math.tanh %390 : vector<8x32xf32>
    %392 = arith.mulf %387, %391 : vector<8x32xf32>
    %393 = vector.extract_strided_slice %347 {offsets = [8, 0], sizes = [8, 128], strides = [1, 1]} : vector<64x128xf32> to vector<8x128xf32>
    %cst_100 = arith.constant dense<0.000000e+00> : vector<8x128xf32>
    %394 = tpu.matmul %373, %340, %cst_100 {dimension_numbers = #tpu.dot_dimension_numbers<[1], [0], [0], [1], [0, 0, 1, 1], [], []>} : vector<8x32xf32>, vector<32x128xf32>, vector<8x128xf32> -> vector<8x128xf32>
    %395 = arith.addf %393, %394 : vector<8x128xf32>
    %396 = vector.extract_strided_slice %395 {offsets = [0, 0], sizes = [8, 96], strides = [1, 1]} : vector<8x128xf32> to vector<8x96xf32>
    %397 = arith.negf %396 : vector<8x96xf32>
    %398 = math.exp %397 : vector<8x96xf32>
    %cst_101 = arith.constant 1.000000e+00 : f32
    %399 = vector.broadcast %cst_101 : f32 to vector<8x96xf32>
    %400 = arith.addf %399, %398 : vector<8x96xf32>
    %401 = arith.divf %399, %400 : vector<8x96xf32>
    %402 = vector.extract_strided_slice %395 {offsets = [0, 96], sizes = [8, 32], strides = [1, 1]} : vector<8x128xf32> to vector<8x32xf32>
    %403 = math.tanh %402 : vector<8x32xf32>
    %404 = vector.extract_strided_slice %401 {offsets = [0, 0], sizes = [8, 32], strides = [1, 1]} : vector<8x96xf32> to vector<8x32xf32>
    %405 = vector.extract_strided_slice %401 {offsets = [0, 32], sizes = [8, 32], strides = [1, 1]} : vector<8x96xf32> to vector<8x32xf32>
    %406 = vector.extract_strided_slice %401 {offsets = [0, 64], sizes = [8, 32], strides = [1, 1]} : vector<8x96xf32> to vector<8x32xf32>
    %407 = arith.mulf %405, %371 : vector<8x32xf32>
    %408 = arith.mulf %404, %403 : vector<8x32xf32>
    %409 = arith.addf %407, %408 : vector<8x32xf32>
    %410 = math.tanh %409 : vector<8x32xf32>
    %411 = arith.mulf %406, %410 : vector<8x32xf32>
    %412 = vector.extract_strided_slice %350 {offsets = [48, 0], sizes = [8, 128], strides = [1, 1]} : vector<64x128xf32> to vector<8x128xf32>
    %cst_102 = arith.constant dense<0.000000e+00> : vector<8x128xf32>
    %413 = tpu.matmul %392, %343, %cst_102 {dimension_numbers = #tpu.dot_dimension_numbers<[1], [0], [0], [1], [0, 0, 1, 1], [], []>} : vector<8x32xf32>, vector<32x128xf32>, vector<8x128xf32> -> vector<8x128xf32>
    %414 = arith.addf %412, %413 : vector<8x128xf32>
    %415 = vector.extract_strided_slice %414 {offsets = [0, 0], sizes = [8, 96], strides = [1, 1]} : vector<8x128xf32> to vector<8x96xf32>
    %416 = arith.negf %415 : vector<8x96xf32>
    %417 = math.exp %416 : vector<8x96xf32>
    %cst_103 = arith.constant 1.000000e+00 : f32
    %418 = vector.broadcast %cst_103 : f32 to vector<8x96xf32>
    %419 = arith.addf %418, %417 : vector<8x96xf32>
    %420 = arith.divf %418, %419 : vector<8x96xf32>
    %421 = vector.extract_strided_slice %414 {offsets = [0, 96], sizes = [8, 32], strides = [1, 1]} : vector<8x128xf32> to vector<8x32xf32>
    %422 = math.tanh %421 : vector<8x32xf32>
    %423 = vector.extract_strided_slice %420 {offsets = [0, 0], sizes = [8, 32], strides = [1, 1]} : vector<8x96xf32> to vector<8x32xf32>
    %424 = vector.extract_strided_slice %420 {offsets = [0, 32], sizes = [8, 32], strides = [1, 1]} : vector<8x96xf32> to vector<8x32xf32>
    %425 = vector.extract_strided_slice %420 {offsets = [0, 64], sizes = [8, 32], strides = [1, 1]} : vector<8x96xf32> to vector<8x32xf32>
    %426 = arith.mulf %424, %390 : vector<8x32xf32>
    %427 = arith.mulf %423, %422 : vector<8x32xf32>
    %428 = arith.addf %426, %427 : vector<8x32xf32>
    %429 = math.tanh %428 : vector<8x32xf32>
    %430 = arith.mulf %425, %429 : vector<8x32xf32>
    %431 = vector.extract_strided_slice %347 {offsets = [16, 0], sizes = [8, 128], strides = [1, 1]} : vector<64x128xf32> to vector<8x128xf32>
    %cst_104 = arith.constant dense<0.000000e+00> : vector<8x128xf32>
    %432 = tpu.matmul %411, %340, %cst_104 {dimension_numbers = #tpu.dot_dimension_numbers<[1], [0], [0], [1], [0, 0, 1, 1], [], []>} : vector<8x32xf32>, vector<32x128xf32>, vector<8x128xf32> -> vector<8x128xf32>
    %433 = arith.addf %431, %432 : vector<8x128xf32>
    %434 = vector.extract_strided_slice %433 {offsets = [0, 0], sizes = [8, 96], strides = [1, 1]} : vector<8x128xf32> to vector<8x96xf32>
    %435 = arith.negf %434 : vector<8x96xf32>
    %436 = math.exp %435 : vector<8x96xf32>
    %cst_105 = arith.constant 1.000000e+00 : f32
    %437 = vector.broadcast %cst_105 : f32 to vector<8x96xf32>
    %438 = arith.addf %437, %436 : vector<8x96xf32>
    %439 = arith.divf %437, %438 : vector<8x96xf32>
    %440 = vector.extract_strided_slice %433 {offsets = [0, 96], sizes = [8, 32], strides = [1, 1]} : vector<8x128xf32> to vector<8x32xf32>
    %441 = math.tanh %440 : vector<8x32xf32>
    %442 = vector.extract_strided_slice %439 {offsets = [0, 0], sizes = [8, 32], strides = [1, 1]} : vector<8x96xf32> to vector<8x32xf32>
    %443 = vector.extract_strided_slice %439 {offsets = [0, 32], sizes = [8, 32], strides = [1, 1]} : vector<8x96xf32> to vector<8x32xf32>
    %444 = vector.extract_strided_slice %439 {offsets = [0, 64], sizes = [8, 32], strides = [1, 1]} : vector<8x96xf32> to vector<8x32xf32>
    %445 = arith.mulf %443, %409 : vector<8x32xf32>
    %446 = arith.mulf %442, %441 : vector<8x32xf32>
    %447 = arith.addf %445, %446 : vector<8x32xf32>
    %448 = math.tanh %447 : vector<8x32xf32>
    %449 = arith.mulf %444, %448 : vector<8x32xf32>
    %450 = vector.extract_strided_slice %350 {offsets = [40, 0], sizes = [8, 128], strides = [1, 1]} : vector<64x128xf32> to vector<8x128xf32>
    %cst_106 = arith.constant dense<0.000000e+00> : vector<8x128xf32>
    %451 = tpu.matmul %430, %343, %cst_106 {dimension_numbers = #tpu.dot_dimension_numbers<[1], [0], [0], [1], [0, 0, 1, 1], [], []>} : vector<8x32xf32>, vector<32x128xf32>, vector<8x128xf32> -> vector<8x128xf32>
    %452 = arith.addf %450, %451 : vector<8x128xf32>
    %453 = vector.extract_strided_slice %452 {offsets = [0, 0], sizes = [8, 96], strides = [1, 1]} : vector<8x128xf32> to vector<8x96xf32>
    %454 = arith.negf %453 : vector<8x96xf32>
    %455 = math.exp %454 : vector<8x96xf32>
    %cst_107 = arith.constant 1.000000e+00 : f32
    %456 = vector.broadcast %cst_107 : f32 to vector<8x96xf32>
    %457 = arith.addf %456, %455 : vector<8x96xf32>
    %458 = arith.divf %456, %457 : vector<8x96xf32>
    %459 = vector.extract_strided_slice %452 {offsets = [0, 96], sizes = [8, 32], strides = [1, 1]} : vector<8x128xf32> to vector<8x32xf32>
    %460 = math.tanh %459 : vector<8x32xf32>
    %461 = vector.extract_strided_slice %458 {offsets = [0, 0], sizes = [8, 32], strides = [1, 1]} : vector<8x96xf32> to vector<8x32xf32>
    %462 = vector.extract_strided_slice %458 {offsets = [0, 32], sizes = [8, 32], strides = [1, 1]} : vector<8x96xf32> to vector<8x32xf32>
    %463 = vector.extract_strided_slice %458 {offsets = [0, 64], sizes = [8, 32], strides = [1, 1]} : vector<8x96xf32> to vector<8x32xf32>
    %464 = arith.mulf %462, %428 : vector<8x32xf32>
    %465 = arith.mulf %461, %460 : vector<8x32xf32>
    %466 = arith.addf %464, %465 : vector<8x32xf32>
    %467 = math.tanh %466 : vector<8x32xf32>
    %468 = arith.mulf %463, %467 : vector<8x32xf32>
    %469 = vector.extract_strided_slice %347 {offsets = [24, 0], sizes = [8, 128], strides = [1, 1]} : vector<64x128xf32> to vector<8x128xf32>
    %cst_108 = arith.constant dense<0.000000e+00> : vector<8x128xf32>
    %470 = tpu.matmul %449, %340, %cst_108 {dimension_numbers = #tpu.dot_dimension_numbers<[1], [0], [0], [1], [0, 0, 1, 1], [], []>} : vector<8x32xf32>, vector<32x128xf32>, vector<8x128xf32> -> vector<8x128xf32>
    %471 = arith.addf %469, %470 : vector<8x128xf32>
    %472 = vector.extract_strided_slice %471 {offsets = [0, 0], sizes = [8, 96], strides = [1, 1]} : vector<8x128xf32> to vector<8x96xf32>
    %473 = arith.negf %472 : vector<8x96xf32>
    %474 = math.exp %473 : vector<8x96xf32>
    %cst_109 = arith.constant 1.000000e+00 : f32
    %475 = vector.broadcast %cst_109 : f32 to vector<8x96xf32>
    %476 = arith.addf %475, %474 : vector<8x96xf32>
    %477 = arith.divf %475, %476 : vector<8x96xf32>
    %478 = vector.extract_strided_slice %471 {offsets = [0, 96], sizes = [8, 32], strides = [1, 1]} : vector<8x128xf32> to vector<8x32xf32>
    %479 = math.tanh %478 : vector<8x32xf32>
    %480 = vector.extract_strided_slice %477 {offsets = [0, 0], sizes = [8, 32], strides = [1, 1]} : vector<8x96xf32> to vector<8x32xf32>
    %481 = vector.extract_strided_slice %477 {offsets = [0, 32], sizes = [8, 32], strides = [1, 1]} : vector<8x96xf32> to vector<8x32xf32>
    %482 = vector.extract_strided_slice %477 {offsets = [0, 64], sizes = [8, 32], strides = [1, 1]} : vector<8x96xf32> to vector<8x32xf32>
    %483 = arith.mulf %481, %447 : vector<8x32xf32>
    %484 = arith.mulf %480, %479 : vector<8x32xf32>
    %485 = arith.addf %483, %484 : vector<8x32xf32>
    %486 = math.tanh %485 : vector<8x32xf32>
    %487 = arith.mulf %482, %486 : vector<8x32xf32>
    %488 = vector.extract_strided_slice %350 {offsets = [32, 0], sizes = [8, 128], strides = [1, 1]} : vector<64x128xf32> to vector<8x128xf32>
    %cst_110 = arith.constant dense<0.000000e+00> : vector<8x128xf32>
    %489 = tpu.matmul %468, %343, %cst_110 {dimension_numbers = #tpu.dot_dimension_numbers<[1], [0], [0], [1], [0, 0, 1, 1], [], []>} : vector<8x32xf32>, vector<32x128xf32>, vector<8x128xf32> -> vector<8x128xf32>
    %490 = arith.addf %488, %489 : vector<8x128xf32>
    %491 = vector.extract_strided_slice %490 {offsets = [0, 0], sizes = [8, 96], strides = [1, 1]} : vector<8x128xf32> to vector<8x96xf32>
    %492 = arith.negf %491 : vector<8x96xf32>
    %493 = math.exp %492 : vector<8x96xf32>
    %cst_111 = arith.constant 1.000000e+00 : f32
    %494 = vector.broadcast %cst_111 : f32 to vector<8x96xf32>
    %495 = arith.addf %494, %493 : vector<8x96xf32>
    %496 = arith.divf %494, %495 : vector<8x96xf32>
    %497 = vector.extract_strided_slice %490 {offsets = [0, 96], sizes = [8, 32], strides = [1, 1]} : vector<8x128xf32> to vector<8x32xf32>
    %498 = math.tanh %497 : vector<8x32xf32>
    %499 = vector.extract_strided_slice %496 {offsets = [0, 0], sizes = [8, 32], strides = [1, 1]} : vector<8x96xf32> to vector<8x32xf32>
    %500 = vector.extract_strided_slice %496 {offsets = [0, 32], sizes = [8, 32], strides = [1, 1]} : vector<8x96xf32> to vector<8x32xf32>
    %501 = vector.extract_strided_slice %496 {offsets = [0, 64], sizes = [8, 32], strides = [1, 1]} : vector<8x96xf32> to vector<8x32xf32>
    %502 = arith.mulf %500, %466 : vector<8x32xf32>
    %503 = arith.mulf %499, %498 : vector<8x32xf32>
    %504 = arith.addf %502, %503 : vector<8x32xf32>
    %505 = math.tanh %504 : vector<8x32xf32>
    %506 = arith.mulf %501, %505 : vector<8x32xf32>
    %507 = vector.extract_strided_slice %347 {offsets = [32, 0], sizes = [8, 128], strides = [1, 1]} : vector<64x128xf32> to vector<8x128xf32>
    %cst_112 = arith.constant dense<0.000000e+00> : vector<8x128xf32>
    %508 = tpu.matmul %487, %340, %cst_112 {dimension_numbers = #tpu.dot_dimension_numbers<[1], [0], [0], [1], [0, 0, 1, 1], [], []>} : vector<8x32xf32>, vector<32x128xf32>, vector<8x128xf32> -> vector<8x128xf32>
    %509 = arith.addf %507, %508 : vector<8x128xf32>
    %510 = vector.extract_strided_slice %509 {offsets = [0, 0], sizes = [8, 96], strides = [1, 1]} : vector<8x128xf32> to vector<8x96xf32>
    %511 = arith.negf %510 : vector<8x96xf32>
    %512 = math.exp %511 : vector<8x96xf32>
    %cst_113 = arith.constant 1.000000e+00 : f32
    %513 = vector.broadcast %cst_113 : f32 to vector<8x96xf32>
    %514 = arith.addf %513, %512 : vector<8x96xf32>
    %515 = arith.divf %513, %514 : vector<8x96xf32>
    %516 = vector.extract_strided_slice %509 {offsets = [0, 96], sizes = [8, 32], strides = [1, 1]} : vector<8x128xf32> to vector<8x32xf32>
    %517 = math.tanh %516 : vector<8x32xf32>
    %518 = vector.extract_strided_slice %515 {offsets = [0, 0], sizes = [8, 32], strides = [1, 1]} : vector<8x96xf32> to vector<8x32xf32>
    %519 = vector.extract_strided_slice %515 {offsets = [0, 32], sizes = [8, 32], strides = [1, 1]} : vector<8x96xf32> to vector<8x32xf32>
    %520 = vector.extract_strided_slice %515 {offsets = [0, 64], sizes = [8, 32], strides = [1, 1]} : vector<8x96xf32> to vector<8x32xf32>
    %521 = arith.mulf %519, %485 : vector<8x32xf32>
    %522 = arith.mulf %518, %517 : vector<8x32xf32>
    %523 = arith.addf %521, %522 : vector<8x32xf32>
    %524 = math.tanh %523 : vector<8x32xf32>
    %525 = arith.mulf %520, %524 : vector<8x32xf32>
    %526 = vector.extract_strided_slice %350 {offsets = [24, 0], sizes = [8, 128], strides = [1, 1]} : vector<64x128xf32> to vector<8x128xf32>
    %cst_114 = arith.constant dense<0.000000e+00> : vector<8x128xf32>
    %527 = tpu.matmul %506, %343, %cst_114 {dimension_numbers = #tpu.dot_dimension_numbers<[1], [0], [0], [1], [0, 0, 1, 1], [], []>} : vector<8x32xf32>, vector<32x128xf32>, vector<8x128xf32> -> vector<8x128xf32>
    %528 = arith.addf %526, %527 : vector<8x128xf32>
    %529 = vector.extract_strided_slice %528 {offsets = [0, 0], sizes = [8, 96], strides = [1, 1]} : vector<8x128xf32> to vector<8x96xf32>
    %530 = arith.negf %529 : vector<8x96xf32>
    %531 = math.exp %530 : vector<8x96xf32>
    %cst_115 = arith.constant 1.000000e+00 : f32
    %532 = vector.broadcast %cst_115 : f32 to vector<8x96xf32>
    %533 = arith.addf %532, %531 : vector<8x96xf32>
    %534 = arith.divf %532, %533 : vector<8x96xf32>
    %535 = vector.extract_strided_slice %528 {offsets = [0, 96], sizes = [8, 32], strides = [1, 1]} : vector<8x128xf32> to vector<8x32xf32>
    %536 = math.tanh %535 : vector<8x32xf32>
    %537 = vector.extract_strided_slice %534 {offsets = [0, 0], sizes = [8, 32], strides = [1, 1]} : vector<8x96xf32> to vector<8x32xf32>
    %538 = vector.extract_strided_slice %534 {offsets = [0, 32], sizes = [8, 32], strides = [1, 1]} : vector<8x96xf32> to vector<8x32xf32>
    %539 = vector.extract_strided_slice %534 {offsets = [0, 64], sizes = [8, 32], strides = [1, 1]} : vector<8x96xf32> to vector<8x32xf32>
    %540 = arith.mulf %538, %504 : vector<8x32xf32>
    %541 = arith.mulf %537, %536 : vector<8x32xf32>
    %542 = arith.addf %540, %541 : vector<8x32xf32>
    %543 = math.tanh %542 : vector<8x32xf32>
    %544 = arith.mulf %539, %543 : vector<8x32xf32>
    %545 = vector.extract_strided_slice %347 {offsets = [40, 0], sizes = [8, 128], strides = [1, 1]} : vector<64x128xf32> to vector<8x128xf32>
    %cst_116 = arith.constant dense<0.000000e+00> : vector<8x128xf32>
    %546 = tpu.matmul %525, %340, %cst_116 {dimension_numbers = #tpu.dot_dimension_numbers<[1], [0], [0], [1], [0, 0, 1, 1], [], []>} : vector<8x32xf32>, vector<32x128xf32>, vector<8x128xf32> -> vector<8x128xf32>
    %547 = arith.addf %545, %546 : vector<8x128xf32>
    %548 = vector.extract_strided_slice %547 {offsets = [0, 0], sizes = [8, 96], strides = [1, 1]} : vector<8x128xf32> to vector<8x96xf32>
    %549 = arith.negf %548 : vector<8x96xf32>
    %550 = math.exp %549 : vector<8x96xf32>
    %cst_117 = arith.constant 1.000000e+00 : f32
    %551 = vector.broadcast %cst_117 : f32 to vector<8x96xf32>
    %552 = arith.addf %551, %550 : vector<8x96xf32>
    %553 = arith.divf %551, %552 : vector<8x96xf32>
    %554 = vector.extract_strided_slice %547 {offsets = [0, 96], sizes = [8, 32], strides = [1, 1]} : vector<8x128xf32> to vector<8x32xf32>
    %555 = math.tanh %554 : vector<8x32xf32>
    %556 = vector.extract_strided_slice %553 {offsets = [0, 0], sizes = [8, 32], strides = [1, 1]} : vector<8x96xf32> to vector<8x32xf32>
    %557 = vector.extract_strided_slice %553 {offsets = [0, 32], sizes = [8, 32], strides = [1, 1]} : vector<8x96xf32> to vector<8x32xf32>
    %558 = vector.extract_strided_slice %553 {offsets = [0, 64], sizes = [8, 32], strides = [1, 1]} : vector<8x96xf32> to vector<8x32xf32>
    %559 = arith.mulf %557, %523 : vector<8x32xf32>
    %560 = arith.mulf %556, %555 : vector<8x32xf32>
    %561 = arith.addf %559, %560 : vector<8x32xf32>
    %562 = math.tanh %561 : vector<8x32xf32>
    %563 = arith.mulf %558, %562 : vector<8x32xf32>
    %564 = vector.extract_strided_slice %350 {offsets = [16, 0], sizes = [8, 128], strides = [1, 1]} : vector<64x128xf32> to vector<8x128xf32>
    %cst_118 = arith.constant dense<0.000000e+00> : vector<8x128xf32>
    %565 = tpu.matmul %544, %343, %cst_118 {dimension_numbers = #tpu.dot_dimension_numbers<[1], [0], [0], [1], [0, 0, 1, 1], [], []>} : vector<8x32xf32>, vector<32x128xf32>, vector<8x128xf32> -> vector<8x128xf32>
    %566 = arith.addf %564, %565 : vector<8x128xf32>
    %567 = vector.extract_strided_slice %566 {offsets = [0, 0], sizes = [8, 96], strides = [1, 1]} : vector<8x128xf32> to vector<8x96xf32>
    %568 = arith.negf %567 : vector<8x96xf32>
    %569 = math.exp %568 : vector<8x96xf32>
    %cst_119 = arith.constant 1.000000e+00 : f32
    %570 = vector.broadcast %cst_119 : f32 to vector<8x96xf32>
    %571 = arith.addf %570, %569 : vector<8x96xf32>
    %572 = arith.divf %570, %571 : vector<8x96xf32>
    %573 = vector.extract_strided_slice %566 {offsets = [0, 96], sizes = [8, 32], strides = [1, 1]} : vector<8x128xf32> to vector<8x32xf32>
    %574 = math.tanh %573 : vector<8x32xf32>
    %575 = vector.extract_strided_slice %572 {offsets = [0, 0], sizes = [8, 32], strides = [1, 1]} : vector<8x96xf32> to vector<8x32xf32>
    %576 = vector.extract_strided_slice %572 {offsets = [0, 32], sizes = [8, 32], strides = [1, 1]} : vector<8x96xf32> to vector<8x32xf32>
    %577 = vector.extract_strided_slice %572 {offsets = [0, 64], sizes = [8, 32], strides = [1, 1]} : vector<8x96xf32> to vector<8x32xf32>
    %578 = arith.mulf %576, %542 : vector<8x32xf32>
    %579 = arith.mulf %575, %574 : vector<8x32xf32>
    %580 = arith.addf %578, %579 : vector<8x32xf32>
    %581 = math.tanh %580 : vector<8x32xf32>
    %582 = arith.mulf %577, %581 : vector<8x32xf32>
    %583 = vector.extract_strided_slice %347 {offsets = [48, 0], sizes = [8, 128], strides = [1, 1]} : vector<64x128xf32> to vector<8x128xf32>
    %cst_120 = arith.constant dense<0.000000e+00> : vector<8x128xf32>
    %584 = tpu.matmul %563, %340, %cst_120 {dimension_numbers = #tpu.dot_dimension_numbers<[1], [0], [0], [1], [0, 0, 1, 1], [], []>} : vector<8x32xf32>, vector<32x128xf32>, vector<8x128xf32> -> vector<8x128xf32>
    %585 = arith.addf %583, %584 : vector<8x128xf32>
    %586 = vector.extract_strided_slice %585 {offsets = [0, 0], sizes = [8, 96], strides = [1, 1]} : vector<8x128xf32> to vector<8x96xf32>
    %587 = arith.negf %586 : vector<8x96xf32>
    %588 = math.exp %587 : vector<8x96xf32>
    %cst_121 = arith.constant 1.000000e+00 : f32
    %589 = vector.broadcast %cst_121 : f32 to vector<8x96xf32>
    %590 = arith.addf %589, %588 : vector<8x96xf32>
    %591 = arith.divf %589, %590 : vector<8x96xf32>
    %592 = vector.extract_strided_slice %585 {offsets = [0, 96], sizes = [8, 32], strides = [1, 1]} : vector<8x128xf32> to vector<8x32xf32>
    %593 = math.tanh %592 : vector<8x32xf32>
    %594 = vector.extract_strided_slice %591 {offsets = [0, 0], sizes = [8, 32], strides = [1, 1]} : vector<8x96xf32> to vector<8x32xf32>
    %595 = vector.extract_strided_slice %591 {offsets = [0, 32], sizes = [8, 32], strides = [1, 1]} : vector<8x96xf32> to vector<8x32xf32>
    %596 = vector.extract_strided_slice %591 {offsets = [0, 64], sizes = [8, 32], strides = [1, 1]} : vector<8x96xf32> to vector<8x32xf32>
    %597 = arith.mulf %595, %561 : vector<8x32xf32>
    %598 = arith.mulf %594, %593 : vector<8x32xf32>
    %599 = arith.addf %597, %598 : vector<8x32xf32>
    %600 = math.tanh %599 : vector<8x32xf32>
    %601 = arith.mulf %596, %600 : vector<8x32xf32>
    %602 = vector.extract_strided_slice %350 {offsets = [8, 0], sizes = [8, 128], strides = [1, 1]} : vector<64x128xf32> to vector<8x128xf32>
    %cst_122 = arith.constant dense<0.000000e+00> : vector<8x128xf32>
    %603 = tpu.matmul %582, %343, %cst_122 {dimension_numbers = #tpu.dot_dimension_numbers<[1], [0], [0], [1], [0, 0, 1, 1], [], []>} : vector<8x32xf32>, vector<32x128xf32>, vector<8x128xf32> -> vector<8x128xf32>
    %604 = arith.addf %602, %603 : vector<8x128xf32>
    %605 = vector.extract_strided_slice %604 {offsets = [0, 0], sizes = [8, 96], strides = [1, 1]} : vector<8x128xf32> to vector<8x96xf32>
    %606 = arith.negf %605 : vector<8x96xf32>
    %607 = math.exp %606 : vector<8x96xf32>
    %cst_123 = arith.constant 1.000000e+00 : f32
    %608 = vector.broadcast %cst_123 : f32 to vector<8x96xf32>
    %609 = arith.addf %608, %607 : vector<8x96xf32>
    %610 = arith.divf %608, %609 : vector<8x96xf32>
    %611 = vector.extract_strided_slice %604 {offsets = [0, 96], sizes = [8, 32], strides = [1, 1]} : vector<8x128xf32> to vector<8x32xf32>
    %612 = math.tanh %611 : vector<8x32xf32>
    %613 = vector.extract_strided_slice %610 {offsets = [0, 0], sizes = [8, 32], strides = [1, 1]} : vector<8x96xf32> to vector<8x32xf32>
    %614 = vector.extract_strided_slice %610 {offsets = [0, 32], sizes = [8, 32], strides = [1, 1]} : vector<8x96xf32> to vector<8x32xf32>
    %615 = vector.extract_strided_slice %610 {offsets = [0, 64], sizes = [8, 32], strides = [1, 1]} : vector<8x96xf32> to vector<8x32xf32>
    %616 = arith.mulf %614, %580 : vector<8x32xf32>
    %617 = arith.mulf %613, %612 : vector<8x32xf32>
    %618 = arith.addf %616, %617 : vector<8x32xf32>
    %619 = math.tanh %618 : vector<8x32xf32>
    %620 = arith.mulf %615, %619 : vector<8x32xf32>
    %621 = vector.extract_strided_slice %347 {offsets = [56, 0], sizes = [8, 128], strides = [1, 1]} : vector<64x128xf32> to vector<8x128xf32>
    %cst_124 = arith.constant dense<0.000000e+00> : vector<8x128xf32>
    %622 = tpu.matmul %601, %340, %cst_124 {dimension_numbers = #tpu.dot_dimension_numbers<[1], [0], [0], [1], [0, 0, 1, 1], [], []>} : vector<8x32xf32>, vector<32x128xf32>, vector<8x128xf32> -> vector<8x128xf32>
    %623 = arith.addf %621, %622 : vector<8x128xf32>
    %624 = vector.extract_strided_slice %623 {offsets = [0, 0], sizes = [8, 96], strides = [1, 1]} : vector<8x128xf32> to vector<8x96xf32>
    %625 = arith.negf %624 : vector<8x96xf32>
    %626 = math.exp %625 : vector<8x96xf32>
    %cst_125 = arith.constant 1.000000e+00 : f32
    %627 = vector.broadcast %cst_125 : f32 to vector<8x96xf32>
    %628 = arith.addf %627, %626 : vector<8x96xf32>
    %629 = arith.divf %627, %628 : vector<8x96xf32>
    %630 = vector.extract_strided_slice %623 {offsets = [0, 96], sizes = [8, 32], strides = [1, 1]} : vector<8x128xf32> to vector<8x32xf32>
    %631 = math.tanh %630 : vector<8x32xf32>
    %632 = vector.extract_strided_slice %629 {offsets = [0, 0], sizes = [8, 32], strides = [1, 1]} : vector<8x96xf32> to vector<8x32xf32>
    %633 = vector.extract_strided_slice %629 {offsets = [0, 32], sizes = [8, 32], strides = [1, 1]} : vector<8x96xf32> to vector<8x32xf32>
    %634 = vector.extract_strided_slice %629 {offsets = [0, 64], sizes = [8, 32], strides = [1, 1]} : vector<8x96xf32> to vector<8x32xf32>
    %635 = arith.mulf %633, %599 : vector<8x32xf32>
    %636 = arith.mulf %632, %631 : vector<8x32xf32>
    %637 = arith.addf %635, %636 : vector<8x32xf32>
    %638 = math.tanh %637 : vector<8x32xf32>
    %639 = arith.mulf %634, %638 : vector<8x32xf32>
    %640 = vector.extract_strided_slice %350 {offsets = [0, 0], sizes = [8, 128], strides = [1, 1]} : vector<64x128xf32> to vector<8x128xf32>
    %cst_126 = arith.constant dense<0.000000e+00> : vector<8x128xf32>
    %641 = tpu.matmul %620, %343, %cst_126 {dimension_numbers = #tpu.dot_dimension_numbers<[1], [0], [0], [1], [0, 0, 1, 1], [], []>} : vector<8x32xf32>, vector<32x128xf32>, vector<8x128xf32> -> vector<8x128xf32>
    %642 = arith.addf %640, %641 : vector<8x128xf32>
    %643 = vector.extract_strided_slice %642 {offsets = [0, 0], sizes = [8, 96], strides = [1, 1]} : vector<8x128xf32> to vector<8x96xf32>
    %644 = arith.negf %643 : vector<8x96xf32>
    %645 = math.exp %644 : vector<8x96xf32>
    %cst_127 = arith.constant 1.000000e+00 : f32
    %646 = vector.broadcast %cst_127 : f32 to vector<8x96xf32>
    %647 = arith.addf %646, %645 : vector<8x96xf32>
    %648 = arith.divf %646, %647 : vector<8x96xf32>
    %649 = vector.extract_strided_slice %642 {offsets = [0, 96], sizes = [8, 32], strides = [1, 1]} : vector<8x128xf32> to vector<8x32xf32>
    %650 = math.tanh %649 : vector<8x32xf32>
    %651 = vector.extract_strided_slice %648 {offsets = [0, 0], sizes = [8, 32], strides = [1, 1]} : vector<8x96xf32> to vector<8x32xf32>
    %652 = vector.extract_strided_slice %648 {offsets = [0, 32], sizes = [8, 32], strides = [1, 1]} : vector<8x96xf32> to vector<8x32xf32>
    %653 = vector.extract_strided_slice %648 {offsets = [0, 64], sizes = [8, 32], strides = [1, 1]} : vector<8x96xf32> to vector<8x32xf32>
    %654 = arith.mulf %652, %618 : vector<8x32xf32>
    %655 = arith.mulf %651, %650 : vector<8x32xf32>
    %656 = arith.addf %654, %655 : vector<8x32xf32>
    %657 = math.tanh %656 : vector<8x32xf32>
    %658 = arith.mulf %653, %657 : vector<8x32xf32>
    %c0_128 = arith.constant 0 : index
    %c0_129 = arith.constant 0 : index
    %659 = vector.load %arg14[%c0_128, %c0_129] : memref<64x5xf32, #tpu.memory_space<vmem>>, vector<64x5xf32>
    %c0_130 = arith.constant 0 : index
    %c0_131 = arith.constant 0 : index
    %660 = vector.load %arg15[%c0_130, %c0_131] : memref<1x5xf32, #tpu.memory_space<vmem>>, vector<1x5xf32>
    %661 = vector.extract_strided_slice %659 {offsets = [0, 0], sizes = [32, 5], strides = [1, 1]} : vector<64x5xf32> to vector<32x5xf32>
    %cst_132 = arith.constant dense<0.000000e+00> : vector<8x5xf32>
    %662 = tpu.matmul %639, %661, %cst_132 {dimension_numbers = #tpu.dot_dimension_numbers<[1], [0], [0], [1], [0, 0, 1, 1], [], []>} : vector<8x32xf32>, vector<32x5xf32>, vector<8x5xf32> -> vector<8x5xf32>
    %663 = vector.broadcast %660 : vector<1x5xf32> to vector<8x5xf32>
    %664 = arith.addf %663, %662 : vector<8x5xf32>
    %665 = vector.extract_strided_slice %659 {offsets = [32, 0], sizes = [32, 5], strides = [1, 1]} : vector<64x5xf32> to vector<32x5xf32>
    %cst_133 = arith.constant dense<0.000000e+00> : vector<8x5xf32>
    %666 = tpu.matmul %658, %665, %cst_133 {dimension_numbers = #tpu.dot_dimension_numbers<[1], [0], [0], [1], [0, 0, 1, 1], [], []>} : vector<8x32xf32>, vector<32x5xf32>, vector<8x5xf32> -> vector<8x5xf32>
    %667 = arith.addf %664, %666 : vector<8x5xf32>
    %c0_134 = arith.constant 0 : index
    %c0_135 = arith.constant 0 : index
    %668 = vector.load %arg16[%c0_134, %c0_135] : memref<8x5xf32, #tpu.memory_space<vmem>>, vector<8x5xf32>
    tpu.vector_store %arg16[%c0_134, %c0_135], %667 {strides = array<i32>} : memref<8x5xf32, #tpu.memory_space<vmem>>, vector<8x5xf32>,
    return
  }
  func.func @transform_0(%arg0: i32) -> (i32, i32, i32) {
    %c0_i32 = arith.constant 0 : i32
    %c0_i32_0 = arith.constant 0 : i32
    %c0_i32_1 = arith.constant 0 : i32
    return %c0_i32, %arg0, %c0_i32_0 : i32, i32, i32
  }
  func.func @transform_1(%arg0: i32) -> (i32, i32) {
    %c0_i32 = arith.constant 0 : i32
    %c0_i32_0 = arith.constant 0 : i32
    %c0_i32_1 = arith.constant 0 : i32
    return %c0_i32, %c0_i32_0 : i32, i32
  }
  func.func @transform_2(%arg0: i32) -> (i32, i32) {
    %c0_i32 = arith.constant 0 : i32
    %c0_i32_0 = arith.constant 0 : i32
    %c0_i32_1 = arith.constant 0 : i32
    return %c0_i32, %c0_i32_0 : i32, i32
  }
  func.func @transform_3(%arg0: i32) -> (i32, i32) {
    %c0_i32 = arith.constant 0 : i32
    %c0_i32_0 = arith.constant 0 : i32
    %c0_i32_1 = arith.constant 0 : i32
    return %c0_i32, %c0_i32_0 : i32, i32
  }
  func.func @transform_4(%arg0: i32) -> (i32, i32) {
    %c0_i32 = arith.constant 0 : i32
    %c0_i32_0 = arith.constant 0 : i32
    %c0_i32_1 = arith.constant 0 : i32
    return %c0_i32, %c0_i32_0 : i32, i32
  }
  func.func @transform_5(%arg0: i32) -> (i32, i32) {
    %c0_i32 = arith.constant 0 : i32
    %c0_i32_0 = arith.constant 0 : i32
    %c0_i32_1 = arith.constant 0 : i32
    return %c0_i32, %c0_i32_0 : i32, i32
  }
  func.func @transform_6(%arg0: i32) -> (i32, i32) {
    %c0_i32 = arith.constant 0 : i32
    %c0_i32_0 = arith.constant 0 : i32
    %c0_i32_1 = arith.constant 0 : i32
    return %c0_i32, %c0_i32_0 : i32, i32
  }
  func.func @transform_7(%arg0: i32) -> (i32, i32) {
    %c0_i32 = arith.constant 0 : i32
    %c0_i32_0 = arith.constant 0 : i32
    %c0_i32_1 = arith.constant 0 : i32
    return %c0_i32, %c0_i32_0 : i32, i32
  }
  func.func @transform_8(%arg0: i32) -> (i32, i32) {
    %c0_i32 = arith.constant 0 : i32
    %c0_i32_0 = arith.constant 0 : i32
    %c0_i32_1 = arith.constant 0 : i32
    return %c0_i32, %c0_i32_0 : i32, i32
  }
  func.func @transform_9(%arg0: i32) -> (i32, i32) {
    %c0_i32 = arith.constant 0 : i32
    %c0_i32_0 = arith.constant 0 : i32
    %c0_i32_1 = arith.constant 0 : i32
    return %c0_i32, %c0_i32_0 : i32, i32
  }
  func.func @transform_10(%arg0: i32) -> (i32, i32) {
    %c0_i32 = arith.constant 0 : i32
    %c0_i32_0 = arith.constant 0 : i32
    %c0_i32_1 = arith.constant 0 : i32
    return %c0_i32, %c0_i32_0 : i32, i32
  }
  func.func @transform_11(%arg0: i32) -> (i32, i32) {
    %c0_i32 = arith.constant 0 : i32
    %c0_i32_0 = arith.constant 0 : i32
    %c0_i32_1 = arith.constant 0 : i32
    return %c0_i32, %c0_i32_0 : i32, i32
  }
  func.func @transform_12(%arg0: i32) -> (i32, i32) {
    %c0_i32 = arith.constant 0 : i32
    %c0_i32_0 = arith.constant 0 : i32
    %c0_i32_1 = arith.constant 0 : i32
    return %c0_i32, %c0_i32_0 : i32, i32
  }
  func.func @transform_13(%arg0: i32) -> (i32, i32) {
    %c0_i32 = arith.constant 0 : i32
    %c0_i32_0 = arith.constant 0 : i32
    %c0_i32_1 = arith.constant 0 : i32
    return %c0_i32, %c0_i32_0 : i32, i32
  }
  func.func @transform_14(%arg0: i32) -> (i32, i32) {
    %c0_i32 = arith.constant 0 : i32
    %c0_i32_0 = arith.constant 0 : i32
    %c0_i32_1 = arith.constant 0 : i32
    return %c0_i32, %c0_i32_0 : i32, i32
  }
  func.func @transform_15(%arg0: i32) -> (i32, i32) {
    %c0_i32 = arith.constant 0 : i32
    %c0_i32_0 = arith.constant 0 : i32
    return %arg0, %c0_i32 : i32, i32
  }
}

</mosaic_0001>

<bundles_post_ra>
// kernel: forward.1
= control target key start
LH: loop header
LB: loop body
LE: loop exit
PB: predicated region body
PF: predicated region fallthrough
CT: control target
= control target key end

     0   :  { %vm75_vm0 = vcmask 130048   ;;  %v2825_v9 = vmov 0.0   ;;  %vm185_vm9 = vcmask 261120   ;;  %s3707_s4 = inlined_call_operand.vmem [shape: f32[16,128], index: 4, kind: input, shape index: {}]   ;;  %s3708_s2 = inlined_call_operand.vmem [shape: f32[32,128], index: 2, kind: input, shape index: {}]   ;;  %s3709_s0 = inlined_call_operand.vmem [shape: f32[8,8,16], index: 0, kind: input, shape index: {}]   ;;  %s3710_s1 = inlined_call_operand.vmem [shape: f32[16,128], index: 1, kind: input, shape index: {}]   ;;  %s3711_s6 = inlined_call_operand.vmem [shape: f32[1,128], index: 6, kind: input, shape index: {}]   ;;  %s3712_s3 = inlined_call_operand.vmem [shape: f32[1,128], index: 3, kind: input, shape index: {}]   ;;  %s3713_s5 = inlined_call_operand.vmem [shape: f32[32,128], index: 5, kind: input, shape index: {}]   ;;  %s3714_s10 = inlined_call_operand.vmem [shape: f32[64,128], index: 10, kind: input, shape index: {}]   ;;  %s3715_s7 = inlined_call_operand.vmem [shape: f32[64,128], index: 7, kind: input, shape index: {}]   ;;  %s3716_s8 = inlined_call_operand.vmem [shape: f32[32,128], index: 8, kind: input, shape index: {}]   ;;  %s3717_s9 = inlined_call_operand.vmem [shape: f32[1,128], index: 9, kind: input, shape index: {}]   ;;  %s3718_s12 = inlined_call_operand.vmem [shape: f32[1,128], index: 12, kind: input, shape index: {}]   ;;  %s3719_s11 = inlined_call_operand.vmem [shape: f32[32,128], index: 11, kind: input, shape index: {}]   ;;  %s3720_s14 = inlined_call_operand.vmem [shape: f32[1,5], index: 14, kind: input, shape index: {}]   ;;  %s3721_s13 = inlined_call_operand.vmem [shape: f32[64,5], index: 13, kind: input, shape index: {}]   ;;  %s3722_s15 = inlined_call_operand.vmem [shape: f32[8,5], index: 15, kind: output, shape index: {}]  }
   0x1   :  { %v66_v0 = vld [vmem:[%s3707_s4 + $0x8] sm:$0xff]  ;;  %v2915_v1 = vld [vmem:[%s3708_s2 + $0x18] sm:$0xff]  ;;  %v65_v2 = vld [vmem:[%s3707_s4] sm:$0xff] }
   0x2   :  { %158 = vmatpush.msra.mxu1 %v66_v0  ;;  %201 = vmatpush.msra.mxu2 %v2915_v1  ;;  %v2924_v3 = vld [vmem:[%s3708_s2 + $0x10] sm:$0xff]  ;;  %v50_v4 = vld [vmem:[%s3709_s0] sm:$0xff]  ;;  %v2932_v5 = vld [vmem:[%s3708_s2 + $0x8] sm:$0xff] }
   0x3   :  { %v59_v6 = vld [vmem:[%s3710_s1 + $0x8] sm:$0xff]  ;;  %v58_v7 = vld [vmem:[%s3710_s1] sm:$0xff]  ;;  %v2960_v11 = vld [vmem:[%s3713_s5 + $0x18] sm:$0xff] }
   0x4   :  { %159 = vmatpush.msra.mxu1 %v65_v2  ;;  %202 = vmatpush.msra.mxu2 %v2924_v3  ;;  %v2945_v8 = vld [vmem:[%s3708_s2] sm:$0xff]  ;;  %v51_v10 = vld [vmem:[%s3709_s0 + $0x8] sm:$0xff]  ;;  %v2965_v12 = vld [vmem:[%s3713_s5 + $0x10] sm:$0xff] }
   0x5   :  { %2463 = vmatmul.msk.f32.vlgmr.msra.gmra.mxu1 %vm75_vm0, %v50_v4  ;;  %114 = vmatpush.msra.mxu0 %v59_v6  ;;  %v52_v13 = vld [vmem:[%s3709_s0 + $0x10] sm:$0xff]  ;;  %v2981_v14 = vld [vmem:[%s3713_s5 + $0x8] sm:$0xff]  ;;  %v2986_v15 = vld [vmem:[%s3713_s5] sm:$0xff] }
   0x6   :  { %203 = vmatpush.msra.mxu2 %v2932_v5  ;;  %264 = vmatpush.msra.mxu3 %v2960_v11  ;;  %v53_v16 = vld [vmem:[%s3709_s0 + $0x18] sm:$0xff]  ;;  %v54_v17 = vld [vmem:[%s3709_s0 + $0x20] sm:$0xff]  ;;  %v55_v18 = vld [vmem:[%s3709_s0 + $0x28] sm:$0xff] }
   0x7   :  { %115 = vmatpush.msra.mxu0 %v58_v7  ;;  %v56_v19 = vld [vmem:[%s3709_s0 + $0x30] sm:$0xff]  ;;  %v57_v20 = vld [vmem:[%s3709_s0 + $0x38] sm:$0xff]  ;;  %v2553_v21 = vld [vmem:[%s3711_s6] ss:$0 sm:$0xff]  ;;  %s2826_s0 = smov 32   ;;  %s2827_s6 = smov 64  }
   0x8   :  { %204 = vmatpush.msra.mxu2 %v2945_v8  ;;  %2455 = vmatmul.msk.f32.vlgmr.msra.gmra.mxu0 %vm75_vm0, %v50_v4  ;;  %v3035_v24 = vld [vmem:[%s3712_s3] ss:$0 sm:$0xff] }
   0x9   :  { %205 = vmatmul.f32.vlgmr.msra.gmra.mxu2 %v2825_v9  ;;  %265 = vmatpush.msra.mxu3 %v2965_v12 }
   0xa   :  { %330 = vmatpush.msrb.mxu2 %v2915_v1 }
   0xb   :  { %266 = vmatpush.msra.mxu3 %v2981_v14 }
   0xc   :  { %331 = vmatpush.msrb.mxu2 %v2924_v3 }
   0xd   :  { %2464 = vmatmul.msk.f32.gmra.mxu1 %vm75_vm0, %v51_v10  ;;  %267 = vmatpush.msra.mxu3 %v2986_v15 }
   0xe   :  { %332 = vmatpush.msrb.mxu2 %v2932_v5  ;;  %268 = vmatmul.f32.vlgmr.msra.gmra.mxu3 %v2825_v9 }
   0xf   :  { %397 = vmatpush.msrb.mxu3 %v2960_v11 }
  0x10   :  { %333 = vmatpush.msrb.mxu2 %v2945_v8  ;;  %2456 = vmatmul.msk.f32.gmra.mxu0 %vm75_vm0, %v51_v10 }
  0x11   :  { %398 = vmatpush.msrb.mxu3 %v2965_v12 }
  0x12   :  { %462 = vmatpush.msra.mxu2 %v2915_v1 }
  0x13   :  { %399 = vmatpush.msrb.mxu3 %v2981_v14 }
  0x14   :  { %463 = vmatpush.msra.mxu2 %v2924_v3 }
  0x15   :  { %2465 = vmatmul.msk.f32.gmra.mxu1 %vm75_vm0, %v52_v13  ;;  %400 = vmatpush.msrb.mxu3 %v2986_v15 }
  0x16   :  { %464 = vmatpush.msra.mxu2 %v2932_v5 }
  0x17   :  { %529 = vmatpush.msra.mxu3 %v2960_v11 }
  0x18   :  { %465 = vmatpush.msra.mxu2 %v2945_v8  ;;  %2457 = vmatmul.msk.f32.gmra.mxu0 %vm75_vm0, %v52_v13 }
  0x19   :  { %530 = vmatpush.msra.mxu3 %v2965_v12 }
  0x1b   :  { %531 = vmatpush.msra.mxu3 %v2981_v14 }
  0x1d   :  { %2466 = vmatmul.msk.f32.gmra.mxu1 %vm75_vm0, %v53_v16  ;;  %532 = vmatpush.msra.mxu3 %v2986_v15 }
  0x20   :  { %2458 = vmatmul.msk.f32.gmra.mxu0 %vm75_vm0, %v53_v16 }
  0x25   :  { %2467 = vmatmul.msk.f32.gmra.mxu1 %vm75_vm0, %v54_v17 }
  0x28   :  { %2459 = vmatmul.msk.f32.gmra.mxu0 %vm75_vm0, %v54_v17 }
  0x2d   :  { %2468 = vmatmul.msk.f32.gmra.mxu1 %vm75_vm0, %v55_v18 }
  0x30   :  { %2460 = vmatmul.msk.f32.gmra.mxu0 %vm75_vm0, %v55_v18 }
  0x35   :  { %2469 = vmatmul.msk.f32.gmra.mxu1 %vm75_vm0, %v56_v19 }
  0x38   :  { %2461 = vmatmul.msk.f32.gmra.mxu0 %vm75_vm0, %v56_v19 }
  0x3d   :  { %2470 = vmatmul.msk.f32.gmra.mxu1 %vm75_vm0, %v57_v20 }
  0x40   :  { %2462 = vmatmul.msk.f32.gmra.mxu0 %vm75_vm0, %v57_v20 }
  0x82   :  { %v161_v22 = vpop.f32.mrf.mxu1 }
  0x83   :  { %v3030_v23 = vadd.f32 %v2553_v21, %v161_v22 }
  0x85   :  { %v117_v25 = vpop.f32.mrf.mxu0 }
  0x86   :  { %v118_v26 = vadd.f32 %v3035_v24, %v117_v25 }
  0x8a   :  { %v164_v27 = vpop.f32.mrf.mxu1 }
  0x8b   :  { %v3038_v28 = vadd.f32 %v2553_v21, %v164_v27 }
  0x8c   :  { %v206_v29 = vpop.f32.mrf.mxu2 }
  0x8d   :  { %v209_v30 = vadd.f32 %v206_v29, %v118_v26 }
  0x8f   :  { %2558 = vtanh.f32 %v209_v30  ;;  %v2471_v47 = vmul.f32 -1.442695, %v209_v30 }
  0x91   :  { %v269_v43 = vpop.f32.mrf.mxu3 }
  0x92   :  { %v167_v31 = vpop.f32.mrf.mxu1 }
  0x93   :  { %v3040_v32 = vadd.f32 %v2553_v21, %v167_v31 }
  0x95   :  { %v2559_v33 = vpop.eup %2558 }
  0x96   :  { %232 = vrot.lane.b32.xlu1 %v2559_v33, %s2826_s0 }
  0x9a   :  { %v170_v34 = vpop.f32.mrf.mxu1 }
  0x9b   :  { %v3043_v35 = vadd.f32 %v2553_v21, %v170_v34 }
  0xa2   :  { %v173_v36 = vpop.f32.mrf.mxu1 }
  0xa3   :  { %v3045_v37 = vadd.f32 %v2553_v21, %v173_v36 }
  0xaa   :  { %v176_v38 = vpop.f32.mrf.mxu1 }
  0xab   :  { %v3047_v39 = vadd.f32 %v2553_v21, %v176_v38 }
  0xb2   :  { %v179_v40 = vpop.f32.mrf.mxu1 }
  0xb3   :  { %v3049_v41 = vadd.f32 %v2553_v21, %v179_v40 }
  0xba   :  { %v182_v42 = vpop.f32.mrf.mxu1 }
  0xbb   :  { %v183_v44 = vadd.f32 %v2553_v21, %v182_v42 }
  0xbd   :  { %v272_v45 = vadd.f32 %v269_v43, %v183_v44  ;;  %v120_v44 = vpop.f32.mrf.mxu0 }
  0xbf   :  { %2560 = vtanh.f32 %v272_v45  ;;  %v2472_v62 = vmul.f32 -1.442695, %v272_v45  ;;  %v121_v45 = vadd.f32 %v3035_v24, %v120_v44 }
  0xc0   :  { %2562 = vpow2.f32 %v2471_v47 }
  0xc5   :  { %v2561_v46 = vpop.eup %2560 }
  0xc6   :  { %295 = vrot.lane.b32.xlu0 %v2561_v46, %s2826_s0  ;;  %v2563_v48 = vpop.eup %2562 }
  0xc7   :  { %v213_v49 = vadd.f32 1.0, %v2563_v48 }
  0xc9   :  { %2564 = vrcp.f32 %v213_v49  ;;  %vm219_vm1 = vweird.f32 %v213_v49  ;;  %v225_v54 = vand.u32 2147483648, %v213_v49  ;;  %v223_v56 = vand.u32 2147483647, %v213_v49 }
  0xca   :  { %2566 = vpow2.f32 %v2472_v62 }
  0xcb   :  { %v226_v57 = vor.u32 1.1754944e-38, %v225_v54  ;;  %vm224_vm4 = vcmp.eq.f32.partialorder %v223_v56, 8.507059e+37 }
  0xcf   :  { %v2565_v50 = vpop.eup %2564 }
  0xd0   :  { %v215_v51 = vmul.f32 %v2565_v50, %v213_v49  ;;  %vm220_vm2 = vweird.f32 %v2565_v50  ;;  %v2567_v63 = vpop.eup %2566 }
  0xd1   :  { %vm221_vm3 = vmor %vm219_vm1, %vm220_vm2  ;;  %v276_v0 = vadd.f32 1.0, %v2567_v63 }
  0xd2   :  { %v216_v52 = vsub.f32 1.0, %v215_v51 }
  0xd3   :  { %2568 = vrcp.f32 %v276_v0  ;;  %v288_v13 = vand.u32 2147483648, %v276_v0  ;;  %vm282_vm6 = vweird.f32 %v276_v0  ;;  %v286_v16 = vand.u32 2147483647, %v276_v0 }
  0xd4   :  { %v217_v53 = vmul.f32 %v2565_v50, %v216_v52 }
  0xd5   :  { %v289_v18 = vor.u32 1.1754944e-38, %v288_v13  ;;  %vm287_vm8 = vcmp.eq.f32.partialorder %v286_v16, 8.507059e+37 }
  0xd6   :  { %v218_v55 = vadd.f32 %v2565_v50, %v217_v53 }
  0xd8   :  { %v222_v58 = vsel %vm221_vm3, %v2565_v50, %v218_v55 }
  0xd9   :  { %v227_v60 = vsel %vm224_vm4, %v226_v57, %v222_v58  ;;  %v2569_v2 = vpop.eup %2568 }
  0xda   :  { %v278_v4 = vmul.f32 %v2569_v2, %v276_v0  ;;  %vm283_vm5 = vweird.f32 %v2569_v2  ;;  %v230_v22 = vmul.f32 0.0, %v227_v60 }
  0xdb   :  { %vm284_vm7 = vmor %vm282_vm6, %vm283_vm5 }
  0xdc   :  { %v279_v6 = vsub.f32 1.0, %v278_v4 }
  0xde   :  { %v280_v7 = vmul.f32 %v2569_v2, %v279_v6 }
  0xe0   :  { %v281_v10 = vadd.f32 %v2569_v2, %v280_v7 }
  0xe2   :  { %v285_v17 = vsel %vm284_vm7, %v2569_v2, %v281_v10 }
  0xe3   :  { %v290_v20 = vsel %vm287_vm8, %v289_v18, %v285_v17 }
  0xe4   :  { %v293_v29 = vmul.f32 0.0, %v290_v20 }
 0x108   :  { %v233_v59 = vpop.permute.xlu1 %232 }
 0x109   :  { %v235_v61 = vmul.f32 %v233_v59, %v227_v60 }
 0x10b   :  { %237 = vrot.lane.b32.xlu2 %v235_v61, %s2826_s0 }
 0x138   :  { %v296_v19 = vpop.permute.xlu0 %295 }
 0x139   :  { %v298_v21 = vmul.f32 %v296_v19, %v290_v20 }
 0x13b   :  { %300 = vrot.lane.b32.xlu0 %v298_v21, %s2826_s0 }
 0x165   :  { %v238_v25 = vpop.permute.xlu2 %237 }
 0x166   :  { %v3054_v26 = vadd.f32 %v238_v25, %v230_v22 }
 0x168   :  { %2570 = vtanh.f32 %v3054_v26 }
 0x16e   :  { %v2571_v27 = vpop.eup %2570 }
 0x16f   :  { %243 = vrot.lane.b32.xlu0 %v2571_v27, %s2826_s0 }
 0x1ad   :  { %v301_v30 = vpop.permute.xlu0 %300 }
 0x1ae   :  { %v3058_v31 = vadd.f32 %v301_v30, %v293_v29 }
 0x1b0   :  { %2572 = vtanh.f32 %v3058_v31 }
 0x1b6   :  { %v2573_v33 = vpop.eup %2572 }
 0x1b7   :  { %306 = vrot.lane.b32.xlu1 %v2573_v33, %s2826_s0 }
 0x1e1   :  { %v244_v34 = vpop.permute.xlu0 %243 }
 0x1e2   :  { %v246_v36 = vmul.f32 %v244_v34, %v227_v60 }
 0x1e4   :  { %248 = vrot.lane.b32.xlu1 %v246_v36, %s2827_s6 }
 0x229   :  { %v307_v38 = vpop.permute.xlu1 %306 }
 0x22a   :  { %v3063_v40 = vmul.f32 %v307_v38, %v290_v20 }
 0x22c   :  { %381 = vrot.lane.b32.xlu2 %v3063_v40, %s2827_s6 }
 0x256   :  { %v249_v42 = vpop.permute.xlu1 %248 }
 0x257   :  { %251 = vst.msk [vmem:[#allocation2] sm:$0xff] %vm185_vm9, %v249_v42  ;;  %2473 = vmatmul.msk.f32.vlgmr.msrb.gmra.mxu2 %vm185_vm9, %v249_v42 }
 0x258   :  { %594 = vmatpush.msrb.mxu2 %v2915_v1 }
 0x25a   :  { %595 = vmatpush.msrb.mxu2 %v2924_v3 }
 0x25c   :  { %596 = vmatpush.msrb.mxu2 %v2932_v5 }
 0x25e   :  { %597 = vmatpush.msrb.mxu2 %v2945_v8 }
 0x286   :  { %v382_v43 = vpop.permute.xlu2 %381 }
 0x287   :  { %2475 = vmatmul.msk.f32.vlgmr.msrb.gmra.mxu3 %vm185_vm9, %v382_v43 }
 0x288   :  { %661 = vmatpush.msrb.mxu3 %v2960_v11 }
 0x28a   :  { %662 = vmatpush.msrb.mxu3 %v2965_v12 }
 0x28c   :  { %663 = vmatpush.msrb.mxu3 %v2981_v14 }
 0x28e   :  { %664 = vmatpush.msrb.mxu3 %v2986_v15 }
 0x2da   :  { %v335_v46 = vpop.f32.mrf.mxu2 }
 0x2db   :  { %v338_v47 = vadd.f32 %v335_v46, %v121_v45 }
 0x2dd   :  { %2574 = vtanh.f32 %v338_v47  ;;  %v2474_v53 = vmul.f32 -1.442695, %v338_v47 }
 0x2e3   :  { %v2575_v48 = vpop.eup %2574 }
 0x2e4   :  { %361 = vrot.lane.b32.xlu1 %v2575_v48, %s2826_s0 }
 0x30a   :  { %v402_v49 = vpop.f32.mrf.mxu3 }
 0x30b   :  { %v405_v50 = vadd.f32 %v402_v49, %v3049_v41 }
 0x30d   :  { %2576 = vtanh.f32 %v405_v50  ;;  %v2476_v52 = vmul.f32 -1.442695, %v405_v50 }
 0x30f   :  { %2578 = vpow2.f32 %v2476_v52 }
 0x310   :  { %2580 = vpow2.f32 %v2474_v53 }
 0x313   :  { %v2577_v51 = vpop.eup %2576 }
 0x314   :  { %428 = vrot.lane.b32.xlu2 %v2577_v51, %s2826_s0  ;;  %v123_v51 = vpop.f32.mrf.mxu0 }
 0x315   :  { %v2579_v54 = vpop.eup %2578  ;;  %v124_v52 = vadd.f32 %v3035_v24, %v123_v51 }
 0x316   :  { %v409_v55 = vadd.f32 1.0, %v2579_v54  ;;  %v2581_v56 = vpop.eup %2580 }
 0x317   :  { %v342_v57 = vadd.f32 1.0, %v2581_v56 }
 0x318   :  { %2582 = vrcp.f32 %v409_v55  ;;  %v421_v2 = vand.u32 2147483648, %v409_v55  ;;  %vm415_vm11 = vweird.f32 %v409_v55  ;;  %v419_v4 = vand.u32 2147483647, %v409_v55 }
 0x319   :  { %2584 = vrcp.f32 %v342_v57  ;;  %v354_v19 = vand.u32 2147483648, %v342_v57  ;;  %vm348_vm15 = vweird.f32 %v342_v57  ;;  %v352_v20 = vand.u32 2147483647, %v342_v57 }
 0x31a   :  { %v422_v10 = vor.u32 1.1754944e-38, %v421_v2  ;;  %vm420_vm13 = vcmp.eq.f32.partialorder %v419_v4, 8.507059e+37 }
 0x31b   :  { %v355_v25 = vor.u32 1.1754944e-38, %v354_v19  ;;  %vm353_vm1 = vcmp.eq.f32.partialorder %v352_v20, 8.507059e+37 }
 0x31e   :  { %v2583_v58 = vpop.eup %2582 }
 0x31f   :  { %v411_v59 = vmul.f32 %v2583_v58, %v409_v55  ;;  %v2585_v61 = vpop.eup %2584  ;;  %vm416_vm10 = vweird.f32 %v2583_v58 }
 0x320   :  { %v344_v62 = vmul.f32 %v2585_v61, %v342_v57  ;;  %vm417_vm12 = vmor %vm415_vm11, %vm416_vm10  ;;  %vm349_vm14 = vweird.f32 %v2585_v61 }
 0x321   :  { %v412_v60 = vsub.f32 1.0, %v411_v59  ;;  %vm350_vm0 = vmor %vm348_vm15, %vm349_vm14 }
 0x322   :  { %v345_v63 = vsub.f32 1.0, %v344_v62 }
 0x323   :  { %v413_v41 = vmul.f32 %v2583_v58, %v412_v60 }
 0x324   :  { %v346_v6 = vmul.f32 %v2585_v61, %v345_v63 }
 0x325   :  { %v414_v0 = vadd.f32 %v2583_v58, %v413_v41 }
 0x326   :  { %v347_v17 = vadd.f32 %v2585_v61, %v346_v6 }
 0x327   :  { %v418_v7 = vsel %vm417_vm12, %v2583_v58, %v414_v0 }
 0x328   :  { %v423_v16 = vsel %vm420_vm13, %v422_v10, %v418_v7  ;;  %v351_v21 = vsel %vm350_vm0, %v2585_v61, %v347_v17 }
 0x329   :  { %v356_v27 = vsel %vm353_vm1, %v355_v25, %v351_v21  ;;  %v426_v30 = vmul.f32 %v423_v16, %v3058_v31 }
 0x32a   :  { %v359_v36 = vmul.f32 %v356_v27, %v3054_v26 }
 0x356   :  { %v362_v22 = vpop.permute.xlu1 %361 }
 0x357   :  { %v364_v29 = vmul.f32 %v362_v22, %v356_v27 }
 0x36e   :  { %v429_v13 = vpop.permute.xlu2 %428 }
 0x36f   :  { %v431_v18 = vmul.f32 %v429_v13, %v423_v16 }
 0x371   :  { %433 = vrot.lane.b32.xlu0 %v431_v18, %s2826_s0 }
 0x379   :  { %366 = vrot.lane.b32.xlu0 %v364_v29, %s2826_s0 }
 0x3e3   :  { %v434_v33 = vpop.permute.xlu0 %433 }
 0x3e4   :  { %v3085_v34 = vadd.f32 %v434_v33, %v426_v30 }
 0x3e6   :  { %2586 = vtanh.f32 %v3085_v34 }
 0x3eb   :  { %v367_v38 = vpop.permute.xlu0 %366 }
 0x3ec   :  { %v2587_v42 = vpop.eup %2586  ;;  %v3089_v43 = vadd.f32 %v367_v38, %v359_v36 }
 0x3ed   :  { %439 = vrot.lane.b32.xlu2 %v2587_v42, %s2826_s0 }
 0x3ee   :  { %2588 = vtanh.f32 %v3089_v43 }
 0x3f4   :  { %v2589_v44 = vpop.eup %2588 }
 0x3f5   :  { %372 = vrot.lane.b32.xlu2 %v2589_v44, %s2826_s0 }
 0x447   :  { %v440_v45 = vpop.permute.xlu2 %439 }
 0x448   :  { %v3094_v31 = vmul.f32 %v440_v45, %v423_v16 }
 0x44a   :  { %513 = vrot.lane.b32.xlu1 %v3094_v31, %s2827_s6 }
 0x44f   :  { %v373_v46 = vpop.permute.xlu2 %372 }
 0x450   :  { %v375_v47 = vmul.f32 %v373_v46, %v356_v27 }
 0x452   :  { %377 = vrot.lane.b32.xlu0 %v375_v47, %s2827_s6 }
 0x4bc   :  { %v514_v26 = vpop.permute.xlu1 %513 }
 0x4bd   :  { %2479 = vmatmul.msk.f32.vlgmr.msra.gmra.mxu3 %vm185_vm9, %v514_v26 }
 0x4be   :  { %793 = vmatpush.msra.mxu3 %v2960_v11 }
 0x4c0   :  { %794 = vmatpush.msra.mxu3 %v2965_v12 }
 0x4c2   :  { %795 = vmatpush.msra.mxu3 %v2981_v14 }
 0x4c4   :  { %v378_v48 = vpop.permute.xlu0 %377  ;;  %796 = vmatpush.msra.mxu3 %v2986_v15 }
 0x4c5   :  { %380 = vst.msk [vmem:[#allocation2 + $0x8] sm:$0xff] %vm185_vm9, %v378_v48  ;;  %2477 = vmatmul.msk.f32.vlgmr.msra.gmra.mxu2 %vm185_vm9, %v378_v48 }
 0x4c6   :  { %726 = vmatpush.msra.mxu2 %v2915_v1 }
 0x4c8   :  { %727 = vmatpush.msra.mxu2 %v2924_v3 }
 0x4ca   :  { %728 = vmatpush.msra.mxu2 %v2932_v5 }
 0x4cc   :  { %729 = vmatpush.msra.mxu2 %v2945_v8 }
 0x540   :  { %v534_v49 = vpop.f32.mrf.mxu3 }
 0x541   :  { %v537_v50 = vadd.f32 %v534_v49, %v3047_v39 }
 0x543   :  { %2590 = vtanh.f32 %v537_v50  ;;  %v2480_v57 = vmul.f32 -1.442695, %v537_v50 }
 0x548   :  { %v467_v53 = vpop.f32.mrf.mxu2 }
 0x549   :  { %v2591_v54 = vpop.eup %2590  ;;  %v470_v55 = vadd.f32 %v467_v53, %v124_v52 }
 0x54a   :  { %560 = vrot.lane.b32.xlu1 %v2591_v54, %s2826_s0  ;;  %v126_v54 = vpop.f32.mrf.mxu0 }
 0x54b   :  { %2592 = vtanh.f32 %v470_v55  ;;  %v2478_v58 = vmul.f32 -1.442695, %v470_v55  ;;  %v127_v55 = vadd.f32 %v3035_v24, %v126_v54 }
 0x54c   :  { %2594 = vpow2.f32 %v2480_v57 }
 0x54d   :  { %2596 = vpow2.f32 %v2478_v58 }
 0x551   :  { %v2593_v56 = vpop.eup %2592 }
 0x552   :  { %493 = vrot.lane.b32.xlu0 %v2593_v56, %s2826_s0  ;;  %v2595_v59 = vpop.eup %2594 }
 0x553   :  { %v541_v60 = vadd.f32 1.0, %v2595_v59  ;;  %v2597_v39 = vpop.eup %2596 }
 0x554   :  { %v474_v61 = vadd.f32 1.0, %v2597_v39 }
 0x555   :  { %2598 = vrcp.f32 %v541_v60  ;;  %v553_v10 = vand.u32 2147483648, %v541_v60  ;;  %vm547_vm3 = vweird.f32 %v541_v60  ;;  %v551_v13 = vand.u32 2147483647, %v541_v60 }
 0x556   :  { %2600 = vrcp.f32 %v474_v61  ;;  %v486_v25 = vand.u32 2147483648, %v474_v61  ;;  %vm480_vm7 = vweird.f32 %v474_v61  ;;  %v484_v27 = vand.u32 2147483647, %v474_v61 }
 0x557   :  { %v554_v18 = vor.u32 1.1754944e-38, %v553_v10  ;;  %vm552_vm5 = vcmp.eq.f32.partialorder %v551_v13, 8.507059e+37 }
 0x558   :  { %v487_v30 = vor.u32 1.1754944e-38, %v486_v25  ;;  %vm485_vm10 = vcmp.eq.f32.partialorder %v484_v27, 8.507059e+37 }
 0x55b   :  { %v2599_v62 = vpop.eup %2598 }
 0x55c   :  { %v543_v41 = vmul.f32 %v2599_v62, %v541_v60  ;;  %v2601_v0 = vpop.eup %2600  ;;  %vm548_vm2 = vweird.f32 %v2599_v62 }
 0x55d   :  { %v476_v4 = vmul.f32 %v2601_v0, %v474_v61  ;;  %vm549_vm4 = vmor %vm547_vm3, %vm548_vm2  ;;  %vm481_vm6 = vweird.f32 %v2601_v0 }
 0x55e   :  { %v544_v63 = vsub.f32 1.0, %v543_v41  ;;  %vm482_vm8 = vmor %vm480_vm7, %vm481_vm6 }
 0x55f   :  { %v477_v7 = vsub.f32 1.0, %v476_v4 }
 0x560   :  { %v545_v2 = vmul.f32 %v2599_v62, %v544_v63 }
 0x561   :  { %v478_v17 = vmul.f32 %v2601_v0, %v477_v7 }
 0x562   :  { %v546_v6 = vadd.f32 %v2599_v62, %v545_v2 }
 0x563   :  { %v479_v22 = vadd.f32 %v2601_v0, %v478_v17 }
 0x564   :  { %v550_v16 = vsel %vm549_vm4, %v2599_v62, %v546_v6 }
 0x565   :  { %v555_v20 = vsel %vm552_vm5, %v554_v18, %v550_v16  ;;  %v483_v29 = vsel %vm482_vm8, %v2601_v0, %v479_v22 }
 0x566   :  { %v488_v36 = vsel %vm485_vm10, %v487_v30, %v483_v29  ;;  %v558_v42 = vmul.f32 %v555_v20, %v3085_v34 }
 0x567   :  { %v491_v46 = vmul.f32 %v488_v36, %v3089_v43 }
 0x5bc   :  { %v561_v19 = vpop.permute.xlu1 %560 }
 0x5bd   :  { %v563_v21 = vmul.f32 %v561_v19, %v555_v20 }
 0x5bf   :  { %565 = vrot.lane.b32.xlu2 %v563_v21, %s2826_s0 }
 0x5c4   :  { %v494_v33 = vpop.permute.xlu0 %493 }
 0x5c5   :  { %v496_v38 = vmul.f32 %v494_v33, %v488_v36 }
 0x5c7   :  { %498 = vrot.lane.b32.xlu2 %v496_v38, %s2826_s0 }
 0x619   :  { %v566_v44 = vpop.permute.xlu2 %565 }
 0x61a   :  { %v3117_v45 = vadd.f32 %v566_v44, %v558_v42 }
 0x61c   :  { %2602 = vtanh.f32 %v3117_v45 }
 0x621   :  { %v499_v47 = vpop.permute.xlu2 %498 }
 0x622   :  { %v2603_v26 = vpop.eup %2602  ;;  %v3121_v48 = vadd.f32 %v499_v47, %v491_v46 }
 0x623   :  { %571 = vrot.lane.b32.xlu1 %v2603_v26, %s2826_s0 }
 0x624   :  { %2604 = vtanh.f32 %v3121_v48 }
 0x62a   :  { %v2605_v49 = vpop.eup %2604 }
 0x62b   :  { %504 = vrot.lane.b32.xlu1 %v2605_v49, %s2826_s0 }
 0x695   :  { %v572_v50 = vpop.permute.xlu1 %571 }
 0x696   :  { %v3126_v34 = vmul.f32 %v572_v50, %v555_v20 }
 0x698   :  { %645 = vrot.lane.b32.xlu0 %v3126_v34, %s2827_s6 }
 0x69d   :  { %v505_v51 = vpop.permute.xlu1 %504 }
 0x69e   :  { %v507_v52 = vmul.f32 %v505_v51, %v488_v36 }
 0x6a0   :  { %509 = vrot.lane.b32.xlu2 %v507_v52, %s2827_s6 }
 0x6fa   :  { %v510_v43 = vpop.permute.xlu2 %509 }
 0x6fb   :  { %512 = vst.msk [vmem:[#allocation2 + $0x10] sm:$0xff] %vm185_vm9, %v510_v43  ;;  %2481 = vmatmul.msk.f32.vlgmr.msrb.gmra.mxu2 %vm185_vm9, %v510_v43 }
 0x6fc   :  { %858 = vmatpush.msrb.mxu2 %v2915_v1 }
 0x6fe   :  { %859 = vmatpush.msrb.mxu2 %v2924_v3 }
 0x700   :  { %860 = vmatpush.msrb.mxu2 %v2932_v5 }
 0x702   :  { %861 = vmatpush.msrb.mxu2 %v2945_v8 }
 0x70a   :  { %v646_v53 = vpop.permute.xlu0 %645 }
 0x70b   :  { %2483 = vmatmul.msk.f32.vlgmr.msrb.gmra.mxu3 %vm185_vm9, %v646_v53 }
 0x70c   :  { %925 = vmatpush.msrb.mxu3 %v2960_v11 }
 0x70e   :  { %926 = vmatpush.msrb.mxu3 %v2965_v12 }
 0x710   :  { %927 = vmatpush.msrb.mxu3 %v2981_v14 }
 0x712   :  { %928 = vmatpush.msrb.mxu3 %v2986_v15 }
 0x77e   :  { %v599_v56 = vpop.f32.mrf.mxu2 }
 0x77f   :  { %v602_v57 = vadd.f32 %v599_v56, %v127_v55 }
 0x781   :  { %2606 = vtanh.f32 %v602_v57  ;;  %v2482_v62 = vmul.f32 -1.442695, %v602_v57 }
 0x787   :  { %v2607_v58 = vpop.eup %2606 }
 0x788   :  { %625 = vrot.lane.b32.xlu2 %v2607_v58, %s2826_s0 }
 0x78e   :  { %v666_v59 = vpop.f32.mrf.mxu3 }
 0x78f   :  { %v669_v60 = vadd.f32 %v666_v59, %v3045_v37 }
 0x791   :  { %2608 = vtanh.f32 %v669_v60  ;;  %v2484_v61 = vmul.f32 -1.442695, %v669_v60 }
 0x793   :  { %2610 = vpow2.f32 %v2484_v61  ;;  %v129_v61 = vpop.f32.mrf.mxu0 }
 0x794   :  { %2612 = vpow2.f32 %v2482_v62  ;;  %v130_v62 = vadd.f32 %v3035_v24, %v129_v61 }
 0x797   :  { %v2609_v39 = vpop.eup %2608 }
 0x798   :  { %692 = vrot.lane.b32.xlu0 %v2609_v39, %s2826_s0 }
 0x799   :  { %v2611_v41 = vpop.eup %2610 }
 0x79a   :  { %v673_v63 = vadd.f32 1.0, %v2611_v41  ;;  %v2613_v0 = vpop.eup %2612 }
 0x79b   :  { %v606_v2 = vadd.f32 1.0, %v2613_v0 }
 0x79c   :  { %2614 = vrcp.f32 %v673_v63  ;;  %v685_v18 = vand.u32 2147483648, %v673_v63  ;;  %vm679_vm12 = vweird.f32 %v673_v63  ;;  %v683_v19 = vand.u32 2147483647, %v673_v63 }
 0x79d   :  { %2616 = vrcp.f32 %v606_v2  ;;  %v618_v33 = vand.u32 2147483648, %v606_v2  ;;  %vm612_vm0 = vweird.f32 %v606_v2  ;;  %v616_v36 = vand.u32 2147483647, %v606_v2 }
 0x79e   :  { %v686_v22 = vor.u32 1.1754944e-38, %v685_v18  ;;  %vm684_vm14 = vcmp.eq.f32.partialorder %v683_v19, 8.507059e+37 }
 0x79f   :  { %v619_v44 = vor.u32 1.1754944e-38, %v618_v33  ;;  %vm617_vm2 = vcmp.eq.f32.partialorder %v616_v36, 8.507059e+37 }
 0x7a2   :  { %v2615_v4 = vpop.eup %2614 }
 0x7a3   :  { %v675_v6 = vmul.f32 %v2615_v4, %v673_v63  ;;  %v2617_v10 = vpop.eup %2616  ;;  %vm680_vm11 = vweird.f32 %v2615_v4 }
 0x7a4   :  { %v608_v13 = vmul.f32 %v2617_v10, %v606_v2  ;;  %vm681_vm13 = vmor %vm679_vm12, %vm680_vm11  ;;  %vm613_vm15 = vweird.f32 %v2617_v10 }
 0x7a5   :  { %v676_v7 = vsub.f32 1.0, %v675_v6  ;;  %vm614_vm1 = vmor %vm612_vm0, %vm613_vm15 }
 0x7a6   :  { %v609_v16 = vsub.f32 1.0, %v608_v13 }
 0x7a7   :  { %v677_v37 = vmul.f32 %v2615_v4, %v676_v7 }
 0x7a8   :  { %v610_v20 = vmul.f32 %v2617_v10, %v609_v16 }
 0x7a9   :  { %v678_v17 = vadd.f32 %v2615_v4, %v677_v37 }
 0x7aa   :  { %v611_v29 = vadd.f32 %v2617_v10, %v610_v20 }
 0x7ab   :  { %v682_v21 = vsel %vm681_vm13, %v2615_v4, %v678_v17 }
 0x7ac   :  { %v687_v27 = vsel %vm684_vm14, %v686_v22, %v682_v21  ;;  %v615_v38 = vsel %vm614_vm1, %v2617_v10, %v611_v29 }
 0x7ad   :  { %v620_v46 = vsel %vm617_vm2, %v619_v44, %v615_v38  ;;  %v690_v26 = vmul.f32 %v687_v27, %v3117_v45 }
 0x7ae   :  { %v623_v51 = vmul.f32 %v620_v46, %v3121_v48 }
 0x7e2   :  { %v626_v42 = vpop.permute.xlu2 %625 }
 0x7e3   :  { %v628_v47 = vmul.f32 %v626_v42, %v620_v46 }
 0x80a   :  { %v693_v25 = vpop.permute.xlu0 %692 }
 0x80b   :  { %v695_v30 = vmul.f32 %v693_v25, %v687_v27 }
 0x80d   :  { %697 = vrot.lane.b32.xlu1 %v695_v30, %s2826_s0 }
 0x815   :  { %630 = vrot.lane.b32.xlu1 %v628_v47, %s2826_s0 }
 0x87f   :  { %v698_v49 = vpop.permute.xlu1 %697 }
 0x880   :  { %v3149_v50 = vadd.f32 %v698_v49, %v690_v26 }
 0x882   :  { %2618 = vtanh.f32 %v3149_v50 }
 0x887   :  { %v631_v52 = vpop.permute.xlu1 %630 }
 0x888   :  { %v2619_v43 = vpop.eup %2618  ;;  %v3153_v53 = vadd.f32 %v631_v52, %v623_v51 }
 0x889   :  { %703 = vrot.lane.b32.xlu0 %v2619_v43, %s2826_s0 }
 0x88a   :  { %2620 = vtanh.f32 %v3153_v53 }
 0x890   :  { %v2621_v54 = vpop.eup %2620 }
 0x891   :  { %636 = vrot.lane.b32.xlu0 %v2621_v54, %s2826_s0 }
 0x8fb   :  { %v704_v55 = vpop.permute.xlu0 %703 }
 0x8fc   :  { %v3158_v45 = vmul.f32 %v704_v55, %v687_v27 }
 0x8fe   :  { %777 = vrot.lane.b32.xlu2 %v3158_v45, %s2827_s6 }
 0x903   :  { %v637_v56 = vpop.permute.xlu0 %636 }
 0x904   :  { %v639_v57 = vmul.f32 %v637_v56, %v620_v46 }
 0x906   :  { %641 = vrot.lane.b32.xlu1 %v639_v57, %s2827_s6 }
 0x958   :  { %v778_v48 = vpop.permute.xlu2 %777 }
 0x959   :  { %2487 = vmatmul.msk.f32.vlgmr.msra.gmra.mxu3 %vm185_vm9, %v778_v48 }
 0x95a   :  { %1057 = vmatpush.msra.mxu3 %v2960_v11 }
 0x95c   :  { %1058 = vmatpush.msra.mxu3 %v2965_v12 }
 0x95e   :  { %1059 = vmatpush.msra.mxu3 %v2981_v14 }
 0x960   :  { %1060 = vmatpush.msra.mxu3 %v2986_v15 }
 0x978   :  { %v642_v58 = vpop.permute.xlu1 %641 }
 0x979   :  { %644 = vst.msk [vmem:[#allocation2 + $0x18] sm:$0xff] %vm185_vm9, %v642_v58  ;;  %2485 = vmatmul.msk.f32.vlgmr.msra.gmra.mxu2 %vm185_vm9, %v642_v58 }
 0x97a   :  { %990 = vmatpush.msra.mxu2 %v2915_v1 }
 0x97c   :  { %991 = vmatpush.msra.mxu2 %v2924_v3 }
 0x97e   :  { %992 = vmatpush.msra.mxu2 %v2932_v5 }
 0x980   :  { %993 = vmatpush.msra.mxu2 %v2945_v8 }
 0x9dc   :  { %v798_v59 = vpop.f32.mrf.mxu3 }
 0x9dd   :  { %v801_v60 = vadd.f32 %v798_v59, %v3043_v35 }
 0x9df   :  { %2622 = vtanh.f32 %v801_v60  ;;  %v2488_v3 = vmul.f32 -1.442695, %v801_v60  ;;  %v2814_v60 = vld [vmem:[%s3708_s2 + $0x18] sm:$0xff] }
 0x9e5   :  { %v2623_v39 = vpop.eup %2622 }
 0x9e6   :  { %824 = vrot.lane.b32.xlu2 %v2623_v39, %s2826_s0 }
 0x9fc   :  { %v731_v41 = vpop.f32.mrf.mxu2 }
 0x9fd   :  { %v734_v63 = vadd.f32 %v731_v41, %v130_v62  ;;  %v132_v62 = vpop.f32.mrf.mxu0 }
 0x9fe   :  { %v133_v41 = vadd.f32 %v3035_v24, %v132_v62 }
 0x9ff   :  { %2624 = vtanh.f32 %v734_v63  ;;  %v2486_v19 = vmul.f32 -1.442695, %v734_v63 }
 0xa00   :  { %2626 = vpow2.f32 %v2488_v3 }
 0xa05   :  { %v2625_v1 = vpop.eup %2624 }
 0xa06   :  { %757 = vrot.lane.b32.xlu1 %v2625_v1, %s2826_s0  ;;  %v2627_v5 = vpop.eup %2626 }
 0xa07   :  { %v805_v8 = vadd.f32 1.0, %v2627_v5 }
 0xa09   :  { %2628 = vrcp.f32 %v805_v8  ;;  %v817_v7 = vand.u32 2147483648, %v805_v8  ;;  %vm811_vm4 = vweird.f32 %v805_v8  ;;  %v815_v10 = vand.u32 2147483647, %v805_v8 }
 0xa0a   :  { %2630 = vpow2.f32 %v2486_v19 }
 0xa0b   :  { %v818_v37 = vor.u32 1.1754944e-38, %v817_v7  ;;  %vm816_vm6 = vcmp.eq.f32.partialorder %v815_v10, 8.507059e+37 }
 0xa0f   :  { %v2629_v0 = vpop.eup %2628 }
 0xa10   :  { %v807_v35 = vmul.f32 %v2629_v0, %v805_v8  ;;  %vm812_vm3 = vweird.f32 %v2629_v0  ;;  %v2631_v20 = vpop.eup %2630 }
 0xa11   :  { %vm813_vm5 = vmor %vm811_vm4, %vm812_vm3  ;;  %v738_v21 = vadd.f32 1.0, %v2631_v20 }
 0xa12   :  { %v808_v2 = vsub.f32 1.0, %v807_v35 }
 0xa13   :  { %2632 = vrcp.f32 %v738_v21  ;;  %v750_v33 = vand.u32 2147483648, %v738_v21  ;;  %vm744_vm8 = vweird.f32 %v738_v21  ;;  %v748_v36 = vand.u32 2147483647, %v738_v21 }
 0xa14   :  { %v809_v4 = vmul.f32 %v2629_v0, %v808_v2 }
 0xa15   :  { %v751_v42 = vor.u32 1.1754944e-38, %v750_v33  ;;  %vm749_vm11 = vcmp.eq.f32.partialorder %v748_v36, 8.507059e+37 }
 0xa16   :  { %v810_v6 = vadd.f32 %v2629_v0, %v809_v4 }
 0xa18   :  { %v814_v13 = vsel %vm813_vm5, %v2629_v0, %v810_v6 }
 0xa19   :  { %v819_v17 = vsel %vm816_vm6, %v818_v37, %v814_v13  ;;  %v2633_v22 = vpop.eup %2632 }
 0xa1a   :  { %v740_v25 = vmul.f32 %v2633_v22, %v738_v21  ;;  %vm745_vm7 = vweird.f32 %v2633_v22  ;;  %v822_v26 = vmul.f32 %v819_v17, %v3149_v50 }
 0xa1b   :  { %vm746_vm10 = vmor %vm744_vm8, %vm745_vm7 }
 0xa1c   :  { %v741_v27 = vsub.f32 1.0, %v740_v25 }
 0xa1e   :  { %v742_v29 = vmul.f32 %v2633_v22, %v741_v27 }
 0xa20   :  { %v743_v30 = vadd.f32 %v2633_v22, %v742_v29 }
 0xa22   :  { %v747_v38 = vsel %vm746_vm10, %v2633_v22, %v743_v30 }
 0xa23   :  { %v752_v46 = vsel %vm749_vm11, %v751_v42, %v747_v38 }
 0xa24   :  { %v755_v43 = vmul.f32 %v752_v46, %v3153_v53 }
 0xa40   :  { %v825_v16 = vpop.permute.xlu2 %824 }
 0xa41   :  { %v827_v18 = vmul.f32 %v825_v16, %v819_v17 }
 0xa43   :  { %829 = vrot.lane.b32.xlu0 %v827_v18, %s2826_s0 }
 0xa78   :  { %v758_v44 = vpop.permute.xlu1 %757 }
 0xa79   :  { %v760_v47 = vmul.f32 %v758_v44, %v752_v46 }
 0xa7b   :  { %762 = vrot.lane.b32.xlu0 %v760_v47, %s2826_s0 }
 0xab5   :  { %v830_v49 = vpop.permute.xlu0 %829 }
 0xab6   :  { %v3181_v51 = vadd.f32 %v830_v49, %v822_v26 }
 0xab8   :  { %2634 = vtanh.f32 %v3181_v51 }
 0xabe   :  { %v2635_v52 = vpop.eup %2634 }
 0xabf   :  { %835 = vrot.lane.b32.xlu2 %v2635_v52, %s2826_s0 }
 0xaed   :  { %v763_v54 = vpop.permute.xlu0 %762 }
 0xaee   :  { %v3186_v55 = vadd.f32 %v763_v54, %v755_v43 }
 0xaf0   :  { %2636 = vtanh.f32 %v3186_v55 }
 0xaf6   :  { %v2637_v56 = vpop.eup %2636 }
 0xaf7   :  { %768 = vrot.lane.b32.xlu2 %v2637_v56, %s2826_s0 }
 0xb19   :  { %v836_v57 = vpop.permute.xlu2 %835 }
 0xb1a   :  { %v3190_v50 = vmul.f32 %v836_v57, %v819_v17 }
 0xb1c   :  { %909 = vrot.lane.b32.xlu1 %v3190_v50, %s2827_s6 }
 0xb51   :  { %v769_v48 = vpop.permute.xlu2 %768 }
 0xb52   :  { %v771_v58 = vmul.f32 %v769_v48, %v752_v46 }
 0xb54   :  { %773 = vrot.lane.b32.xlu0 %v771_v58, %s2827_s6 }
 0xb8e   :  { %v910_v59 = vpop.permute.xlu1 %909 }
 0xb8f   :  { %2491 = vmatmul.msk.f32.vlgmr.msrb.gmra.mxu3 %vm185_vm9, %v910_v59 }
 0xb90   :  { %1189 = vmatpush.msrb.mxu3 %v2960_v11  ;;  %v2815_v11 = vld [vmem:[%s3708_s2 + $0x10] sm:$0xff] }
 0xb92   :  { %1190 = vmatpush.msrb.mxu3 %v2965_v12  ;;  %v2816_v12 = vld [vmem:[%s3708_s2 + $0x8] sm:$0xff] }
 0xb94   :  { %1191 = vmatpush.msrb.mxu3 %v2981_v14  ;;  %v2817_v14 = vld [vmem:[%s3708_s2] sm:$0xff] }
 0xb96   :  { %1192 = vmatpush.msrb.mxu3 %v2986_v15 }
 0xbc6   :  { %v3200_v53 = vpop.permute.xlu0 %773 }
 0xbc7   :  { %2489 = vmatmul.msk.f32.vlgmr.msrb.gmra.mxu2 %vm185_vm9, %v3200_v53 }
 0xbc8   :  { %1122 = vmatpush.msrb.mxu2 %v2814_v60 }
 0xbca   :  { %1123 = vmatpush.msrb.mxu2 %v2815_v11 }
 0xbcc   :  { %1124 = vmatpush.msrb.mxu2 %v2816_v12 }
 0xbce   :  { %1125 = vmatpush.msrb.mxu2 %v2817_v14 }
 0xc12   :  { %v930_v15 = vpop.f32.mrf.mxu3 }
 0xc13   :  { %v933_v39 = vadd.f32 %v930_v15, %v3040_v32  ;;  %v135_v15 = vpop.f32.mrf.mxu0 }
 0xc15   :  { %2638 = vtanh.f32 %v933_v39  ;;  %v2492_v5 = vmul.f32 -1.442695, %v933_v39  ;;  %v3247_v39 = vld [vmem:[%s3712_s3] ss:$0 sm:$0xff]  ;;  %s2828_s3 = smov 96  }
 0xc1b   :  { %v2639_v61 = vpop.eup %2638 }
 0xc1c   :  { %956 = vrot.lane.b32.xlu1 %v2639_v61, %s2826_s0  ;;  %v136_v61 = vadd.f32 %v3247_v39, %v135_v15 }
 0xc4a   :  { %v863_v63 = vpop.f32.mrf.mxu2 }
 0xc4b   :  { %v866_v1 = vadd.f32 %v863_v63, %v133_v41 }
 0xc4d   :  { %2640 = vtanh.f32 %v866_v1  ;;  %v2490_v18 = vmul.f32 -1.442695, %v866_v1 }
 0xc4e   :  { %2642 = vpow2.f32 %v2492_v5 }
 0xc53   :  { %v2641_v3 = vpop.eup %2640 }
 0xc54   :  { %889 = vrot.lane.b32.xlu0 %v2641_v3, %s2826_s0  ;;  %v2643_v8 = vpop.eup %2642 }
 0xc55   :  { %v937_v0 = vadd.f32 1.0, %v2643_v8 }
 0xc57   :  { %2644 = vrcp.f32 %v937_v0  ;;  %v949_v7 = vand.u32 2147483648, %v937_v0  ;;  %vm943_vm13 = vweird.f32 %v937_v0  ;;  %v947_v24 = vand.u32 2147483647, %v937_v0 }
 0xc58   :  { %2646 = vpow2.f32 %v2490_v18 }
 0xc59   :  { %v950_v13 = vor.u32 1.1754944e-38, %v949_v7  ;;  %vm948_vm15 = vcmp.eq.f32.partialorder %v947_v24, 8.507059e+37 }
 0xc5d   :  { %v2645_v35 = vpop.eup %2644 }
 0xc5e   :  { %v939_v32 = vmul.f32 %v2645_v35, %v937_v0  ;;  %vm944_vm12 = vweird.f32 %v2645_v35  ;;  %v2647_v19 = vpop.eup %2646 }
 0xc5f   :  { %vm945_vm14 = vmor %vm943_vm13, %vm944_vm12  ;;  %v870_v20 = vadd.f32 1.0, %v2647_v19 }
 0xc60   :  { %v940_v2 = vsub.f32 1.0, %v939_v32 }
 0xc61   :  { %2648 = vrcp.f32 %v870_v20  ;;  %v882_v30 = vand.u32 2147483648, %v870_v20  ;;  %vm876_vm1 = vweird.f32 %v870_v20  ;;  %v880_v33 = vand.u32 2147483647, %v870_v20 }
 0xc62   :  { %v941_v4 = vmul.f32 %v2645_v35, %v940_v2 }
 0xc63   :  { %v883_v38 = vor.u32 1.1754944e-38, %v882_v30  ;;  %vm881_vm3 = vcmp.eq.f32.partialorder %v880_v33, 8.507059e+37 }
 0xc64   :  { %v942_v6 = vadd.f32 %v2645_v35, %v941_v4 }
 0xc66   :  { %v946_v10 = vsel %vm945_vm14, %v2645_v35, %v942_v6 }
 0xc67   :  { %v951_v16 = vsel %vm948_vm15, %v950_v13, %v946_v10  ;;  %v2649_v21 = vpop.eup %2648 }
 0xc68   :  { %v872_v22 = vmul.f32 %v2649_v21, %v870_v20  ;;  %vm877_vm0 = vweird.f32 %v2649_v21  ;;  %v954_v47 = vmul.f32 %v951_v16, %v3181_v51 }
 0xc69   :  { %vm878_vm2 = vmor %vm876_vm1, %vm877_vm0 }
 0xc6a   :  { %v873_v25 = vsub.f32 1.0, %v872_v22 }
 0xc6c   :  { %v874_v27 = vmul.f32 %v2649_v21, %v873_v25 }
 0xc6e   :  { %v875_v29 = vadd.f32 %v2649_v21, %v874_v27 }
 0xc70   :  { %v879_v36 = vsel %vm878_vm2, %v2649_v21, %v875_v29 }
 0xc71   :  { %v884_v44 = vsel %vm881_vm3, %v883_v38, %v879_v36 }
 0xc72   :  { %v887_v43 = vmul.f32 %v884_v44, %v3186_v55 }
 0xc8e   :  { %v957_v37 = vpop.permute.xlu1 %956 }
 0xc8f   :  { %v959_v17 = vmul.f32 %v957_v37, %v951_v16 }
 0xc91   :  { %961 = vrot.lane.b32.xlu2 %v959_v17, %s2826_s0 }
 0xcc6   :  { %v890_v42 = vpop.permute.xlu0 %889 }
 0xcc7   :  { %v892_v46 = vmul.f32 %v890_v42, %v884_v44 }
 0xcc9   :  { %894 = vrot.lane.b32.xlu2 %v892_v46, %s2826_s0 }
 0xceb   :  { %v962_v26 = vpop.permute.xlu2 %961 }
 0xcec   :  { %v3223_v49 = vadd.f32 %v962_v26, %v954_v47 }
 0xcee   :  { %2650 = vtanh.f32 %v3223_v49 }
 0xcf4   :  { %v2651_v52 = vpop.eup %2650 }
 0xcf5   :  { %967 = vrot.lane.b32.xlu1 %v2651_v52, %s2826_s0 }
 0xd23   :  { %v895_v54 = vpop.permute.xlu2 %894 }
 0xd24   :  { %v3228_v56 = vadd.f32 %v895_v54, %v887_v43 }
 0xd26   :  { %2652 = vtanh.f32 %v3228_v56 }
 0xd2c   :  { %v2653_v57 = vpop.eup %2652 }
 0xd2d   :  { %900 = vrot.lane.b32.xlu1 %v2653_v57, %s2826_s0 }
 0xd67   :  { %v968_v48 = vpop.permute.xlu1 %967 }
 0xd68   :  { %v3232_v51 = vmul.f32 %v968_v48, %v951_v16 }
 0xd6a   :  { %1041 = vrot.lane.b32.xlu0 %v3232_v51, %s2827_s6 }
 0xd9f   :  { %v901_v58 = vpop.permute.xlu1 %900 }
 0xda0   :  { %v903_v59 = vmul.f32 %v901_v58, %v884_v44 }
 0xda2   :  { %905 = vrot.lane.b32.xlu2 %v903_v59, %s2827_s6 }
 0xddc   :  { %v1042_v60 = vpop.permute.xlu0 %1041 }
 0xddd   :  { %2495 = vmatmul.msk.f32.vlgmr.msra.gmra.mxu3 %vm185_vm9, %v1042_v60 }
 0xdfc   :  { %v3238_v55 = vpop.permute.xlu2 %905 }
 0xdfd   :  { %2493 = vmatmul.msk.f32.vlgmr.msra.gmra.mxu2 %vm185_vm9, %v3238_v55 }
 0xe60   :  { %v1062_v11 = vpop.f32.mrf.mxu3 }
 0xe61   :  { %v1065_v12 = vadd.f32 %v1062_v11, %v3038_v28 }
 0xe63   :  { %2654 = vtanh.f32 %v1065_v12  ;;  %v2496_v1 = vmul.f32 -1.442695, %v1065_v12 }
 0xe69   :  { %v2655_v14 = vpop.eup %2654 }
 0xe6a   :  { %1088 = vrot.lane.b32.xlu0 %v2655_v14, %s2826_s0  ;;  %v138_v14 = vpop.f32.mrf.mxu0 }
 0xe6b   :  { %v139_v15 = vadd.f32 %v3247_v39, %v138_v14  ;;  %v1251_v14 = vld [vmem:[%s3715_s7 + $0x18] sm:$0xff] }
 0xe80   :  { %v995_v62 = vpop.f32.mrf.mxu2 }
 0xe81   :  { %v998_v41 = vadd.f32 %v995_v62, %v136_v61 }
 0xe83   :  { %2656 = vtanh.f32 %v998_v41  ;;  %v2494_v28 = vmul.f32 -1.442695, %v998_v41 }
 0xe84   :  { %2658 = vpow2.f32 %v2496_v1 }
 0xe85   :  { %2660 = vpow2.f32 %v2494_v28 }
 0xe89   :  { %v2657_v63 = vpop.eup %2656 }
 0xe8a   :  { %1021 = vrot.lane.b32.xlu2 %v2657_v63, %s2826_s0  ;;  %v2659_v3 = vpop.eup %2658 }
 0xe8b   :  { %v1069_v5 = vadd.f32 1.0, %v2659_v3  ;;  %v2661_v8 = vpop.eup %2660 }
 0xe8c   :  { %v1002_v0 = vadd.f32 1.0, %v2661_v8 }
 0xe8d   :  { %2662 = vrcp.f32 %v1069_v5  ;;  %v1081_v13 = vand.u32 2147483648, %v1069_v5  ;;  %vm1075_vm5 = vweird.f32 %v1069_v5  ;;  %v1079_v37 = vand.u32 2147483647, %v1069_v5 }
 0xe8e   :  { %2664 = vrcp.f32 %v1002_v0  ;;  %v1014_v25 = vand.u32 2147483648, %v1002_v0  ;;  %vm1008_vm10 = vweird.f32 %v1002_v0  ;;  %v1012_v27 = vand.u32 2147483647, %v1002_v0 }
 0xe8f   :  { %v1082_v18 = vor.u32 1.1754944e-38, %v1081_v13  ;;  %vm1080_vm7 = vcmp.eq.f32.partialorder %v1079_v37, 8.507059e+37 }
 0xe90   :  { %v1015_v30 = vor.u32 1.1754944e-38, %v1014_v25  ;;  %vm1013_vm12 = vcmp.eq.f32.partialorder %v1012_v27, 8.507059e+37 }
 0xe93   :  { %v2663_v35 = vpop.eup %2662 }
 0xe94   :  { %v1071_v32 = vmul.f32 %v2663_v35, %v1069_v5  ;;  %v2665_v4 = vpop.eup %2664  ;;  %vm1076_vm4 = vweird.f32 %v2663_v35 }
 0xe95   :  { %v1004_v7 = vmul.f32 %v2665_v4, %v1002_v0  ;;  %vm1077_vm6 = vmor %vm1075_vm5, %vm1076_vm4  ;;  %vm1009_vm8 = vweird.f32 %v2665_v4  ;;  %vm314_vm5 = vcmask 523520  }
 0xe96   :  { %v1072_v2 = vsub.f32 1.0, %v1071_v32  ;;  %vm1010_vm11 = vmor %vm1008_vm10, %vm1009_vm8 }
 0xe97   :  { %v1005_v10 = vsub.f32 1.0, %v1004_v7 }
 0xe98   :  { %v1073_v6 = vmul.f32 %v2663_v35, %v1072_v2 }
 0xe99   :  { %v1006_v17 = vmul.f32 %v2665_v4, %v1005_v10 }
 0xe9a   :  { %v1074_v24 = vadd.f32 %v2663_v35, %v1073_v6 }
 0xe9b   :  { %v1007_v22 = vadd.f32 %v2665_v4, %v1006_v17 }
 0xe9c   :  { %v1078_v16 = vsel %vm1077_vm6, %v2663_v35, %v1074_v24  ;;  %vm1277_vm6 = vcmask 523264  }
 0xe9d   :  { %v1083_v20 = vsel %vm1080_vm7, %v1082_v18, %v1078_v16  ;;  %v1011_v29 = vsel %vm1010_vm11, %v2665_v4, %v1007_v22 }
 0xe9e   :  { %v1016_v36 = vsel %vm1013_vm12, %v1015_v30, %v1011_v29  ;;  %v1086_v42 = vmul.f32 %v1083_v20, %v3223_v49 }
 0xe9f   :  { %v1019_v47 = vmul.f32 %v1016_v36, %v3228_v56 }
 0xedc   :  { %v1089_v19 = vpop.permute.xlu0 %1088 }
 0xedd   :  { %v1091_v21 = vmul.f32 %v1089_v19, %v1083_v20 }
 0xedf   :  { %1093 = vrot.lane.b32.xlu1 %v1091_v21, %s2826_s0 }
 0xee4   :  { %v1022_v33 = vpop.permute.xlu2 %1021 }
 0xee5   :  { %v1024_v38 = vmul.f32 %v1022_v33, %v1016_v36 }
 0xee7   :  { %1026 = vrot.lane.b32.xlu1 %v1024_v38, %s2826_s0 }
 0xf51   :  { %v1094_v44 = vpop.permute.xlu1 %1093 }
 0xf52   :  { %v3254_v46 = vadd.f32 %v1094_v44, %v1086_v42 }
 0xf54   :  { %2666 = vtanh.f32 %v3254_v46 }
 0xf59   :  { %v1027_v26 = vpop.permute.xlu1 %1026 }
 0xf5a   :  { %v2667_v52 = vpop.eup %2666  ;;  %v3258_v43 = vadd.f32 %v1027_v26, %v1019_v47 }
 0xf5b   :  { %1099 = vrot.lane.b32.xlu0 %v2667_v52, %s2826_s0 }
 0xf5c   :  { %2668 = vtanh.f32 %v3258_v43 }
 0xf62   :  { %v2669_v54 = vpop.eup %2668 }
 0xf63   :  { %1032 = vrot.lane.b32.xlu0 %v2669_v54, %s2826_s0 }
 0xfcd   :  { %v1100_v57 = vpop.permute.xlu0 %1099 }
 0xfce   :  { %v3263_v49 = vmul.f32 %v1100_v57, %v1083_v20 }
 0xfd0   :  { %1173 = vrot.lane.b32.xlu2 %v3263_v49, %s2827_s6 }
 0xfd5   :  { %v1033_v48 = vpop.permute.xlu0 %1032 }
 0xfd6   :  { %v1035_v58 = vmul.f32 %v1033_v48, %v1016_v36  ;;  %v3316_v48 = vld [vmem:[%s3716_s8 + $0x18] sm:$0xff] }
 0xfd7   :  { %1399 = vmatpush.msra.mxu2 %v3316_v48 }
 0xfd8   :  { %1037 = vrot.lane.b32.xlu1 %v1035_v58, %s2827_s6  ;;  %v1253_v58 = vld [vmem:[%s3715_s7 + $0x28] sm:$0xff] }
0x102a   :  { %v1174_v56 = vpop.permute.xlu2 %1173 }
0x102b   :  { %2499 = vmatmul.msk.f32.vlgmr.msrb.gmra.mxu3 %vm185_vm9, %v1174_v56  ;;  %v3325_v56 = vld [vmem:[%s3716_s8 + $0x10] sm:$0xff] }
0x102c   :  { %1400 = vmatpush.msra.mxu2 %v3325_v56 }
0x104a   :  { %v3269_v59 = vpop.permute.xlu1 %1037 }
0x104b   :  { %2497 = vmatmul.msk.f32.vlgmr.msrb.gmra.mxu2 %vm185_vm9, %v3269_v59 }
0x10ae   :  { %v1194_v60 = vpop.f32.mrf.mxu3 }
0x10af   :  { %v1197_v11 = vadd.f32 %v1194_v60, %v3030_v23 }
0x10b1   :  { %2670 = vtanh.f32 %v1197_v11  ;;  %v2500_v63 = vmul.f32 -1.442695, %v1197_v11 }
0x10b7   :  { %v2671_v12 = vpop.eup %2670 }
0x10b8   :  { %1220 = vrot.lane.b32.xlu2 %v2671_v12, %s2826_s0  ;;  %v1264_v12 = vld [vmem:[%s3714_s10 + $0x18] sm:$0xff] }
0x10ce   :  { %v1127_v61 = vpop.f32.mrf.mxu2 }
0x10cf   :  { %v1130_v62 = vadd.f32 %v1127_v61, %v139_v15  ;;  %v3341_v15 = vld [vmem:[%s3716_s8 + $0x8] sm:$0xff]  ;;  %v1250_v61 = vld [vmem:[%s3715_s7 + $0x10] sm:$0xff] }
0x10d0   :  { %1401 = vmatpush.msra.mxu2 %v3341_v15 }
0x10d1   :  { %2672 = vtanh.f32 %v1130_v62  ;;  %v2498_v24 = vmul.f32 -1.442695, %v1130_v62  ;;  %v1263_v62 = vld [vmem:[%s3714_s10 + $0x10] sm:$0xff] }
0x10d2   :  { %2674 = vpow2.f32 %v2500_v63 }
0x10d7   :  { %v2673_v41 = vpop.eup %2672 }
0x10d8   :  { %1153 = vrot.lane.b32.xlu1 %v2673_v41, %s2826_s0  ;;  %v2675_v1 = vpop.eup %2674  ;;  %v3352_v41 = vld [vmem:[%s3716_s8] sm:$0xff] }
0x10d9   :  { %v1201_v28 = vadd.f32 1.0, %v2675_v1  ;;  %v1249_v1 = vld [vmem:[%s3715_s7 + $0x8] sm:$0xff]  ;;  %1402 = vmatpush.msra.mxu2 %v3352_v41 }
0x10da   :  { %1403 = vmatmul.f32.vlgmr.msra.gmra.mxu2 %v2825_v9 }
0x10db   :  { %2676 = vrcp.f32 %v1201_v28  ;;  %v1213_v35 = vand.u32 2147483648, %v1201_v28  ;;  %vm1207_vm14 = vweird.f32 %v1201_v28  ;;  %v1211_v39 = vand.u32 2147483647, %v1201_v28  ;;  %1520 = vmatpush.msrb.mxu2 %v3316_v48 }
0x10dc   :  { %2678 = vpow2.f32 %v2498_v24  ;;  %v3413_v24 = vld [vmem:[%s3719_s11 + $0x8] sm:$0xff] }
0x10dd   :  { %v1214_v2 = vor.u32 1.1754944e-38, %v1213_v35  ;;  %vm1212_vm0 = vcmp.eq.f32.partialorder %v1211_v39, 8.507059e+37  ;;  %1521 = vmatpush.msrb.mxu2 %v3325_v56 }
0x10df   :  { %1522 = vmatpush.msrb.mxu2 %v3341_v15 }
0x10e1   :  { %v2677_v3 = vpop.eup %2676  ;;  %1523 = vmatpush.msrb.mxu2 %v3352_v41 }
0x10e2   :  { %v1203_v23 = vmul.f32 %v2677_v3, %v1201_v28  ;;  %vm1208_vm13 = vweird.f32 %v2677_v3  ;;  %v2679_v10 = vpop.eup %2678  ;;  %v1262_v28 = vld [vmem:[%s3714_s10 + $0x8] sm:$0xff] }
0x10e3   :  { %vm1209_vm15 = vmor %vm1207_vm14, %vm1208_vm13  ;;  %v1134_v13 = vadd.f32 1.0, %v2679_v10  ;;  %1646 = vmatpush.msra.mxu2 %v3316_v48  ;;  %v3418_v10 = vld [vmem:[%s3719_s11] sm:$0xff] }
0x10e4   :  { %v1204_v5 = vsub.f32 1.0, %v1203_v23  ;;  %v1261_v23 = vld [vmem:[%s3714_s10] sm:$0xff] }
0x10e5   :  { %2680 = vrcp.f32 %v1134_v13  ;;  %v1146_v20 = vand.u32 2147483648, %v1134_v13  ;;  %vm1140_vm2 = vweird.f32 %v1134_v13  ;;  %v1144_v21 = vand.u32 2147483647, %v1134_v13  ;;  %1647 = vmatpush.msra.mxu2 %v3325_v56 }
0x10e6   :  { %v1205_v8 = vmul.f32 %v2677_v3, %v1204_v5 }
0x10e7   :  { %v1147_v25 = vor.u32 1.1754944e-38, %v1146_v20  ;;  %vm1145_vm4 = vcmp.eq.f32.partialorder %v1144_v21, 8.507059e+37  ;;  %1648 = vmatpush.msra.mxu2 %v3341_v15 }
0x10e8   :  { %v1206_v0 = vadd.f32 %v2677_v3, %v1205_v8 }
0x10e9   :  { %1649 = vmatpush.msra.mxu2 %v3352_v41 }
0x10ea   :  { %v1210_v32 = vsel %vm1209_vm15, %v2677_v3, %v1206_v0  ;;  %v1248_v3 = vld [vmem:[%s3715_s7] sm:$0xff] }
0x10eb   :  { %v1215_v6 = vsel %vm1212_vm0, %v1214_v2, %v1210_v32  ;;  %v2681_v37 = vpop.eup %2680  ;;  %v3395_v2 = vld [vmem:[%s3719_s11 + $0x18] sm:$0xff] }
0x10ec   :  { %v1136_v16 = vmul.f32 %v2681_v37, %v1134_v13  ;;  %vm1141_vm1 = vweird.f32 %v2681_v37  ;;  %v1218_v33 = vmul.f32 %v1215_v6, %v3254_v46  ;;  %1457 = vmatpush.msra.mxu3 %v3395_v2 }
0x10ed   :  { %vm1142_vm3 = vmor %vm1140_vm2, %vm1141_vm1 }
0x10ee   :  { %v1137_v17 = vsub.f32 1.0, %v1136_v16  ;;  %v3439_v16 = vld [vmem:[%s3717_s9] ss:$0 sm:$0xff] }
0x10f0   :  { %v1138_v18 = vmul.f32 %v2681_v37, %v1137_v17 }
0x10f2   :  { %v1139_v19 = vadd.f32 %v2681_v37, %v1138_v18 }
0x10f4   :  { %v1143_v22 = vsel %vm1142_vm3, %v2681_v37, %v1139_v19 }
0x10f5   :  { %v1148_v29 = vsel %vm1145_vm4, %v1147_v25, %v1143_v22 }
0x10f6   :  { %v1151_v44 = vmul.f32 %v1148_v29, %v3258_v43  ;;  %v1255_v43 = vld [vmem:[%s3715_s7 + $0x38] sm:$0xff] }
0x10f7   :  { %1310 = vmatpush.msrb.mxu0 %v1255_v43 }
0x1112   :  { %v1221_v4 = vpop.permute.xlu2 %1220 }
0x1113   :  { %v1223_v7 = vmul.f32 %v1221_v4, %v1215_v6  ;;  %v3400_v4 = vld [vmem:[%s3719_s11 + $0x10] sm:$0xff] }
0x1114   :  { %1458 = vmatpush.msra.mxu3 %v3400_v4 }
0x1115   :  { %1225 = vrot.lane.b32.xlu0 %v1223_v7, %s2826_s0 }
0x1116   :  { %1459 = vmatpush.msra.mxu3 %v3413_v24 }
0x1118   :  { %1460 = vmatpush.msra.mxu3 %v3418_v10 }
0x1119   :  { %1461 = vmatmul.f32.vlgmr.msra.gmra.mxu3 %v2825_v9 }
0x111a   :  { %1583 = vmatpush.msrb.mxu3 %v3395_v2 }
0x111c   :  { %1584 = vmatpush.msrb.mxu3 %v3400_v4 }
0x111e   :  { %1585 = vmatpush.msrb.mxu3 %v3413_v24 }
0x1120   :  { %1586 = vmatpush.msrb.mxu3 %v3418_v10 }
0x1122   :  { %1709 = vmatpush.msra.mxu3 %v3395_v2 }
0x1124   :  { %1710 = vmatpush.msra.mxu3 %v3400_v4 }
0x1126   :  { %1711 = vmatpush.msra.mxu3 %v3413_v24 }
0x1128   :  { %1712 = vmatpush.msra.mxu3 %v3418_v10 }
0x114a   :  { %v1154_v27 = vpop.permute.xlu1 %1153 }
0x114b   :  { %v1156_v30 = vmul.f32 %v1154_v27, %v1148_v29 }
0x114d   :  { %1158 = vrot.lane.b32.xlu0 %v1156_v30, %s2826_s0 }
0x115d   :  { %v1404_v18 = vpop.f32.mrf.mxu2 }
0x1187   :  { %v1226_v36 = vpop.permute.xlu0 %1225 }
0x1188   :  { %v1228_v38 = vadd.f32 %v1226_v36, %v1218_v33 }
0x118a   :  { %2682 = vtanh.f32 %v1228_v38 }
0x1190   :  { %v2683_v42 = vpop.eup %2682 }
0x1191   :  { %1231 = vrot.lane.b32.xlu2 %v2683_v42, %s2826_s0 }
0x1199   :  { %1104 = vrot.lane.b32.xlu2 %v3263_v49, %s2828_s3  ;;  %v1254_v49 = vld [vmem:[%s3715_s7 + $0x30] sm:$0xff] }
0x119a   :  { %1311 = vmatpush.msrb.mxu0 %v1254_v49 }
0x119c   :  { %1312 = vmatpush.msrb.mxu0 %v1253_v58 }
0x11a1   :  { %840 = vrot.lane.b32.xlu2 %v3190_v50, %s2828_s3 }
0x11a9   :  { %444 = vrot.lane.b32.xlu2 %v3094_v31, %s2828_s3 }
0x11bf   :  { %v1159_v47 = vpop.permute.xlu0 %1158 }
0x11c0   :  { %v1161_v26 = vadd.f32 %v1159_v47, %v1151_v44  ;;  %v3460_v47 = vld [vmem:[%s3718_s12] ss:$0 sm:$0xff] }
0x11c2   :  { %2684 = vtanh.f32 %v1161_v26 }
0x11c8   :  { %v2685_v52 = vpop.eup %2684 }
0x11c9   :  { %1164 = vrot.lane.b32.xlu0 %v2685_v52, %s2826_s0 }
0x11d1   :  { %708 = vrot.lane.b32.xlu0 %v3158_v45, %s2828_s3  ;;  %v1267_v45 = vld [vmem:[%s3714_s10 + $0x30] sm:$0xff] }
0x11d9   :  { %311 = vrot.lane.b32.xlu0 %v3063_v40, %s2828_s3  ;;  %v1268_v40 = vld [vmem:[%s3714_s10 + $0x38] sm:$0xff] }
0x11da   :  { %1354 = vmatpush.msrb.mxu1 %v1268_v40 }
0x11dc   :  { %1355 = vmatpush.msrb.mxu1 %v1267_v45 }
0x11eb   :  { %v1232_v46 = vpop.permute.xlu2 %1231 }
0x11ec   :  { %v1234_v54 = vmul.f32 %v1232_v46, %v1215_v6  ;;  %v1462_v46 = vpop.f32.mrf.mxu3 }
0x11ee   :  { %1236 = vrot.lane.b32.xlu1 %v1234_v54, %s2828_s3 }
0x11f3   :  { %v1105_v57 = vpop.permute.xlu2 %1104 }
0x11f4   :  { %1107 = vst.msk [vmem:[#allocation2 + $0x8] sm:$0xff] %vm314_vm5, %v1105_v57 }
0x11f6   :  { %972 = vrot.lane.b32.xlu1 %v3232_v51, %s2828_s3  ;;  %v1265_v51 = vld [vmem:[%s3714_s10 + $0x20] sm:$0xff] }
0x11fb   :  { %v841_v31 = vpop.permute.xlu2 %840  ;;  %v1241_v39 = vld [vmem:[#allocation2 + $0x8] sm:$0xff] }
0x11fc   :  { %843 = vst.msk [vmem:[#allocation2 + $0x18] sm:$0xff] %vm314_vm5, %v841_v31 }
0x11fe   :  { %576 = vrot.lane.b32.xlu1 %v3126_v34, %s2828_s3  ;;  %v1266_v34 = vld [vmem:[%s3714_s10 + $0x28] sm:$0xff] }
0x11ff   :  { %1356 = vmatpush.msrb.mxu1 %v1266_v34 }
0x1201   :  { %1357 = vmatpush.msrb.mxu1 %v1265_v51 }
0x1203   :  { %v445_v50 = vpop.permute.xlu2 %444  ;;  %1358 = vmatpush.msrb.mxu1 %v1264_v12 }
0x1204   :  { %447 = vst.msk [vmem:[#allocation2 + $0x30] sm:$0xff] %vm314_vm5, %v445_v50 }
0x1205   :  { %1040 = vst.msk [vmem:[#allocation2 + $0x30] sm:$0xff] %vm185_vm9, %v3269_v59  ;;  %v1252_v59 = vld [vmem:[%s3715_s7 + $0x20] sm:$0xff]  ;;  %1359 = vmatpush.msrb.mxu1 %v1263_v62 }
0x1206   :  { %1313 = vmatpush.msrb.mxu0 %v1252_v59 }
0x1207   :  { %1360 = vmatpush.msrb.mxu1 %v1262_v28 }
0x1208   :  { %1314 = vmatpush.msrb.mxu0 %v1251_v14 }
0x1209   :  { %1361 = vmatpush.msrb.mxu1 %v1261_v23 }
0x120a   :  { %1315 = vmatpush.msrb.mxu0 %v1250_v61 }
0x120c   :  { %1316 = vmatpush.msrb.mxu0 %v1249_v1  ;;  %v1246_v13 = vld [vmem:[#allocation2 + $0x30] sm:$0xff] }
0x120e   :  { %1317 = vmatpush.msrb.mxu0 %v1248_v3 }
0x123b   :  { %v1165_v60 = vpop.permute.xlu0 %1164 }
0x123c   :  { %v1167_v11 = vmul.f32 %v1165_v60, %v1148_v29 }
0x123e   :  { %1169 = vrot.lane.b32.xlu1 %v1167_v11, %s2827_s6 }
0x1243   :  { %v709_v63 = vpop.permute.xlu0 %708 }
0x1244   :  { %711 = vst.msk [vmem:[#allocation2 + $0x20] sm:$0xff] %vm314_vm5, %v709_v63 }
0x1245   :  { %776 = vst.msk [vmem:[#allocation2 + $0x20] sm:$0xff] %vm185_vm9, %v3200_v53 }
0x124b   :  { %v312_v53 = vpop.permute.xlu0 %311 }
0x124c   :  { %315 = vst.msk [vmem:[#allocation2 + $0x38] sm:$0xff] %vm314_vm5, %v312_v53  ;;  %v1244_v6 = vld [vmem:[#allocation2 + $0x20] sm:$0xff] }
0x1260   :  { %v1237_v5 = vpop.permute.xlu1 %1236 }
0x1261   :  { %1239 = vst.msk [vmem:[#allocation2] sm:$0xff] %vm314_vm5, %v1237_v5 }
0x1268   :  { %v973_v8 = vpop.permute.xlu1 %972  ;;  %v1240_v0 = vld [vmem:[#allocation2] sm:$0xff] }
0x1269   :  { %975 = vst.msk [vmem:[#allocation2 + $0x10] sm:$0xff] %vm314_vm5, %v973_v8  ;;  %2501 = vmatmul.msk.f32.vlgmr.msrb.gmra.mxu0 %vm1277_vm6, %v1240_v0  ;;  %2509 = vmatmul.msk.f32.vlgmr.msrb.gmra.mxu1 %vm1277_vm6, %v1240_v0 }
0x1270   :  { %v577_v35 = vpop.permute.xlu1 %576  ;;  %v1242_v32 = vld [vmem:[#allocation2 + $0x10] sm:$0xff] }
0x1271   :  { %579 = vst.msk [vmem:[#allocation2 + $0x28] sm:$0xff] %vm314_vm5, %v577_v35  ;;  %2502 = vmatmul.msk.f32.gmra.mxu0 %vm1277_vm6, %v1241_v39  ;;  %2510 = vmatmul.msk.f32.gmra.mxu1 %vm1277_vm6, %v1241_v39 }
0x1272   :  { %908 = vst.msk [vmem:[#allocation2 + $0x28] sm:$0xff] %vm185_vm9, %v3238_v55  ;;  %v1243_v55 = vld [vmem:[#allocation2 + $0x18] sm:$0xff] }
0x1279   :  { %2503 = vmatmul.msk.f32.gmra.mxu0 %vm1277_vm6, %v1242_v32  ;;  %2511 = vmatmul.msk.f32.gmra.mxu1 %vm1277_vm6, %v1242_v32  ;;  %v1245_v7 = vld [vmem:[#allocation2 + $0x28] sm:$0xff] }
0x1281   :  { %2504 = vmatmul.msk.f32.gmra.mxu0 %vm1277_vm6, %v1243_v55  ;;  %2512 = vmatmul.msk.f32.gmra.mxu1 %vm1277_vm6, %v1243_v55 }
0x1289   :  { %2505 = vmatmul.msk.f32.gmra.mxu0 %vm1277_vm6, %v1244_v6  ;;  %2513 = vmatmul.msk.f32.gmra.mxu1 %vm1277_vm6, %v1244_v6 }
0x1291   :  { %2506 = vmatmul.msk.f32.gmra.mxu0 %vm1277_vm6, %v1245_v7  ;;  %2514 = vmatmul.msk.f32.gmra.mxu1 %vm1277_vm6, %v1245_v7 }
0x1299   :  { %2507 = vmatmul.msk.f32.gmra.mxu0 %vm1277_vm6, %v1246_v13  ;;  %2515 = vmatmul.msk.f32.gmra.mxu1 %vm1277_vm6, %v1246_v13 }
0x12b0   :  { %v1170_v9 = vpop.permute.xlu1 %1169 }
0x12b1   :  { %1172 = vst.msk [vmem:[#allocation2 + $0x38] sm:$0xff] %vm185_vm9, %v1170_v9 }
0x12b8   :  { %v1247_v37 = vld [vmem:[#allocation2 + $0x38] sm:$0xff] }
0x12b9   :  { %2508 = vmatmul.msk.f32.gmra.mxu0 %vm1277_vm6, %v1247_v37  ;;  %2516 = vmatmul.msk.f32.gmra.mxu1 %vm1277_vm6, %v1247_v37 }
0x12e6   :  { %v1319_v17 = vpop.f32.mrf.mxu0  ;;  %v3442_v22 = vpop.f32.mrf.mxu1 }
0x12e7   :  { %v1320_v19 = vadd.f32 %v3439_v16, %v1319_v17 }
0x12e9   :  { %v1407_v20 = vadd.f32 %v1404_v18, %v1320_v19 }
0x12eb   :  { %2686 = vtanh.f32 %v1407_v20  ;;  %v2517_v33 = vmul.f32 -1.442695, %v1407_v20 }
0x12ed   :  { %2688 = vpow2.f32 %v2517_v33 }
0x12ee   :  { %v3445_v25 = vpop.f32.mrf.mxu1 }
0x12f1   :  { %v2687_v21 = vpop.eup %2686 }
0x12f2   :  { %1430 = vrot.lane.b32.xlu2 %v2687_v21, %s2826_s0 }
0x12f3   :  { %v2689_v38 = vpop.eup %2688 }
0x12f4   :  { %v1411_v42 = vadd.f32 1.0, %v2689_v38 }
0x12f6   :  { %v3447_v27 = vpop.f32.mrf.mxu1  ;;  %2690 = vrcp.f32 %v1411_v42  ;;  %v1423_v51 = vand.u32 2147483648, %v1411_v42  ;;  %vm1417_vm8 = vweird.f32 %v1411_v42  ;;  %v1421_v43 = vand.u32 2147483647, %v1411_v42 }
0x12f8   :  { %v1424_v58 = vor.u32 1.1754944e-38, %v1423_v51  ;;  %vm1422_vm11 = vcmp.eq.f32.partialorder %v1421_v43, 8.507059e+37 }
0x12fc   :  { %v2691_v26 = vpop.eup %2690 }
0x12fd   :  { %v1413_v31 = vmul.f32 %v2691_v26, %v1411_v42  ;;  %vm1418_vm7 = vweird.f32 %v2691_v26  ;;  %v1322_v42 = vpop.f32.mrf.mxu0 }
0x12fe   :  { %v3449_v29 = vpop.f32.mrf.mxu1  ;;  %vm1419_vm10 = vmor %vm1417_vm8, %vm1418_vm7 }
0x12ff   :  { %v1414_v50 = vsub.f32 1.0, %v1413_v31 }
0x1301   :  { %v1415_v45 = vmul.f32 %v2691_v26, %v1414_v50 }
0x1303   :  { %v1416_v34 = vadd.f32 %v2691_v26, %v1415_v45 }
0x1305   :  { %v1420_v49 = vsel %vm1419_vm10, %v2691_v26, %v1416_v34  ;;  %v1323_v26 = vadd.f32 %v3439_v16, %v1322_v42 }
0x1306   :  { %v3451_v30 = vpop.f32.mrf.mxu1  ;;  %v1425_v59 = vsel %vm1422_vm11, %v1424_v58, %v1420_v49 }
0x1307   :  { %v1428_v32 = vmul.f32 0.0, %v1425_v59 }
0x130e   :  { %v3453_v36 = vpop.f32.mrf.mxu1 }
0x1316   :  { %v3455_v44 = vpop.f32.mrf.mxu1 }
0x1317   :  { %v1382_v45 = vadd.f32 %v3460_v47, %v3455_v44 }
0x1336   :  { %v1384_v52 = vpop.f32.mrf.mxu1 }
0x1337   :  { %v1385_v54 = vadd.f32 %v3460_v47, %v1384_v52 }
0x1339   :  { %v1465_v57 = vadd.f32 %v1462_v46, %v1385_v54 }
0x133b   :  { %2692 = vtanh.f32 %v1465_v57  ;;  %v2518_v12 = vmul.f32 -1.442695, %v1465_v57 }
0x133d   :  { %2694 = vpow2.f32 %v2518_v12 }
0x1341   :  { %v2693_v40 = vpop.eup %2692 }
0x1342   :  { %1488 = vrot.lane.b32.xlu0 %v2693_v40, %s2826_s0 }
0x1343   :  { %v2695_v14 = vpop.eup %2694 }
0x1344   :  { %v1469_v61 = vadd.f32 1.0, %v2695_v14 }
0x1346   :  { %2696 = vrcp.f32 %v1469_v61  ;;  %v1481_v23 = vand.u32 2147483648, %v1469_v61  ;;  %vm1475_vm13 = vweird.f32 %v1469_v61  ;;  %v1479_v53 = vand.u32 2147483647, %v1469_v61 }
0x1348   :  { %v1482_v8 = vor.u32 1.1754944e-38, %v1481_v23  ;;  %vm1480_vm15 = vcmp.eq.f32.partialorder %v1479_v53, 8.507059e+37 }
0x134c   :  { %v1431_v60 = vpop.permute.xlu2 %1430  ;;  %v2697_v62 = vpop.eup %2696 }
0x134d   :  { %v1433_v11 = vmul.f32 %v1431_v60, %v1425_v59  ;;  %v1471_v63 = vmul.f32 %v2697_v62, %v1469_v61  ;;  %vm1476_vm12 = vweird.f32 %v2697_v62 }
0x134e   :  { %vm1477_vm14 = vmor %vm1475_vm13, %vm1476_vm12 }
0x134f   :  { %1435 = vrot.lane.b32.xlu1 %v1433_v11, %s2826_s0  ;;  %v1472_v1 = vsub.f32 1.0, %v1471_v63 }
0x1351   :  { %v1473_v28 = vmul.f32 %v2697_v62, %v1472_v1 }
0x1353   :  { %v1474_v3 = vadd.f32 %v2697_v62, %v1473_v28 }
0x1355   :  { %v1478_v5 = vsel %vm1477_vm14, %v2697_v62, %v1474_v3 }
0x1356   :  { %v1483_v35 = vsel %vm1480_vm15, %v1482_v8, %v1478_v5 }
0x1357   :  { %v1486_v13 = vmul.f32 0.0, %v1483_v35 }
0x13b4   :  { %v1489_v0 = vpop.permute.xlu0 %1488 }
0x13b5   :  { %v1491_v39 = vmul.f32 %v1489_v0, %v1483_v35 }
0x13b7   :  { %1493 = vrot.lane.b32.xlu2 %v1491_v39, %s2826_s0 }
0x13c1   :  { %v1436_v55 = vpop.permute.xlu1 %1435 }
0x13c2   :  { %v3466_v6 = vadd.f32 %v1436_v55, %v1428_v32 }
0x13c4   :  { %2698 = vtanh.f32 %v3466_v6 }
0x13ca   :  { %v2699_v7 = vpop.eup %2698 }
0x13cb   :  { %1441 = vrot.lane.b32.xlu0 %v2699_v7, %s2826_s0 }
0x1411   :  { %v1494_v9 = vpop.permute.xlu2 %1493 }
0x1412   :  { %v3470_v37 = vadd.f32 %v1494_v9, %v1486_v13 }
0x1414   :  { %2700 = vtanh.f32 %v3470_v37 }
0x141a   :  { %v2701_v17 = vpop.eup %2700 }
0x141b   :  { %1499 = vrot.lane.b32.xlu1 %v2701_v17, %s2826_s0 }
0x143d   :  { %v1442_v18 = vpop.permute.xlu0 %1441 }
0x143e   :  { %v1444_v19 = vmul.f32 %v1442_v18, %v1425_v59 }
0x1440   :  { %1504 = vrot.lane.b32.xlu2 %v1444_v19, %s2827_s6 }
0x148d   :  { %v1500_v20 = vpop.permute.xlu1 %1499 }
0x148e   :  { %v1502_v21 = vmul.f32 %v1500_v20, %v1483_v35 }
0x1490   :  { %1567 = vrot.lane.b32.xlu0 %v1502_v21, %s2827_s6 }
0x149a   :  { %v1505_v33 = vpop.permute.xlu2 %1504 }
0x149b   :  { %2519 = vmatmul.msk.f32.vlgmr.msrb.gmra.mxu2 %vm185_vm9, %v1505_v33 }
0x149c   :  { %1772 = vmatpush.msrb.mxu2 %v3316_v48 }
0x149e   :  { %1773 = vmatpush.msrb.mxu2 %v3325_v56 }
0x14a0   :  { %1774 = vmatpush.msrb.mxu2 %v3341_v15 }
0x14a2   :  { %1775 = vmatpush.msrb.mxu2 %v3352_v41 }
0x1502   :  { %v1568_v38 = vpop.permute.xlu0 %1567 }
0x1503   :  { %2521 = vmatmul.msk.f32.vlgmr.msrb.gmra.mxu3 %vm185_vm9, %v1568_v38 }
0x1504   :  { %1835 = vmatpush.msrb.mxu3 %v3395_v2 }
0x1506   :  { %1836 = vmatpush.msrb.mxu3 %v3400_v4 }
0x1508   :  { %1837 = vmatpush.msrb.mxu3 %v3413_v24 }
0x150a   :  { %1838 = vmatpush.msrb.mxu3 %v3418_v10 }
0x151e   :  { %v1525_v52 = vpop.f32.mrf.mxu2 }
0x151f   :  { %v1528_v46 = vadd.f32 %v1525_v52, %v1323_v26 }
0x1521   :  { %2702 = vtanh.f32 %v1528_v46  ;;  %v2520_v57 = vmul.f32 -1.442695, %v1528_v46 }
0x1523   :  { %2704 = vpow2.f32 %v2520_v57  ;;  %v1325_v57 = vpop.f32.mrf.mxu0 }
0x1527   :  { %v2703_v54 = vpop.eup %2702 }
0x1528   :  { %1551 = vrot.lane.b32.xlu1 %v2703_v54, %s2826_s0 }
0x1529   :  { %v2705_v31 = vpop.eup %2704 }
0x152a   :  { %v1532_v50 = vadd.f32 1.0, %v2705_v31  ;;  %v1326_v31 = vadd.f32 %v3439_v16, %v1325_v57 }
0x152c   :  { %2706 = vrcp.f32 %v1532_v50  ;;  %v1544_v11 = vand.u32 2147483648, %v1532_v50  ;;  %vm1538_vm1 = vweird.f32 %v1532_v50  ;;  %v1542_v12 = vand.u32 2147483647, %v1532_v50 }
0x152e   :  { %v1545_v61 = vor.u32 1.1754944e-38, %v1544_v11  ;;  %vm1543_vm3 = vcmp.eq.f32.partialorder %v1542_v12, 8.507059e+37 }
0x1532   :  { %v2707_v40 = vpop.eup %2706 }
0x1533   :  { %v1534_v43 = vmul.f32 %v2707_v40, %v1532_v50  ;;  %vm1539_vm0 = vweird.f32 %v2707_v40 }
0x1534   :  { %vm1540_vm2 = vmor %vm1538_vm1, %vm1539_vm0 }
0x1535   :  { %v1535_v49 = vsub.f32 1.0, %v1534_v43 }
0x1537   :  { %v1536_v59 = vmul.f32 %v2707_v40, %v1535_v49 }
0x1539   :  { %v1537_v60 = vadd.f32 %v2707_v40, %v1536_v59 }
0x153b   :  { %v1541_v14 = vsel %vm1540_vm2, %v2707_v40, %v1537_v60 }
0x153c   :  { %v1546_v62 = vsel %vm1543_vm3, %v1545_v61, %v1541_v14 }
0x153d   :  { %v1549_v17 = vmul.f32 %v1546_v62, %v3466_v6 }
0x1586   :  { %v1588_v34 = vpop.f32.mrf.mxu3 }
0x1587   :  { %v1591_v51 = vadd.f32 %v1588_v34, %v1382_v45 }
0x1589   :  { %2708 = vtanh.f32 %v1591_v51  ;;  %v2522_v1 = vmul.f32 -1.442695, %v1591_v51  ;;  %v1379_v51 = vadd.f32 %v3460_v47, %v3453_v36 }
0x158b   :  { %2710 = vpow2.f32 %v2522_v1 }
0x158f   :  { %v2709_v58 = vpop.eup %2708 }
0x1590   :  { %1614 = vrot.lane.b32.xlu2 %v2709_v58, %s2826_s0 }
0x1591   :  { %v2711_v28 = vpop.eup %2710 }
0x1592   :  { %v1595_v3 = vadd.f32 1.0, %v2711_v28 }
0x1594   :  { %2712 = vrcp.f32 %v1595_v3  ;;  %v1607_v35 = vand.u32 2147483648, %v1595_v3  ;;  %vm1601_vm5 = vweird.f32 %v1595_v3  ;;  %v1605_v39 = vand.u32 2147483647, %v1595_v3 }
0x1596   :  { %v1608_v55 = vor.u32 1.1754944e-38, %v1607_v35  ;;  %vm1606_vm7 = vcmp.eq.f32.partialorder %v1605_v39, 8.507059e+37 }
0x159a   :  { %v1552_v44 = vpop.permute.xlu1 %1551  ;;  %v2713_v23 = vpop.eup %2712 }
0x159b   :  { %v1554_v63 = vmul.f32 %v1552_v44, %v1546_v62  ;;  %v1597_v53 = vmul.f32 %v2713_v23, %v1595_v3  ;;  %vm1602_vm4 = vweird.f32 %v2713_v23 }
0x159c   :  { %vm1603_vm6 = vmor %vm1601_vm5, %vm1602_vm4 }
0x159d   :  { %1556 = vrot.lane.b32.xlu0 %v1554_v63, %s2826_s0  ;;  %v1598_v5 = vsub.f32 1.0, %v1597_v53 }
0x159f   :  { %v1599_v8 = vmul.f32 %v2713_v23, %v1598_v5 }
0x15a1   :  { %v1600_v0 = vadd.f32 %v2713_v23, %v1599_v8 }
0x15a3   :  { %v1604_v32 = vsel %vm1603_vm6, %v2713_v23, %v1600_v0 }
0x15a4   :  { %v1609_v13 = vsel %vm1606_vm7, %v1608_v55, %v1604_v32 }
0x15a5   :  { %v1612_v21 = vmul.f32 %v1609_v13, %v3470_v37 }
0x15ea   :  { %v1615_v7 = vpop.permute.xlu2 %1614 }
0x15eb   :  { %v1617_v9 = vmul.f32 %v1615_v7, %v1609_v13 }
0x15ed   :  { %1619 = vrot.lane.b32.xlu1 %v1617_v9, %s2826_s0 }
0x160f   :  { %v1557_v18 = vpop.permute.xlu0 %1556 }
0x1610   :  { %v3494_v19 = vadd.f32 %v1557_v18, %v1549_v17 }
0x1612   :  { %2714 = vtanh.f32 %v3494_v19 }
0x1618   :  { %v2715_v20 = vpop.eup %2714 }
0x1619   :  { %1562 = vrot.lane.b32.xlu2 %v2715_v20, %s2826_s0 }
0x165f   :  { %v1620_v33 = vpop.permute.xlu1 %1619 }
0x1660   :  { %v3499_v38 = vadd.f32 %v1620_v33, %v1612_v21 }
0x1662   :  { %2716 = vtanh.f32 %v3499_v38 }
0x1668   :  { %v2717_v42 = vpop.eup %2716 }
0x1669   :  { %1625 = vrot.lane.b32.xlu0 %v2717_v42, %s2826_s0 }
0x1673   :  { %v1563_v26 = vpop.permute.xlu2 %1562 }
0x1674   :  { %v1565_v6 = vmul.f32 %v1563_v26, %v1546_v62 }
0x1676   :  { %1630 = vrot.lane.b32.xlu1 %v1565_v6, %s2827_s6 }
0x16db   :  { %v1626_v52 = vpop.permute.xlu0 %1625 }
0x16dc   :  { %v1628_v46 = vmul.f32 %v1626_v52, %v1609_v13 }
0x16de   :  { %1693 = vrot.lane.b32.xlu2 %v1628_v46, %s2827_s6 }
0x16e8   :  { %v1631_v54 = vpop.permute.xlu1 %1630 }
0x16e9   :  { %2523 = vmatmul.msk.f32.vlgmr.msra.gmra.mxu2 %vm185_vm9, %v1631_v54 }
0x16ea   :  { %1898 = vmatpush.msra.mxu2 %v3316_v48 }
0x16ec   :  { %1899 = vmatpush.msra.mxu2 %v3325_v56 }
0x16ee   :  { %1900 = vmatpush.msra.mxu2 %v3341_v15 }
0x16f0   :  { %1901 = vmatpush.msra.mxu2 %v3352_v41 }
0x1738   :  { %v1694_v37 = vpop.permute.xlu2 %1693 }
0x1739   :  { %2525 = vmatmul.msk.f32.vlgmr.msra.gmra.mxu3 %vm185_vm9, %v1694_v37 }
0x173a   :  { %1961 = vmatpush.msra.mxu3 %v3395_v2 }
0x173c   :  { %1962 = vmatpush.msra.mxu3 %v3400_v4 }
0x173e   :  { %1963 = vmatpush.msra.mxu3 %v3413_v24 }
0x1740   :  { %1964 = vmatpush.msra.mxu3 %v3418_v10 }
0x176c   :  { %v1651_v50 = vpop.f32.mrf.mxu2 }
0x176d   :  { %v1654_v40 = vadd.f32 %v1651_v50, %v1326_v31 }
0x176f   :  { %2718 = vtanh.f32 %v1654_v40  ;;  %v2524_v34 = vmul.f32 -1.442695, %v1654_v40 }
0x1771   :  { %2720 = vpow2.f32 %v2524_v34 }
0x1775   :  { %v2719_v45 = vpop.eup %2718 }
0x1776   :  { %1677 = vrot.lane.b32.xlu0 %v2719_v45, %s2826_s0  ;;  %v1328_v45 = vpop.f32.mrf.mxu0 }
0x1777   :  { %v2721_v58 = vpop.eup %2720  ;;  %v1329_v34 = vadd.f32 %v3439_v16, %v1328_v45 }
0x1778   :  { %v1658_v60 = vadd.f32 1.0, %v2721_v58 }
0x177a   :  { %v1670_v44 = vand.u32 2147483648, %v1658_v60  ;;  %vm1664_vm10 = vweird.f32 %v1658_v60  ;;  %v1668_v63 = vand.u32 2147483647, %v1658_v60 }
0x177c   :  { %v1671_v1 = vor.u32 1.1754944e-38, %v1670_v44  ;;  %vm1669_vm12 = vcmp.eq.f32.partialorder %v1668_v63, 8.507059e+37 }
0x17bc   :  { %v1714_v43 = vpop.f32.mrf.mxu3 }
0x17bd   :  { %v1717_v49 = vadd.f32 %v1714_v43, %v1379_v51 }
0x17bf   :  { %2722 = vtanh.f32 %v1717_v49  ;;  %v2526_v53 = vmul.f32 -1.442695, %v1717_v49 }
0x17c0   :  { %2724 = vrcp.f32 %v1658_v60 }
0x17c1   :  { %2726 = vpow2.f32 %v2526_v53 }
0x17c5   :  { %v2723_v59 = vpop.eup %2722 }
0x17c6   :  { %1740 = vrot.lane.b32.xlu1 %v2723_v59, %s2826_s0  ;;  %v2725_v11 = vpop.eup %2724 }
0x17c7   :  { %v1660_v12 = vmul.f32 %v2725_v11, %v1658_v60  ;;  %vm1665_vm8 = vweird.f32 %v2725_v11  ;;  %v2727_v5 = vpop.eup %2726 }
0x17c8   :  { %vm1666_vm11 = vmor %vm1664_vm10, %vm1665_vm8  ;;  %v1721_v8 = vadd.f32 1.0, %v2727_v5 }
0x17c9   :  { %v1661_v14 = vsub.f32 1.0, %v1660_v12  ;;  %v1376_v12 = vadd.f32 %v3460_v47, %v3451_v30 }
0x17ca   :  { %2728 = vrcp.f32 %v1721_v8  ;;  %v1733_v7 = vand.u32 2147483648, %v1721_v8  ;;  %vm1727_vm14 = vweird.f32 %v1721_v8  ;;  %v1731_v13 = vand.u32 2147483647, %v1721_v8 }
0x17cb   :  { %v1662_v61 = vmul.f32 %v2725_v11, %v1661_v14 }
0x17cc   :  { %v1734_v17 = vor.u32 1.1754944e-38, %v1733_v7  ;;  %vm1732_vm0 = vcmp.eq.f32.partialorder %v1731_v13, 8.507059e+37 }
0x17cd   :  { %v1663_v62 = vadd.f32 %v2725_v11, %v1662_v61 }
0x17cf   :  { %v1667_v36 = vsel %vm1666_vm11, %v2725_v11, %v1663_v62 }
0x17d0   :  { %v1672_v3 = vsel %vm1669_vm12, %v1671_v1, %v1667_v36  ;;  %v2729_v0 = vpop.eup %2728 }
0x17d1   :  { %v1723_v35 = vmul.f32 %v2729_v0, %v1721_v8  ;;  %vm1728_vm13 = vweird.f32 %v2729_v0  ;;  %v1675_v33 = vmul.f32 %v1672_v3, %v3494_v19 }
0x17d2   :  { %vm1729_vm15 = vmor %vm1727_vm14, %vm1728_vm13 }
0x17d3   :  { %v1724_v39 = vsub.f32 1.0, %v1723_v35 }
0x17d5   :  { %v1725_v32 = vmul.f32 %v2729_v0, %v1724_v39 }
0x17d7   :  { %v1726_v55 = vadd.f32 %v2729_v0, %v1725_v32 }
0x17d9   :  { %v1730_v9 = vsel %vm1729_vm15, %v2729_v0, %v1726_v55 }
0x17da   :  { %v1735_v18 = vsel %vm1732_vm0, %v1734_v17, %v1730_v9 }
0x17db   :  { %v1738_v52 = vmul.f32 %v1735_v18, %v3499_v38 }
0x17e8   :  { %v1678_v28 = vpop.permute.xlu0 %1677 }
0x17e9   :  { %v1680_v23 = vmul.f32 %v1678_v28, %v1672_v3 }
0x17eb   :  { %1682 = vrot.lane.b32.xlu2 %v1680_v23, %s2826_s0 }
0x1838   :  { %v1741_v20 = vpop.permute.xlu1 %1740 }
0x1839   :  { %v1743_v21 = vmul.f32 %v1741_v20, %v1735_v18 }
0x183b   :  { %1745 = vrot.lane.b32.xlu0 %v1743_v21, %s2826_s0 }
0x1845   :  { %v1683_v42 = vpop.permute.xlu2 %1682 }
0x1846   :  { %v3523_v26 = vadd.f32 %v1683_v42, %v1675_v33 }
0x1848   :  { %2730 = vtanh.f32 %v3523_v26 }
0x184e   :  { %v2731_v6 = vpop.eup %2730 }
0x184f   :  { %1688 = vrot.lane.b32.xlu1 %v2731_v6, %s2826_s0 }
0x18ad   :  { %v1746_v46 = vpop.permute.xlu0 %1745 }
0x18ae   :  { %v3528_v54 = vadd.f32 %v1746_v46, %v1738_v52 }
0x18b0   :  { %2732 = vtanh.f32 %v3528_v54 }
0x18b6   :  { %v2733_v37 = vpop.eup %2732 }
0x18b7   :  { %1751 = vrot.lane.b32.xlu2 %v2733_v37, %s2826_s0 }
0x18c1   :  { %v1689_v57 = vpop.permute.xlu1 %1688 }
0x18c2   :  { %v1691_v19 = vmul.f32 %v1689_v57, %v1672_v3 }
0x18c4   :  { %1756 = vrot.lane.b32.xlu0 %v1691_v19, %s2827_s6 }
0x1911   :  { %v1752_v31 = vpop.permute.xlu2 %1751 }
0x1912   :  { %v1754_v50 = vmul.f32 %v1752_v31, %v1735_v18 }
0x1914   :  { %1819 = vrot.lane.b32.xlu1 %v1754_v50, %s2827_s6 }
0x1936   :  { %v1757_v40 = vpop.permute.xlu0 %1756 }
0x1937   :  { %2527 = vmatmul.msk.f32.vlgmr.msrb.gmra.mxu2 %vm185_vm9, %v1757_v40 }
0x1938   :  { %2024 = vmatpush.msrb.mxu2 %v3316_v48 }
0x193a   :  { %2025 = vmatpush.msrb.mxu2 %v3325_v56 }
0x193c   :  { %2026 = vmatpush.msrb.mxu2 %v3341_v15 }
0x193e   :  { %2027 = vmatpush.msrb.mxu2 %v3352_v41 }
0x1986   :  { %v1820_v38 = vpop.permute.xlu1 %1819 }
0x1987   :  { %2529 = vmatmul.msk.f32.vlgmr.msrb.gmra.mxu3 %vm185_vm9, %v1820_v38 }
0x1988   :  { %2087 = vmatpush.msrb.mxu3 %v3395_v2 }
0x198a   :  { %2088 = vmatpush.msrb.mxu3 %v3400_v4 }
0x198c   :  { %2089 = vmatpush.msrb.mxu3 %v3413_v24 }
0x198e   :  { %2090 = vmatpush.msrb.mxu3 %v3418_v10 }
0x19ba   :  { %v1777_v51 = vpop.f32.mrf.mxu2 }
0x19bb   :  { %v1780_v43 = vadd.f32 %v1777_v51, %v1329_v34 }
0x19bd   :  { %2734 = vtanh.f32 %v1780_v43  ;;  %v2528_v58 = vmul.f32 -1.442695, %v1780_v43  ;;  %v1331_v43 = vpop.f32.mrf.mxu0 }
0x19bf   :  { %2736 = vpow2.f32 %v2528_v58 }
0x19c3   :  { %v2735_v49 = vpop.eup %2734 }
0x19c4   :  { %1803 = vrot.lane.b32.xlu2 %v2735_v49, %s2826_s0 }
0x19c5   :  { %v2737_v59 = vpop.eup %2736 }
0x19c6   :  { %v1784_v60 = vadd.f32 1.0, %v2737_v59 }
0x19c8   :  { %2738 = vrcp.f32 %v1784_v60  ;;  %v1796_v28 = vand.u32 2147483648, %v1784_v60  ;;  %vm1790_vm2 = vweird.f32 %v1784_v60  ;;  %v1794_v3 = vand.u32 2147483647, %v1784_v60 }
0x19ca   :  { %v1797_v53 = vor.u32 1.1754944e-38, %v1796_v28  ;;  %vm1795_vm4 = vcmp.eq.f32.partialorder %v1794_v3, 8.507059e+37 }
0x19ce   :  { %v2739_v11 = vpop.eup %2738 }
0x19cf   :  { %v1786_v62 = vmul.f32 %v2739_v11, %v1784_v60  ;;  %vm1791_vm1 = vweird.f32 %v2739_v11 }
0x19d0   :  { %vm1792_vm3 = vmor %vm1790_vm2, %vm1791_vm1 }
0x19d1   :  { %v1787_v44 = vsub.f32 1.0, %v1786_v62 }
0x19d3   :  { %v1788_v36 = vmul.f32 %v2739_v11, %v1787_v44 }
0x19d5   :  { %v1789_v1 = vadd.f32 %v2739_v11, %v1788_v36 }
0x19d7   :  { %v1793_v23 = vsel %vm1792_vm3, %v2739_v11, %v1789_v1  ;;  %v1373_v11 = vadd.f32 %v3460_v47, %v3449_v29 }
0x19d8   :  { %v1798_v30 = vsel %vm1795_vm4, %v1797_v53, %v1793_v23 }
0x19d9   :  { %v1801_v52 = vmul.f32 %v1798_v30, %v3523_v26 }
0x1a0a   :  { %v1840_v14 = vpop.f32.mrf.mxu3 }
0x1a0b   :  { %v1843_v61 = vadd.f32 %v1840_v14, %v1376_v12 }
0x1a0d   :  { %2740 = vtanh.f32 %v1843_v61  ;;  %v2530_v0 = vmul.f32 -1.442695, %v1843_v61 }
0x1a0f   :  { %2742 = vpow2.f32 %v2530_v0 }
0x1a13   :  { %v2741_v63 = vpop.eup %2740 }
0x1a14   :  { %1866 = vrot.lane.b32.xlu0 %v2741_v63, %s2826_s0 }
0x1a15   :  { %v2743_v35 = vpop.eup %2742 }
0x1a16   :  { %v1847_v39 = vadd.f32 1.0, %v2743_v35 }
0x1a18   :  { %2744 = vrcp.f32 %v1847_v39  ;;  %v1859_v17 = vand.u32 2147483648, %v1847_v39  ;;  %vm1853_vm6 = vweird.f32 %v1847_v39  ;;  %v1857_v18 = vand.u32 2147483647, %v1847_v39 }
0x1a1a   :  { %v1860_v21 = vor.u32 1.1754944e-38, %v1859_v17  ;;  %vm1858_vm8 = vcmp.eq.f32.partialorder %v1857_v18, 8.507059e+37 }
0x1a1e   :  { %v1804_v5 = vpop.permute.xlu2 %1803  ;;  %v2745_v32 = vpop.eup %2744 }
0x1a1f   :  { %v1806_v8 = vmul.f32 %v1804_v5, %v1798_v30  ;;  %v1849_v55 = vmul.f32 %v2745_v32, %v1847_v39  ;;  %vm1854_vm5 = vweird.f32 %v2745_v32 }
0x1a20   :  { %vm1855_vm7 = vmor %vm1853_vm6, %vm1854_vm5 }
0x1a21   :  { %1808 = vrot.lane.b32.xlu1 %v1806_v8, %s2826_s0  ;;  %v1850_v7 = vsub.f32 1.0, %v1849_v55 }
0x1a23   :  { %v1851_v13 = vmul.f32 %v2745_v32, %v1850_v7 }
0x1a25   :  { %v1852_v9 = vadd.f32 %v2745_v32, %v1851_v13 }
0x1a27   :  { %v1856_v20 = vsel %vm1855_vm7, %v2745_v32, %v1852_v9 }
0x1a28   :  { %v1861_v42 = vsel %vm1858_vm8, %v1860_v21, %v1856_v20 }
0x1a29   :  { %v1864_v19 = vmul.f32 %v1861_v42, %v3528_v54 }
0x1a86   :  { %v1867_v33 = vpop.permute.xlu0 %1866 }
0x1a87   :  { %v1869_v6 = vmul.f32 %v1867_v33, %v1861_v42 }
0x1a89   :  { %1871 = vrot.lane.b32.xlu2 %v1869_v6, %s2826_s0 }
0x1a93   :  { %v1809_v46 = vpop.permute.xlu1 %1808 }
0x1a94   :  { %v3552_v37 = vadd.f32 %v1809_v46, %v1801_v52 }
0x1a96   :  { %2746 = vtanh.f32 %v3552_v37 }
0x1a9c   :  { %v2747_v57 = vpop.eup %2746 }
0x1a9d   :  { %1814 = vrot.lane.b32.xlu0 %v2747_v57, %s2826_s0 }
0x1ae3   :  { %v1872_v31 = vpop.permute.xlu2 %1871 }
0x1ae4   :  { %v3557_v50 = vadd.f32 %v1872_v31, %v1864_v19 }
0x1ae6   :  { %2748 = vtanh.f32 %v3557_v50 }
0x1aec   :  { %v2749_v40 = vpop.eup %2748 }
0x1aed   :  { %1877 = vrot.lane.b32.xlu1 %v2749_v40, %s2826_s0 }
0x1b0f   :  { %v1815_v38 = vpop.permute.xlu0 %1814 }
0x1b10   :  { %v1817_v26 = vmul.f32 %v1815_v38, %v1798_v30 }
0x1b12   :  { %1882 = vrot.lane.b32.xlu2 %v1817_v26, %s2827_s6 }
0x1b5f   :  { %v1878_v45 = vpop.permute.xlu1 %1877 }
0x1b60   :  { %v1880_v34 = vmul.f32 %v1878_v45, %v1861_v42 }
0x1b62   :  { %1945 = vrot.lane.b32.xlu0 %v1880_v34, %s2827_s6 }
0x1b6c   :  { %v1883_v51 = vpop.permute.xlu2 %1882 }
0x1b6d   :  { %2531 = vmatmul.msk.f32.vlgmr.msra.gmra.mxu2 %vm185_vm9, %v1883_v51  ;;  %v2820_v51 = vld [vmem:[%s3716_s8 + $0x10] sm:$0xff] }
0x1b6e   :  { %2150 = vmatpush.msra.mxu2 %v3316_v48  ;;  %v1332_v48 = vadd.f32 %v3439_v16, %v1331_v43  ;;  %v2822_v43 = vld [vmem:[%s3716_s8] sm:$0xff] }
0x1b70   :  { %2151 = vmatpush.msra.mxu2 %v3325_v56 }
0x1b72   :  { %2152 = vmatpush.msra.mxu2 %v3341_v15 }
0x1b74   :  { %2153 = vmatpush.msra.mxu2 %v3352_v41 }
0x1bd4   :  { %v1946_v54 = vpop.permute.xlu0 %1945 }
0x1bd5   :  { %2533 = vmatmul.msk.f32.vlgmr.msra.gmra.mxu3 %vm185_vm9, %v1946_v54  ;;  %v2821_v54 = vld [vmem:[%s3716_s8 + $0x8] sm:$0xff] }
0x1bd6   :  { %2213 = vmatpush.msra.mxu3 %v3395_v2 }
0x1bd8   :  { %2214 = vmatpush.msra.mxu3 %v3400_v4 }
0x1bda   :  { %2215 = vmatpush.msra.mxu3 %v3413_v24 }
0x1bdc   :  { %2216 = vmatpush.msra.mxu3 %v3418_v10 }
0x1bf0   :  { %v1903_v49 = vpop.f32.mrf.mxu2 }
0x1bf1   :  { %v1906_v56 = vadd.f32 %v1903_v49, %v1332_v48  ;;  %v1334_v49 = vpop.f32.mrf.mxu0 }
0x1bf3   :  { %2750 = vtanh.f32 %v1906_v56  ;;  %v2532_v41 = vmul.f32 -1.442695, %v1906_v56  ;;  %v1335_v56 = vadd.f32 %v3439_v16, %v1334_v49 }
0x1bf5   :  { %2752 = vpow2.f32 %v2532_v41 }
0x1bf9   :  { %v2751_v15 = vpop.eup %2750 }
0x1bfa   :  { %1929 = vrot.lane.b32.xlu1 %v2751_v15, %s2826_s0 }
0x1bfb   :  { %v2753_v58 = vpop.eup %2752 }
0x1bfc   :  { %v1910_v59 = vadd.f32 1.0, %v2753_v58 }
0x1bfe   :  { %2754 = vrcp.f32 %v1910_v59  ;;  %v1922_v1 = vand.u32 2147483648, %v1910_v59  ;;  %vm1916_vm11 = vweird.f32 %v1910_v59  ;;  %v1920_v28 = vand.u32 2147483647, %v1910_v59 }
0x1c00   :  { %v1923_v23 = vor.u32 1.1754944e-38, %v1922_v1  ;;  %vm1921_vm13 = vcmp.eq.f32.partialorder %v1920_v28, 8.507059e+37 }
0x1c04   :  { %v2755_v60 = vpop.eup %2754 }
0x1c05   :  { %v1912_v61 = vmul.f32 %v2755_v60, %v1910_v59  ;;  %vm1917_vm10 = vweird.f32 %v2755_v60 }
0x1c06   :  { %vm1918_vm12 = vmor %vm1916_vm11, %vm1917_vm10 }
0x1c07   :  { %v1913_v62 = vsub.f32 1.0, %v1912_v61 }
0x1c09   :  { %v1914_v63 = vmul.f32 %v2755_v60, %v1913_v62 }
0x1c0b   :  { %v1915_v36 = vadd.f32 %v2755_v60, %v1914_v63 }
0x1c0d   :  { %v1919_v3 = vsel %vm1918_vm12, %v2755_v60, %v1915_v36  ;;  %v1370_v60 = vadd.f32 %v3460_v47, %v3447_v27 }
0x1c0e   :  { %v1924_v53 = vsel %vm1921_vm13, %v1923_v23, %v1919_v3 }
0x1c0f   :  { %v1927_v42 = vmul.f32 %v1924_v53, %v3552_v37 }
0x1c58   :  { %v1966_v12 = vpop.f32.mrf.mxu3 }
0x1c59   :  { %v1969_v14 = vadd.f32 %v1966_v12, %v1373_v11 }
0x1c5b   :  { %2756 = vtanh.f32 %v1969_v14  ;;  %v2534_v30 = vmul.f32 -1.442695, %v1969_v14 }
0x1c5d   :  { %2758 = vpow2.f32 %v2534_v30 }
0x1c61   :  { %v2757_v44 = vpop.eup %2756 }
0x1c62   :  { %1992 = vrot.lane.b32.xlu2 %v2757_v44, %s2826_s0 }
0x1c63   :  { %v2759_v8 = vpop.eup %2758 }
0x1c64   :  { %v1973_v0 = vadd.f32 1.0, %v2759_v8 }
0x1c66   :  { %2760 = vrcp.f32 %v1973_v0  ;;  %v1985_v13 = vand.u32 2147483648, %v1973_v0  ;;  %vm1979_vm15 = vweird.f32 %v1973_v0  ;;  %v1983_v9 = vand.u32 2147483647, %v1973_v0 }
0x1c68   :  { %v1986_v18 = vor.u32 1.1754944e-38, %v1985_v13  ;;  %vm1984_vm1 = vcmp.eq.f32.partialorder %v1983_v9, 8.507059e+37 }
0x1c6c   :  { %v1930_v29 = vpop.permute.xlu1 %1929  ;;  %v2761_v35 = vpop.eup %2760 }
0x1c6d   :  { %v1932_v5 = vmul.f32 %v1930_v29, %v1924_v53  ;;  %v1975_v39 = vmul.f32 %v2761_v35, %v1973_v0  ;;  %vm1980_vm14 = vweird.f32 %v2761_v35 }
0x1c6e   :  { %vm1981_vm0 = vmor %vm1979_vm15, %vm1980_vm14 }
0x1c6f   :  { %1934 = vrot.lane.b32.xlu0 %v1932_v5, %s2826_s0  ;;  %v1976_v32 = vsub.f32 1.0, %v1975_v39 }
0x1c71   :  { %v1977_v55 = vmul.f32 %v2761_v35, %v1976_v32 }
0x1c73   :  { %v1978_v7 = vadd.f32 %v2761_v35, %v1977_v55 }
0x1c75   :  { %v1982_v17 = vsel %vm1981_vm0, %v2761_v35, %v1978_v7 }
0x1c76   :  { %v1987_v21 = vsel %vm1984_vm1, %v1986_v18, %v1982_v17 }
0x1c77   :  { %v1990_v57 = vmul.f32 %v1987_v21, %v3557_v50  ;;  %v2819_v50 = vld [vmem:[%s3716_s8 + $0x18] sm:$0xff] }
0x1cbc   :  { %v1993_v20 = vpop.permute.xlu2 %1992 }
0x1cbd   :  { %v1995_v33 = vmul.f32 %v1993_v20, %v1987_v21 }
0x1cbf   :  { %1997 = vrot.lane.b32.xlu1 %v1995_v33, %s2826_s0 }
0x1ce1   :  { %v1935_v6 = vpop.permute.xlu0 %1934 }
0x1ce2   :  { %v3581_v52 = vadd.f32 %v1935_v6, %v1927_v42 }
0x1ce4   :  { %2762 = vtanh.f32 %v3581_v52 }
0x1cea   :  { %v2763_v46 = vpop.eup %2762 }
0x1ceb   :  { %1940 = vrot.lane.b32.xlu2 %v2763_v46, %s2826_s0 }
0x1d31   :  { %v1998_v19 = vpop.permute.xlu1 %1997 }
0x1d32   :  { %v3586_v31 = vadd.f32 %v1998_v19, %v1990_v57 }
0x1d34   :  { %2764 = vtanh.f32 %v3586_v31 }
0x1d3a   :  { %v2765_v40 = vpop.eup %2764 }
0x1d3b   :  { %2003 = vrot.lane.b32.xlu0 %v2765_v40, %s2826_s0 }
0x1d45   :  { %v1941_v38 = vpop.permute.xlu2 %1940 }
0x1d46   :  { %v1943_v37 = vmul.f32 %v1941_v38, %v1924_v53 }
0x1d48   :  { %2008 = vrot.lane.b32.xlu1 %v1943_v37, %s2827_s6  ;;  %v1337_v37 = vpop.f32.mrf.mxu0 }
0x1dad   :  { %v2004_v26 = vpop.permute.xlu0 %2003 }
0x1dae   :  { %v2006_v45 = vmul.f32 %v2004_v26, %v1987_v21  ;;  %v3634_v26 = vld [vmem:[%s3717_s9] ss:$0 sm:$0xff] }
0x1db0   :  { %2071 = vrot.lane.b32.xlu2 %v2006_v45, %s2827_s6  ;;  %v1338_v45 = vadd.f32 %v3634_v26, %v1337_v37 }
0x1dba   :  { %v2009_v34 = vpop.permute.xlu1 %2008 }
0x1dbb   :  { %2535 = vmatmul.msk.f32.vlgmr.msrb.gmra.mxu2 %vm185_vm9, %v2009_v34 }
0x1dbc   :  { %2276 = vmatpush.msrb.mxu2 %v2819_v50 }
0x1dbe   :  { %2277 = vmatpush.msrb.mxu2 %v2820_v51 }
0x1dc0   :  { %2278 = vmatpush.msrb.mxu2 %v2821_v54 }
0x1dc2   :  { %2279 = vmatpush.msrb.mxu2 %v2822_v43 }
0x1e0a   :  { %v2072_v48 = vpop.permute.xlu2 %2071 }
0x1e0b   :  { %2537 = vmatmul.msk.f32.vlgmr.msrb.gmra.mxu3 %vm185_vm9, %v2072_v48 }
0x1e0c   :  { %2339 = vmatpush.msrb.mxu3 %v3395_v2 }
0x1e0e   :  { %2340 = vmatpush.msrb.mxu3 %v3400_v4 }
0x1e10   :  { %2341 = vmatpush.msrb.mxu3 %v3413_v24 }
0x1e12   :  { %2342 = vmatpush.msrb.mxu3 %v3418_v10 }
0x1e3e   :  { %v2029_v15 = vpop.f32.mrf.mxu2 }
0x1e3f   :  { %v2032_v41 = vadd.f32 %v2029_v15, %v1335_v56  ;;  %v3641_v56 = vld [vmem:[%s3718_s12] ss:$0 sm:$0xff] }
0x1e40   :  { %v1367_v15 = vadd.f32 %v3641_v56, %v3445_v25 }
0x1e41   :  { %2766 = vtanh.f32 %v2032_v41  ;;  %v2536_v59 = vmul.f32 -1.442695, %v2032_v41 }
0x1e43   :  { %2768 = vpow2.f32 %v2536_v59 }
0x1e47   :  { %v2767_v58 = vpop.eup %2766 }
0x1e48   :  { %2055 = vrot.lane.b32.xlu0 %v2767_v58, %s2826_s0 }
0x1e49   :  { %v2769_v4 = vpop.eup %2768 }
0x1e4a   :  { %v2036_v10 = vadd.f32 1.0, %v2769_v4 }
0x1e4c   :  { %v2048_v44 = vand.u32 2147483648, %v2036_v10  ;;  %vm2042_vm3 = vweird.f32 %v2036_v10  ;;  %v2046_v63 = vand.u32 2147483647, %v2036_v10 }
0x1e4e   :  { %v2049_v47 = vor.u32 1.1754944e-38, %v2048_v44  ;;  %vm2047_vm5 = vcmp.eq.f32.partialorder %v2046_v63, 8.507059e+37 }
0x1e8e   :  { %v2092_v2 = vpop.f32.mrf.mxu3 }
0x1e8f   :  { %v2095_v11 = vadd.f32 %v2092_v2, %v1370_v60 }
0x1e91   :  { %2770 = vtanh.f32 %v2095_v11  ;;  %v2538_v3 = vmul.f32 -1.442695, %v2095_v11 }
0x1e92   :  { %2772 = vrcp.f32 %v2036_v10 }
0x1e93   :  { %2774 = vpow2.f32 %v2538_v3 }
0x1e97   :  { %v2771_v24 = vpop.eup %2770 }
0x1e98   :  { %2118 = vrot.lane.b32.xlu1 %v2771_v24, %s2826_s0  ;;  %v2773_v16 = vpop.eup %2772 }
0x1e99   :  { %v2038_v12 = vmul.f32 %v2773_v16, %v2036_v10  ;;  %vm2043_vm2 = vweird.f32 %v2773_v16  ;;  %v2775_v23 = vpop.eup %2774 }
0x1e9a   :  { %vm2044_vm4 = vmor %vm2042_vm3, %vm2043_vm2  ;;  %v2099_v53 = vadd.f32 1.0, %v2775_v23 }
0x1e9b   :  { %v2039_v14 = vsub.f32 1.0, %v2038_v12 }
0x1e9c   :  { %2776 = vrcp.f32 %v2099_v53  ;;  %v2111_v35 = vand.u32 2147483648, %v2099_v53  ;;  %vm2105_vm7 = vweird.f32 %v2099_v53  ;;  %v2109_v39 = vand.u32 2147483647, %v2099_v53 }
0x1e9d   :  { %v2040_v61 = vmul.f32 %v2773_v16, %v2039_v14 }
0x1e9e   :  { %v2112_v55 = vor.u32 1.1754944e-38, %v2111_v35  ;;  %vm2110_vm10 = vcmp.eq.f32.partialorder %v2109_v39, 8.507059e+37 }
0x1e9f   :  { %v2041_v62 = vadd.f32 %v2773_v16, %v2040_v61 }
0x1ea1   :  { %v2045_v27 = vsel %vm2044_vm4, %v2773_v16, %v2041_v62 }
0x1ea2   :  { %v2050_v1 = vsel %vm2047_vm5, %v2049_v47, %v2045_v27  ;;  %v2777_v29 = vpop.eup %2776 }
0x1ea3   :  { %v2101_v5 = vmul.f32 %v2777_v29, %v2099_v53  ;;  %vm2106_vm6 = vweird.f32 %v2777_v29  ;;  %v2053_v17 = vmul.f32 %v2050_v1, %v3581_v52 }
0x1ea4   :  { %vm2107_vm8 = vmor %vm2105_vm7, %vm2106_vm6 }
0x1ea5   :  { %v2102_v30 = vsub.f32 1.0, %v2101_v5 }
0x1ea7   :  { %v2103_v8 = vmul.f32 %v2777_v29, %v2102_v30 }
0x1ea9   :  { %v2104_v0 = vadd.f32 %v2777_v29, %v2103_v8 }
0x1eab   :  { %v2108_v32 = vsel %vm2107_vm8, %v2777_v29, %v2104_v0 }
0x1eac   :  { %v2113_v7 = vsel %vm2110_vm10, %v2112_v55, %v2108_v32 }
0x1ead   :  { %v2116_v33 = vmul.f32 %v2113_v7, %v3586_v31 }
0x1eba   :  { %v2056_v36 = vpop.permute.xlu0 %2055 }
0x1ebb   :  { %v2058_v28 = vmul.f32 %v2056_v36, %v2050_v1 }
0x1ebd   :  { %2060 = vrot.lane.b32.xlu2 %v2058_v28, %s2826_s0 }
0x1f0a   :  { %v2119_v13 = vpop.permute.xlu1 %2118 }
0x1f0b   :  { %v2121_v9 = vmul.f32 %v2119_v13, %v2113_v7 }
0x1f0d   :  { %2123 = vrot.lane.b32.xlu0 %v2121_v9, %s2826_s0 }
0x1f17   :  { %v2061_v18 = vpop.permute.xlu2 %2060 }
0x1f18   :  { %v3618_v20 = vadd.f32 %v2061_v18, %v2053_v17 }
0x1f1a   :  { %2778 = vtanh.f32 %v3618_v20 }
0x1f20   :  { %v2779_v21 = vpop.eup %2778 }
0x1f21   :  { %2066 = vrot.lane.b32.xlu1 %v2779_v21, %s2826_s0 }
0x1f7f   :  { %v2124_v42 = vpop.permute.xlu0 %2123 }
0x1f80   :  { %v3623_v6 = vadd.f32 %v2124_v42, %v2116_v33 }
0x1f82   :  { %2780 = vtanh.f32 %v3623_v6 }
0x1f88   :  { %v2781_v46 = vpop.eup %2780 }
0x1f89   :  { %2129 = vrot.lane.b32.xlu2 %v2781_v46, %s2826_s0 }
0x1f93   :  { %v2067_v57 = vpop.permute.xlu1 %2066 }
0x1f94   :  { %v2069_v52 = vmul.f32 %v2067_v57, %v2050_v1 }
0x1f96   :  { %2134 = vrot.lane.b32.xlu0 %v2069_v52, %s2827_s6 }
0x1fe3   :  { %v2130_v19 = vpop.permute.xlu2 %2129 }
0x1fe4   :  { %v2132_v40 = vmul.f32 %v2130_v19, %v2113_v7 }
0x1fe6   :  { %2197 = vrot.lane.b32.xlu1 %v2132_v40, %s2827_s6 }
0x2008   :  { %v2135_v38 = vpop.permute.xlu0 %2134 }
0x2009   :  { %2539 = vmatmul.msk.f32.vlgmr.msra.gmra.mxu2 %vm185_vm9, %v2135_v38 }
0x2058   :  { %v2198_v31 = vpop.permute.xlu1 %2197 }
0x2059   :  { %2541 = vmatmul.msk.f32.vlgmr.msra.gmra.mxu3 %vm185_vm9, %v2198_v31 }
0x208c   :  { %v2155_v34 = vpop.f32.mrf.mxu2 }
0x208d   :  { %v2158_v50 = vadd.f32 %v2155_v34, %v1338_v45  ;;  %v1364_v45 = vadd.f32 %v3641_v56, %v3442_v22 }
0x208f   :  { %2782 = vtanh.f32 %v2158_v50  ;;  %v2540_v54 = vmul.f32 -1.442695, %v2158_v50 }
0x2091   :  { %2784 = vpow2.f32 %v2540_v54 }
0x2095   :  { %v2783_v51 = vpop.eup %2782 }
0x2096   :  { %2181 = vrot.lane.b32.xlu2 %v2783_v51, %s2826_s0 }
0x2097   :  { %v2785_v43 = vpop.eup %2784 }
0x2098   :  { %v2162_v48 = vadd.f32 1.0, %v2785_v43 }
0x209a   :  { %2786 = vrcp.f32 %v2162_v48  ;;  %v2174_v24 = vand.u32 2147483648, %v2162_v48  ;;  %vm2168_vm12 = vweird.f32 %v2162_v48  ;;  %v2172_v10 = vand.u32 2147483647, %v2162_v48 }
0x209c   :  { %v2175_v12 = vor.u32 1.1754944e-38, %v2174_v24  ;;  %vm2173_vm14 = vcmp.eq.f32.partialorder %v2172_v10, 8.507059e+37 }
0x20a0   :  { %v2787_v49 = vpop.eup %2786 }
0x20a1   :  { %v2164_v59 = vmul.f32 %v2787_v49, %v2162_v48  ;;  %vm2169_vm11 = vweird.f32 %v2787_v49 }
0x20a2   :  { %vm2170_vm13 = vmor %vm2168_vm12, %vm2169_vm11  ;;  %vm2449_vm12 = vcmask 39936  }
0x20a3   :  { %v2165_v60 = vsub.f32 1.0, %v2164_v59 }
0x20a5   :  { %v2166_v11 = vmul.f32 %v2787_v49, %v2165_v60 }
0x20a7   :  { %v2167_v4 = vadd.f32 %v2787_v49, %v2166_v11 }
0x20a9   :  { %v2171_v16 = vsel %vm2170_vm13, %v2787_v49, %v2167_v4 }
0x20aa   :  { %v2176_v25 = vsel %vm2173_vm14, %v2175_v12, %v2171_v16 }
0x20ab   :  { %v2179_v0 = vmul.f32 %v2176_v25, %v3618_v20 }
0x20dc   :  { %v2218_v41 = vpop.f32.mrf.mxu3 }
0x20dd   :  { %v2221_v58 = vadd.f32 %v2218_v41, %v1367_v15 }
0x20df   :  { %2788 = vtanh.f32 %v2221_v58  ;;  %v2542_v62 = vmul.f32 -1.442695, %v2221_v58 }
0x20e1   :  { %2790 = vpow2.f32 %v2542_v62 }
0x20e5   :  { %v2789_v2 = vpop.eup %2788 }
0x20e6   :  { %2244 = vrot.lane.b32.xlu0 %v2789_v2, %s2826_s0 }
0x20e7   :  { %v2791_v44 = vpop.eup %2790 }
0x20e8   :  { %v2225_v63 = vadd.f32 1.0, %v2791_v44 }
0x20ea   :  { %2792 = vrcp.f32 %v2225_v63  ;;  %v2237_v3 = vand.u32 2147483648, %v2225_v63  ;;  %vm2231_vm0 = vweird.f32 %v2225_v63  ;;  %v2235_v23 = vand.u32 2147483647, %v2225_v63 }
0x20ec   :  { %v2238_v29 = vor.u32 1.1754944e-38, %v2237_v3  ;;  %vm2236_vm2 = vcmp.eq.f32.partialorder %v2235_v23, 8.507059e+37 }
0x20f0   :  { %v2182_v14 = vpop.permute.xlu2 %2181  ;;  %v2793_v27 = vpop.eup %2792 }
0x20f1   :  { %v2184_v61 = vmul.f32 %v2182_v14, %v2176_v25  ;;  %v2227_v47 = vmul.f32 %v2793_v27, %v2225_v63  ;;  %vm2232_vm15 = vweird.f32 %v2793_v27 }
0x20f2   :  { %vm2233_vm1 = vmor %vm2231_vm0, %vm2232_vm15 }
0x20f3   :  { %2186 = vrot.lane.b32.xlu1 %v2184_v61, %s2826_s0  ;;  %v2228_v36 = vsub.f32 1.0, %v2227_v47 }
0x20f5   :  { %v2229_v1 = vmul.f32 %v2793_v27, %v2228_v36 }
0x20f7   :  { %v2230_v28 = vadd.f32 %v2793_v27, %v2229_v1 }
0x20f9   :  { %v2234_v53 = vsel %vm2233_vm1, %v2793_v27, %v2230_v28 }
0x20fa   :  { %v2239_v30 = vsel %vm2236_vm2, %v2238_v29, %v2234_v53 }
0x20fb   :  { %v2242_v55 = vmul.f32 %v2239_v30, %v3623_v6  ;;  %v1340_v6 = vpop.f32.mrf.mxu0 }
0x20fc   :  { %v1341_v46 = vadd.f32 %v3634_v26, %v1340_v6 }
0x2158   :  { %v2245_v5 = vpop.permute.xlu0 %2244 }
0x2159   :  { %v2247_v8 = vmul.f32 %v2245_v5, %v2239_v30 }
0x215b   :  { %2249 = vrot.lane.b32.xlu2 %v2247_v8, %s2826_s0  ;;  %v2388_v8 = vld [vmem:[%s3721_s13 + $0x18] sm:$0xff] }
0x215c   :  { %2411 = vmatpush.msra.mxu0 %v2388_v8 }
0x2165   :  { %v2187_v35 = vpop.permute.xlu1 %2186 }
0x2166   :  { %v3649_v39 = vadd.f32 %v2187_v35, %v2179_v0  ;;  %v2387_v0 = vld [vmem:[%s3721_s13 + $0x10] sm:$0xff]  ;;  %v2386_v35 = vld [vmem:[%s3721_s13 + $0x8] sm:$0xff] }
0x2167   :  { %2412 = vmatpush.msra.mxu0 %v2387_v0 }
0x2168   :  { %2794 = vtanh.f32 %v3649_v39 }
0x2169   :  { %2413 = vmatpush.msra.mxu0 %v2386_v35 }
0x216e   :  { %v2795_v32 = vpop.eup %2794 }
0x216f   :  { %2192 = vrot.lane.b32.xlu0 %v2795_v32, %s2826_s0  ;;  %v2392_v32 = vld [vmem:[%s3721_s13 + $0x38] sm:$0xff] }
0x2170   :  { %2440 = vmatpush.msra.mxu1 %v2392_v32 }
0x21b5   :  { %v2250_v7 = vpop.permute.xlu2 %2249 }
0x21b6   :  { %v3654_v13 = vadd.f32 %v2250_v7, %v2242_v55  ;;  %v2391_v55 = vld [vmem:[%s3721_s13 + $0x30] sm:$0xff]  ;;  %v2390_v7 = vld [vmem:[%s3721_s13 + $0x28] sm:$0xff] }
0x21b7   :  { %2441 = vmatpush.msra.mxu1 %v2391_v55 }
0x21b8   :  { %2796 = vtanh.f32 %v3654_v13 }
0x21b9   :  { %2442 = vmatpush.msra.mxu1 %v2390_v7 }
0x21be   :  { %v2797_v9 = vpop.eup %2796 }
0x21bf   :  { %2255 = vrot.lane.b32.xlu1 %v2797_v9, %s2826_s0 }
0x21e1   :  { %v2193_v17 = vpop.permute.xlu0 %2192 }
0x21e2   :  { %v2195_v18 = vmul.f32 %v2193_v17, %v2176_v25 }
0x21e4   :  { %2260 = vrot.lane.b32.xlu2 %v2195_v18, %s2827_s6 }
0x2231   :  { %v2256_v20 = vpop.permute.xlu1 %2255 }
0x2232   :  { %v2258_v21 = vmul.f32 %v2256_v20, %v2239_v30 }
0x2234   :  { %2323 = vrot.lane.b32.xlu0 %v2258_v21, %s2827_s6  ;;  %v2557_v21 = vld [vmem:[%s3720_s14] ss:$0 sm:$0xff] }
0x223e   :  { %v2261_v33 = vpop.permute.xlu2 %2260 }
0x223f   :  { %2543 = vmatmul.msk.f32.vlgmr.msrb.gmra.mxu2 %vm185_vm9, %v2261_v33 }
0x22a6   :  { %v2324_v42 = vpop.permute.xlu0 %2323 }
0x22a7   :  { %2545 = vmatmul.msk.f32.vlgmr.msrb.gmra.mxu3 %vm185_vm9, %v2324_v42 }
0x22c2   :  { %v2281_v57 = vpop.f32.mrf.mxu2 }
0x22c3   :  { %v2284_v52 = vadd.f32 %v2281_v57, %v1341_v46 }
0x22c5   :  { %2798 = vtanh.f32 %v2284_v52  ;;  %v2544_v40 = vmul.f32 -1.442695, %v2284_v52 }
0x22c7   :  { %2800 = vpow2.f32 %v2544_v40 }
0x22cb   :  { %v2799_v19 = vpop.eup %2798 }
0x22cc   :  { %2307 = vrot.lane.b32.xlu1 %v2799_v19, %s2826_s0 }
0x22cd   :  { %v2801_v38 = vpop.eup %2800 }
0x22ce   :  { %v2288_v31 = vadd.f32 1.0, %v2801_v38 }
0x22d0   :  { %2802 = vrcp.f32 %v2288_v31  ;;  %v2300_v49 = vand.u32 2147483648, %v2288_v31  ;;  %vm2294_vm4 = vweird.f32 %v2288_v31  ;;  %v2298_v15 = vand.u32 2147483647, %v2288_v31 }
0x22d2   :  { %v2301_v58 = vor.u32 1.1754944e-38, %v2300_v49  ;;  %vm2299_vm6 = vcmp.eq.f32.partialorder %v2298_v15, 8.507059e+37 }
0x22d6   :  { %v2803_v37 = vpop.eup %2802 }
0x22d7   :  { %v2290_v51 = vmul.f32 %v2803_v37, %v2288_v31  ;;  %vm2295_vm3 = vweird.f32 %v2803_v37 }
0x22d8   :  { %vm2296_vm5 = vmor %vm2294_vm4, %vm2295_vm3 }
0x22d9   :  { %v2291_v26 = vsub.f32 1.0, %v2290_v51 }
0x22db   :  { %v2292_v43 = vmul.f32 %v2803_v37, %v2291_v26 }
0x22dd   :  { %v2293_v48 = vadd.f32 %v2803_v37, %v2292_v43 }
0x22df   :  { %v2297_v41 = vsel %vm2296_vm5, %v2803_v37, %v2293_v48 }
0x22e0   :  { %v2302_v22 = vsel %vm2299_vm6, %v2301_v58, %v2297_v41 }
0x22e1   :  { %v2305_v47 = vmul.f32 %v2302_v22, %v3649_v39  ;;  %v2385_v39 = vld [vmem:[%s3721_s13] sm:$0xff] }
0x22e2   :  { %2414 = vmatpush.msra.mxu0 %v2385_v39 }
0x232a   :  { %v2344_v34 = vpop.f32.mrf.mxu3 }
0x232b   :  { %v2347_v50 = vadd.f32 %v2344_v34, %v1364_v45 }
0x232d   :  { %2804 = vtanh.f32 %v2347_v50  ;;  %v2546_v60 = vmul.f32 -1.442695, %v2347_v50 }
0x232f   :  { %2806 = vpow2.f32 %v2546_v60 }
0x2333   :  { %v2805_v54 = vpop.eup %2804 }
0x2334   :  { %2370 = vrot.lane.b32.xlu2 %v2805_v54, %s2826_s0 }
0x2335   :  { %v2807_v2 = vpop.eup %2806 }
0x2336   :  { %v2351_v11 = vadd.f32 1.0, %v2807_v2 }
0x2338   :  { %2808 = vrcp.f32 %v2351_v11  ;;  %v2363_v14 = vand.u32 2147483648, %v2351_v11  ;;  %vm2357_vm8 = vweird.f32 %v2351_v11  ;;  %v2361_v25 = vand.u32 2147483647, %v2351_v11 }
0x233a   :  { %v2364_v62 = vor.u32 1.1754944e-38, %v2363_v14  ;;  %vm2362_vm11 = vcmp.eq.f32.partialorder %v2361_v25, 8.507059e+37 }
0x233e   :  { %v2308_v59 = vpop.permute.xlu1 %2307  ;;  %v2809_v4 = vpop.eup %2808 }
0x233f   :  { %v2310_v56 = vmul.f32 %v2308_v59, %v2302_v22  ;;  %v2353_v24 = vmul.f32 %v2809_v4, %v2351_v11  ;;  %vm2358_vm7 = vweird.f32 %v2809_v4 }
0x2340   :  { %vm2359_vm10 = vmor %vm2357_vm8, %vm2358_vm7 }
0x2341   :  { %2312 = vrot.lane.b32.xlu0 %v2310_v56, %s2826_s0  ;;  %v2354_v10 = vsub.f32 1.0, %v2353_v24 }
0x2343   :  { %v2355_v16 = vmul.f32 %v2809_v4, %v2354_v10 }
0x2345   :  { %v2356_v12 = vadd.f32 %v2809_v4, %v2355_v16 }
0x2347   :  { %v2360_v61 = vsel %vm2359_vm10, %v2809_v4, %v2356_v12 }
0x2348   :  { %v2365_v63 = vsel %vm2362_vm11, %v2364_v62, %v2360_v61 }
0x2349   :  { %v2368_v3 = vmul.f32 %v2365_v63, %v3654_v13  ;;  %v2389_v13 = vld [vmem:[%s3721_s13 + $0x20] sm:$0xff] }
0x234a   :  { %2443 = vmatpush.msra.mxu1 %v2389_v13 }
0x238e   :  { %v2371_v44 = vpop.permute.xlu2 %2370 }
0x238f   :  { %v2373_v27 = vmul.f32 %v2371_v44, %v2365_v63 }
0x2391   :  { %2375 = vrot.lane.b32.xlu1 %v2373_v27, %s2826_s0 }
0x23b3   :  { %v2313_v36 = vpop.permute.xlu0 %2312 }
0x23b4   :  { %v2315_v1 = vadd.f32 %v2313_v36, %v2305_v47 }
0x23b6   :  { %2810 = vtanh.f32 %v2315_v1 }
0x23bc   :  { %v2811_v28 = vpop.eup %2810 }
0x23bd   :  { %2318 = vrot.lane.b32.xlu2 %v2811_v28, %s2826_s0 }
0x2403   :  { %v2376_v23 = vpop.permute.xlu1 %2375 }
0x2404   :  { %v2378_v53 = vadd.f32 %v2376_v23, %v2368_v3 }
0x2406   :  { %2812 = vtanh.f32 %v2378_v53 }
0x240c   :  { %v2813_v29 = vpop.eup %2812 }
0x240d   :  { %2381 = vrot.lane.b32.xlu0 %v2813_v29, %s2826_s0 }
0x2417   :  { %v2319_v5 = vpop.permute.xlu2 %2318 }
0x2418   :  { %v2321_v30 = vmul.f32 %v2319_v5, %v2302_v22 }
0x241a   :  { %2395 = vrot.lane.b32.xlu1 %v2321_v30, %s2827_s6 }
0x247f   :  { %v2382_v9 = vpop.permute.xlu0 %2381 }
0x2480   :  { %v2384_v17 = vmul.f32 %v2382_v9, %v2365_v63 }
0x2482   :  { %2424 = vrot.lane.b32.xlu2 %v2384_v17, %s2827_s6 }
0x248c   :  { %v2396_v18 = vpop.permute.xlu1 %2395 }
0x248d   :  { %2547 = vmatmul.msk.f32.vlgmr.msra.gmra.mxu0 %vm185_vm9, %v2396_v18 }
0x24dc   :  { %v2425_v20 = vpop.permute.xlu2 %2424 }
0x24dd   :  { %2548 = vmatmul.msk.f32.vlgmr.msra.gmra.mxu1 %vm185_vm9, %v2425_v20 }
0x250a   :  { %v2416_v33 = vpop.f32.mrf.mxu0 }
0x250b   :  { %v2422_v42 = vadd.f32 %v2557_v21, %v2416_v33 }
0x255a   :  { %v2445_v6 = vpop.f32.mrf.mxu1 }
0x255b   :  { %v2448_v46 = vadd.f32 %v2445_v6, %v2422_v42 }
0x255d   :  { %2450 = vst.msk [vmem:[%s3722_s15] sm:$0xff] %vm2449_vm12, %v2448_v46 }

</bundles_post_ra>
